<compile_context>
chip_gen: v7x
topology: tpu7x:2x2x1
jax: 0.10.0
libtpu: 0.0.40
codegen_flags: <defaults>
</compile_context>

<pallas_src>
import functools

import jax
import jax.numpy as jnp
from jax.experimental import pallas as pl
from jax.experimental.pallas import tpu as pltpu

_LANE = 128
_SUB = 8


def _nerf_pe_kernel(x_ref, o_ref, *, freqs):
    # x_ref: (D, rows, 128)   lane/sublane-dense block of the transposed input
    # o_ref: (P, D, rows, 128) with P = 1 + 2*len(freqs)
    x = x_ref[...].astype(jnp.float32)          # force f32 math even for bf16 I/O
    o_ref[0] = x.astype(o_ref.dtype)            # include_input part
    for m, f in enumerate(freqs):               # freqs are static -> unrolled
        xf = x * jnp.float32(f)
        o_ref[2 * m + 1] = jnp.sin(xf).astype(o_ref.dtype)
        o_ref[2 * m + 2] = jnp.cos(xf).astype(o_ref.dtype)


def _freq_bands(multires, log_sampling):
    max_freq = multires - 1
    n_freqs = multires
    if log_sampling:
        if n_freqs == 1:
            freqs = [1.0]
        else:
            freqs = [2.0 ** (max_freq * i / (n_freqs - 1)) for i in range(n_freqs)]
    else:
        lo, hi = 2.0 ** 0.0, 2.0 ** max_freq
        if n_freqs == 1:
            freqs = [lo]
        else:
            freqs = [lo + (hi - lo) * i / (n_freqs - 1) for i in range(n_freqs)]
    return tuple(float(f) for f in freqs)


def nerf_positional_embedding(x, multires, log_sampling=True, tile_n=2048):
    """JAX/Pallas equivalent of Nerf_positional_embedding.forward.

    x: (1, N, D) or (N, D) float array.  Returns (N, D*(1+2*multires)).
    """
    if x.ndim == 3:
        x = jnp.squeeze(x, axis=0)
    assert x.ndim == 2, f"Expected 2D input (got {x.ndim}D input)"
    N, D = x.shape
    out_dtype = x.dtype

    freqs = _freq_bands(multires, log_sampling)
    n_freqs = len(freqs)
    P = 1 + 2 * n_freqs

    # Tile over N: tile_n rows per grid step.  Must be a multiple of 8*128 so
    # the reshaped (rows, 128) block is sublane/lane dense (use >= 16*128 if
    # you switch to bf16 I/O).
    tile_n = max(_SUB * _LANE, (int(tile_n) // (_SUB * _LANE)) * (_SUB * _LANE))
    n_steps = pl.cdiv(N, tile_n)
    N_pad = n_steps * tile_n
    rows = tile_n // _LANE          # sublane rows per block
    NB = N_pad // _LANE             # total sublane rows

    # Lane-dense layout: (N, D) -> (D, N_pad) -> (D, NB, 128); every block's
    # fast axis is 128 distinct points.
    xt = jnp.transpose(x, (1, 0))
    if N_pad != N:
        xt = jnp.pad(xt, ((0, 0), (0, N_pad - N)))
    xr = xt.reshape(D, NB, _LANE)

    kernel = functools.partial(_nerf_pe_kernel, freqs=freqs)

    itemsize = int(jnp.dtype(out_dtype).itemsize)
    cost = pl.CostEstimate(
        flops=2 * n_freqs * N * D,
        transcendentals=2 * n_freqs * N * D,
        bytes_accessed=itemsize * N * D * (2 + 2 * n_freqs),
    )

    out = pl.pallas_call(
        kernel,
        out_shape=jax.ShapeDtypeStruct((P, D, NB, _LANE), out_dtype),
        grid_spec=pltpu.PrefetchScalarGridSpec(
            num_scalar_prefetch=0,
            grid=(n_steps,),
            in_specs=[pl.BlockSpec((D, rows, _LANE), lambda i: (0, i, 0))],
            out_specs=pl.BlockSpec((P, D, rows, _LANE), lambda i: (0, 0, i, 0)),
        ),
        compiler_params=pltpu.CompilerParams(
            dimension_semantics=("parallel",),
            vmem_limit_bytes=32 * 1024 * 1024,
        ),
        cost_estimate=cost,
    )(xr)

    # (P, D, NB, 128) -> (P, D, N) -> (N, P, D) -> (N, P*D)  (layout plumbing)
    out = out.reshape(P, D, N_pad)[:, :, :N]
    out = jnp.transpose(out, (2, 0, 1)).reshape(N, P * D)
    return out


def _reference(x, multires, log_sampling=True):
    x = jnp.squeeze(x, axis=0) if x.ndim == 3 else x
    max_freq = multires - 1
    if log_sampling:
        freq_bands = 2.0 ** jnp.linspace(0.0, max_freq, multires)
    else:
        freq_bands = jnp.linspace(2.0 ** 0.0, 2.0 ** max_freq, multires)
    out = [x]
    for f in freq_bands:
        out.append(jnp.sin(x * f))
        out.append(jnp.cos(x * f))
    return jnp.concatenate(out, axis=1)


if __name__ == "__main__":
    multires = 10        # typical NeRF setting for xyz coordinates
    N, D = 2500, 3       # small, not a multiple of the tile -> exercises padding
    key = jax.random.PRNGKey(0)
    # (1, N, D) like the PyTorch module expects before squeeze(0)
    x = jax.random.normal(key, (1, N, D), dtype=jnp.float32)

    fn = jax.jit(functools.partial(
        nerf_positional_embedding, multires=multires, log_sampling=True,
        tile_n=1024))      # tile_n=1024 -> 3 parallel grid steps at N=2500
    out = jax.block_until_ready(fn(x))

    ref = _reference(x, multires, log_sampling=True)
    assert out.shape == (N, D * (1 + 2 * multires)), out.shape
    max_err = float(jnp.max(jnp.abs(out - ref)))
    assert jnp.allclose(out, ref, atol=1e-5, rtol=1e-5), max_err

    print("KERNEL_OK")
</pallas_src>

<mosaic_0001>
module attributes {stable_mosaic.version = 11 : i64} {
  func.func @_nerf_pe_kernel(%arg0: i32, %arg1: memref<3x8x128xf32, #tpu.memory_space<vmem>>, %arg2: memref<21x3x8x128xf32, #tpu.memory_space<vmem>>) attributes {dimension_semantics = [#tpu.dimension_semantics<parallel>], iteration_bounds = array<i64: 3>, scalar_prefetch = 0 : i64, scratch_operands = 0 : i64, tpu.core_type = #tpu.core_type<tc>, window_params = [{transform_indices = @transform_0, window_bounds = array<i64: 3, 8, 128>}, {transform_indices = @transform_1, window_bounds = array<i64: 21, 3, 8, 128>}]} {
    %c0 = arith.constant 0 : index
    %c0_0 = arith.constant 0 : index
    %c0_1 = arith.constant 0 : index
    %0 = vector.load %arg1[%c0, %c0_0, %c0_1] : memref<3x8x128xf32, #tpu.memory_space<vmem>>, vector<3x8x128xf32>
    %c0_2 = arith.constant 0 : index
    %c0_3 = arith.constant 0 : index
    %c0_4 = arith.constant 0 : index
    %c0_5 = arith.constant 0 : index
    %1 = vector.load %arg2[%c0_2, %c0_3, %c0_4, %c0_5] : memref<21x3x8x128xf32, #tpu.memory_space<vmem>>, vector<1x3x8x128xf32>
    %2 = vector.shape_cast %1 : vector<1x3x8x128xf32> to vector<3x8x128xf32>
    %3 = vector.shape_cast %0 : vector<3x8x128xf32> to vector<1x3x8x128xf32>
    tpu.vector_store %arg2[%c0_2, %c0_3, %c0_4, %c0_5], %3 {strides = array<i32>} : memref<21x3x8x128xf32, #tpu.memory_space<vmem>>, vector<1x3x8x128xf32>,
    %cst = arith.constant 1.000000e+00 : f32
    %4 = vector.broadcast %cst : f32 to vector<3x8x128xf32>
    %5 = arith.mulf %0, %4 : vector<3x8x128xf32>
    %6 = math.sin %5 : vector<3x8x128xf32>
    %c1 = arith.constant 1 : index
    %c0_6 = arith.constant 0 : index
    %c0_7 = arith.constant 0 : index
    %c0_8 = arith.constant 0 : index
    %7 = vector.load %arg2[%c1, %c0_6, %c0_7, %c0_8] : memref<21x3x8x128xf32, #tpu.memory_space<vmem>>, vector<1x3x8x128xf32>
    %8 = vector.shape_cast %7 : vector<1x3x8x128xf32> to vector<3x8x128xf32>
    %9 = vector.shape_cast %6 : vector<3x8x128xf32> to vector<1x3x8x128xf32>
    tpu.vector_store %arg2[%c1, %c0_6, %c0_7, %c0_8], %9 {strides = array<i32>} : memref<21x3x8x128xf32, #tpu.memory_space<vmem>>, vector<1x3x8x128xf32>,
    %10 = math.cos %5 : vector<3x8x128xf32>
    %c2 = arith.constant 2 : index
    %c0_9 = arith.constant 0 : index
    %c0_10 = arith.constant 0 : index
    %c0_11 = arith.constant 0 : index
    %11 = vector.load %arg2[%c2, %c0_9, %c0_10, %c0_11] : memref<21x3x8x128xf32, #tpu.memory_space<vmem>>, vector<1x3x8x128xf32>
    %12 = vector.shape_cast %11 : vector<1x3x8x128xf32> to vector<3x8x128xf32>
    %13 = vector.shape_cast %10 : vector<3x8x128xf32> to vector<1x3x8x128xf32>
    tpu.vector_store %arg2[%c2, %c0_9, %c0_10, %c0_11], %13 {strides = array<i32>} : memref<21x3x8x128xf32, #tpu.memory_space<vmem>>, vector<1x3x8x128xf32>,
    %cst_12 = arith.constant 2.000000e+00 : f32
    %14 = vector.broadcast %cst_12 : f32 to vector<3x8x128xf32>
    %15 = arith.mulf %0, %14 : vector<3x8x128xf32>
    %16 = math.sin %15 : vector<3x8x128xf32>
    %c3 = arith.constant 3 : index
    %c0_13 = arith.constant 0 : index
    %c0_14 = arith.constant 0 : index
    %c0_15 = arith.constant 0 : index
    %17 = vector.load %arg2[%c3, %c0_13, %c0_14, %c0_15] : memref<21x3x8x128xf32, #tpu.memory_space<vmem>>, vector<1x3x8x128xf32>
    %18 = vector.shape_cast %17 : vector<1x3x8x128xf32> to vector<3x8x128xf32>
    %19 = vector.shape_cast %16 : vector<3x8x128xf32> to vector<1x3x8x128xf32>
    tpu.vector_store %arg2[%c3, %c0_13, %c0_14, %c0_15], %19 {strides = array<i32>} : memref<21x3x8x128xf32, #tpu.memory_space<vmem>>, vector<1x3x8x128xf32>,
    %20 = math.cos %15 : vector<3x8x128xf32>
    %c4 = arith.constant 4 : index
    %c0_16 = arith.constant 0 : index
    %c0_17 = arith.constant 0 : index
    %c0_18 = arith.constant 0 : index
    %21 = vector.load %arg2[%c4, %c0_16, %c0_17, %c0_18] : memref<21x3x8x128xf32, #tpu.memory_space<vmem>>, vector<1x3x8x128xf32>
    %22 = vector.shape_cast %21 : vector<1x3x8x128xf32> to vector<3x8x128xf32>
    %23 = vector.shape_cast %20 : vector<3x8x128xf32> to vector<1x3x8x128xf32>
    tpu.vector_store %arg2[%c4, %c0_16, %c0_17, %c0_18], %23 {strides = array<i32>} : memref<21x3x8x128xf32, #tpu.memory_space<vmem>>, vector<1x3x8x128xf32>,
    %cst_19 = arith.constant 4.000000e+00 : f32
    %24 = vector.broadcast %cst_19 : f32 to vector<3x8x128xf32>
    %25 = arith.mulf %0, %24 : vector<3x8x128xf32>
    %26 = math.sin %25 : vector<3x8x128xf32>
    %c5 = arith.constant 5 : index
    %c0_20 = arith.constant 0 : index
    %c0_21 = arith.constant 0 : index
    %c0_22 = arith.constant 0 : index
    %27 = vector.load %arg2[%c5, %c0_20, %c0_21, %c0_22] : memref<21x3x8x128xf32, #tpu.memory_space<vmem>>, vector<1x3x8x128xf32>
    %28 = vector.shape_cast %27 : vector<1x3x8x128xf32> to vector<3x8x128xf32>
    %29 = vector.shape_cast %26 : vector<3x8x128xf32> to vector<1x3x8x128xf32>
    tpu.vector_store %arg2[%c5, %c0_20, %c0_21, %c0_22], %29 {strides = array<i32>} : memref<21x3x8x128xf32, #tpu.memory_space<vmem>>, vector<1x3x8x128xf32>,
    %30 = math.cos %25 : vector<3x8x128xf32>
    %c6 = arith.constant 6 : index
    %c0_23 = arith.constant 0 : index
    %c0_24 = arith.constant 0 : index
    %c0_25 = arith.constant 0 : index
    %31 = vector.load %arg2[%c6, %c0_23, %c0_24, %c0_25] : memref<21x3x8x128xf32, #tpu.memory_space<vmem>>, vector<1x3x8x128xf32>
    %32 = vector.shape_cast %31 : vector<1x3x8x128xf32> to vector<3x8x128xf32>
    %33 = vector.shape_cast %30 : vector<3x8x128xf32> to vector<1x3x8x128xf32>
    tpu.vector_store %arg2[%c6, %c0_23, %c0_24, %c0_25], %33 {strides = array<i32>} : memref<21x3x8x128xf32, #tpu.memory_space<vmem>>, vector<1x3x8x128xf32>,
    %cst_26 = arith.constant 8.000000e+00 : f32
    %34 = vector.broadcast %cst_26 : f32 to vector<3x8x128xf32>
    %35 = arith.mulf %0, %34 : vector<3x8x128xf32>
    %36 = math.sin %35 : vector<3x8x128xf32>
    %c7 = arith.constant 7 : index
    %c0_27 = arith.constant 0 : index
    %c0_28 = arith.constant 0 : index
    %c0_29 = arith.constant 0 : index
    %37 = vector.load %arg2[%c7, %c0_27, %c0_28, %c0_29] : memref<21x3x8x128xf32, #tpu.memory_space<vmem>>, vector<1x3x8x128xf32>
    %38 = vector.shape_cast %37 : vector<1x3x8x128xf32> to vector<3x8x128xf32>
    %39 = vector.shape_cast %36 : vector<3x8x128xf32> to vector<1x3x8x128xf32>
    tpu.vector_store %arg2[%c7, %c0_27, %c0_28, %c0_29], %39 {strides = array<i32>} : memref<21x3x8x128xf32, #tpu.memory_space<vmem>>, vector<1x3x8x128xf32>,
    %40 = math.cos %35 : vector<3x8x128xf32>
    %c8 = arith.constant 8 : index
    %c0_30 = arith.constant 0 : index
    %c0_31 = arith.constant 0 : index
    %c0_32 = arith.constant 0 : index
    %41 = vector.load %arg2[%c8, %c0_30, %c0_31, %c0_32] : memref<21x3x8x128xf32, #tpu.memory_space<vmem>>, vector<1x3x8x128xf32>
    %42 = vector.shape_cast %41 : vector<1x3x8x128xf32> to vector<3x8x128xf32>
    %43 = vector.shape_cast %40 : vector<3x8x128xf32> to vector<1x3x8x128xf32>
    tpu.vector_store %arg2[%c8, %c0_30, %c0_31, %c0_32], %43 {strides = array<i32>} : memref<21x3x8x128xf32, #tpu.memory_space<vmem>>, vector<1x3x8x128xf32>,
    %cst_33 = arith.constant 1.600000e+01 : f32
    %44 = vector.broadcast %cst_33 : f32 to vector<3x8x128xf32>
    %45 = arith.mulf %0, %44 : vector<3x8x128xf32>
    %46 = math.sin %45 : vector<3x8x128xf32>
    %c9 = arith.constant 9 : index
    %c0_34 = arith.constant 0 : index
    %c0_35 = arith.constant 0 : index
    %c0_36 = arith.constant 0 : index
    %47 = vector.load %arg2[%c9, %c0_34, %c0_35, %c0_36] : memref<21x3x8x128xf32, #tpu.memory_space<vmem>>, vector<1x3x8x128xf32>
    %48 = vector.shape_cast %47 : vector<1x3x8x128xf32> to vector<3x8x128xf32>
    %49 = vector.shape_cast %46 : vector<3x8x128xf32> to vector<1x3x8x128xf32>
    tpu.vector_store %arg2[%c9, %c0_34, %c0_35, %c0_36], %49 {strides = array<i32>} : memref<21x3x8x128xf32, #tpu.memory_space<vmem>>, vector<1x3x8x128xf32>,
    %50 = math.cos %45 : vector<3x8x128xf32>
    %c10 = arith.constant 10 : index
    %c0_37 = arith.constant 0 : index
    %c0_38 = arith.constant 0 : index
    %c0_39 = arith.constant 0 : index
    %51 = vector.load %arg2[%c10, %c0_37, %c0_38, %c0_39] : memref<21x3x8x128xf32, #tpu.memory_space<vmem>>, vector<1x3x8x128xf32>
    %52 = vector.shape_cast %51 : vector<1x3x8x128xf32> to vector<3x8x128xf32>
    %53 = vector.shape_cast %50 : vector<3x8x128xf32> to vector<1x3x8x128xf32>
    tpu.vector_store %arg2[%c10, %c0_37, %c0_38, %c0_39], %53 {strides = array<i32>} : memref<21x3x8x128xf32, #tpu.memory_space<vmem>>, vector<1x3x8x128xf32>,
    %cst_40 = arith.constant 3.200000e+01 : f32
    %54 = vector.broadcast %cst_40 : f32 to vector<3x8x128xf32>
    %55 = arith.mulf %0, %54 : vector<3x8x128xf32>
    %56 = math.sin %55 : vector<3x8x128xf32>
    %c11 = arith.constant 11 : index
    %c0_41 = arith.constant 0 : index
    %c0_42 = arith.constant 0 : index
    %c0_43 = arith.constant 0 : index
    %57 = vector.load %arg2[%c11, %c0_41, %c0_42, %c0_43] : memref<21x3x8x128xf32, #tpu.memory_space<vmem>>, vector<1x3x8x128xf32>
    %58 = vector.shape_cast %57 : vector<1x3x8x128xf32> to vector<3x8x128xf32>
    %59 = vector.shape_cast %56 : vector<3x8x128xf32> to vector<1x3x8x128xf32>
    tpu.vector_store %arg2[%c11, %c0_41, %c0_42, %c0_43], %59 {strides = array<i32>} : memref<21x3x8x128xf32, #tpu.memory_space<vmem>>, vector<1x3x8x128xf32>,
    %60 = math.cos %55 : vector<3x8x128xf32>
    %c12 = arith.constant 12 : index
    %c0_44 = arith.constant 0 : index
    %c0_45 = arith.constant 0 : index
    %c0_46 = arith.constant 0 : index
    %61 = vector.load %arg2[%c12, %c0_44, %c0_45, %c0_46] : memref<21x3x8x128xf32, #tpu.memory_space<vmem>>, vector<1x3x8x128xf32>
    %62 = vector.shape_cast %61 : vector<1x3x8x128xf32> to vector<3x8x128xf32>
    %63 = vector.shape_cast %60 : vector<3x8x128xf32> to vector<1x3x8x128xf32>
    tpu.vector_store %arg2[%c12, %c0_44, %c0_45, %c0_46], %63 {strides = array<i32>} : memref<21x3x8x128xf32, #tpu.memory_space<vmem>>, vector<1x3x8x128xf32>,
    %cst_47 = arith.constant 6.400000e+01 : f32
    %64 = vector.broadcast %cst_47 : f32 to vector<3x8x128xf32>
    %65 = arith.mulf %0, %64 : vector<3x8x128xf32>
    %66 = math.sin %65 : vector<3x8x128xf32>
    %c13 = arith.constant 13 : index
    %c0_48 = arith.constant 0 : index
    %c0_49 = arith.constant 0 : index
    %c0_50 = arith.constant 0 : index
    %67 = vector.load %arg2[%c13, %c0_48, %c0_49, %c0_50] : memref<21x3x8x128xf32, #tpu.memory_space<vmem>>, vector<1x3x8x128xf32>
    %68 = vector.shape_cast %67 : vector<1x3x8x128xf32> to vector<3x8x128xf32>
    %69 = vector.shape_cast %66 : vector<3x8x128xf32> to vector<1x3x8x128xf32>
    tpu.vector_store %arg2[%c13, %c0_48, %c0_49, %c0_50], %69 {strides = array<i32>} : memref<21x3x8x128xf32, #tpu.memory_space<vmem>>, vector<1x3x8x128xf32>,
    %70 = math.cos %65 : vector<3x8x128xf32>
    %c14 = arith.constant 14 : index
    %c0_51 = arith.constant 0 : index
    %c0_52 = arith.constant 0 : index
    %c0_53 = arith.constant 0 : index
    %71 = vector.load %arg2[%c14, %c0_51, %c0_52, %c0_53] : memref<21x3x8x128xf32, #tpu.memory_space<vmem>>, vector<1x3x8x128xf32>
    %72 = vector.shape_cast %71 : vector<1x3x8x128xf32> to vector<3x8x128xf32>
    %73 = vector.shape_cast %70 : vector<3x8x128xf32> to vector<1x3x8x128xf32>
    tpu.vector_store %arg2[%c14, %c0_51, %c0_52, %c0_53], %73 {strides = array<i32>} : memref<21x3x8x128xf32, #tpu.memory_space<vmem>>, vector<1x3x8x128xf32>,
    %cst_54 = arith.constant 1.280000e+02 : f32
    %74 = vector.broadcast %cst_54 : f32 to vector<3x8x128xf32>
    %75 = arith.mulf %0, %74 : vector<3x8x128xf32>
    %76 = math.sin %75 : vector<3x8x128xf32>
    %c15 = arith.constant 15 : index
    %c0_55 = arith.constant 0 : index
    %c0_56 = arith.constant 0 : index
    %c0_57 = arith.constant 0 : index
    %77 = vector.load %arg2[%c15, %c0_55, %c0_56, %c0_57] : memref<21x3x8x128xf32, #tpu.memory_space<vmem>>, vector<1x3x8x128xf32>
    %78 = vector.shape_cast %77 : vector<1x3x8x128xf32> to vector<3x8x128xf32>
    %79 = vector.shape_cast %76 : vector<3x8x128xf32> to vector<1x3x8x128xf32>
    tpu.vector_store %arg2[%c15, %c0_55, %c0_56, %c0_57], %79 {strides = array<i32>} : memref<21x3x8x128xf32, #tpu.memory_space<vmem>>, vector<1x3x8x128xf32>,
    %80 = math.cos %75 : vector<3x8x128xf32>
    %c16 = arith.constant 16 : index
    %c0_58 = arith.constant 0 : index
    %c0_59 = arith.constant 0 : index
    %c0_60 = arith.constant 0 : index
    %81 = vector.load %arg2[%c16, %c0_58, %c0_59, %c0_60] : memref<21x3x8x128xf32, #tpu.memory_space<vmem>>, vector<1x3x8x128xf32>
    %82 = vector.shape_cast %81 : vector<1x3x8x128xf32> to vector<3x8x128xf32>
    %83 = vector.shape_cast %80 : vector<3x8x128xf32> to vector<1x3x8x128xf32>
    tpu.vector_store %arg2[%c16, %c0_58, %c0_59, %c0_60], %83 {strides = array<i32>} : memref<21x3x8x128xf32, #tpu.memory_space<vmem>>, vector<1x3x8x128xf32>,
    %cst_61 = arith.constant 2.560000e+02 : f32
    %84 = vector.broadcast %cst_61 : f32 to vector<3x8x128xf32>
    %85 = arith.mulf %0, %84 : vector<3x8x128xf32>
    %86 = math.sin %85 : vector<3x8x128xf32>
    %c17 = arith.constant 17 : index
    %c0_62 = arith.constant 0 : index
    %c0_63 = arith.constant 0 : index
    %c0_64 = arith.constant 0 : index
    %87 = vector.load %arg2[%c17, %c0_62, %c0_63, %c0_64] : memref<21x3x8x128xf32, #tpu.memory_space<vmem>>, vector<1x3x8x128xf32>
    %88 = vector.shape_cast %87 : vector<1x3x8x128xf32> to vector<3x8x128xf32>
    %89 = vector.shape_cast %86 : vector<3x8x128xf32> to vector<1x3x8x128xf32>
    tpu.vector_store %arg2[%c17, %c0_62, %c0_63, %c0_64], %89 {strides = array<i32>} : memref<21x3x8x128xf32, #tpu.memory_space<vmem>>, vector<1x3x8x128xf32>,
    %90 = math.cos %85 : vector<3x8x128xf32>
    %c18 = arith.constant 18 : index
    %c0_65 = arith.constant 0 : index
    %c0_66 = arith.constant 0 : index
    %c0_67 = arith.constant 0 : index
    %91 = vector.load %arg2[%c18, %c0_65, %c0_66, %c0_67] : memref<21x3x8x128xf32, #tpu.memory_space<vmem>>, vector<1x3x8x128xf32>
    %92 = vector.shape_cast %91 : vector<1x3x8x128xf32> to vector<3x8x128xf32>
    %93 = vector.shape_cast %90 : vector<3x8x128xf32> to vector<1x3x8x128xf32>
    tpu.vector_store %arg2[%c18, %c0_65, %c0_66, %c0_67], %93 {strides = array<i32>} : memref<21x3x8x128xf32, #tpu.memory_space<vmem>>, vector<1x3x8x128xf32>,
    %cst_68 = arith.constant 5.120000e+02 : f32
    %94 = vector.broadcast %cst_68 : f32 to vector<3x8x128xf32>
    %95 = arith.mulf %0, %94 : vector<3x8x128xf32>
    %96 = math.sin %95 : vector<3x8x128xf32>
    %c19 = arith.constant 19 : index
    %c0_69 = arith.constant 0 : index
    %c0_70 = arith.constant 0 : index
    %c0_71 = arith.constant 0 : index
    %97 = vector.load %arg2[%c19, %c0_69, %c0_70, %c0_71] : memref<21x3x8x128xf32, #tpu.memory_space<vmem>>, vector<1x3x8x128xf32>
    %98 = vector.shape_cast %97 : vector<1x3x8x128xf32> to vector<3x8x128xf32>
    %99 = vector.shape_cast %96 : vector<3x8x128xf32> to vector<1x3x8x128xf32>
    tpu.vector_store %arg2[%c19, %c0_69, %c0_70, %c0_71], %99 {strides = array<i32>} : memref<21x3x8x128xf32, #tpu.memory_space<vmem>>, vector<1x3x8x128xf32>,
    %100 = math.cos %95 : vector<3x8x128xf32>
    %c20 = arith.constant 20 : index
    %c0_72 = arith.constant 0 : index
    %c0_73 = arith.constant 0 : index
    %c0_74 = arith.constant 0 : index
    %101 = vector.load %arg2[%c20, %c0_72, %c0_73, %c0_74] : memref<21x3x8x128xf32, #tpu.memory_space<vmem>>, vector<1x3x8x128xf32>
    %102 = vector.shape_cast %101 : vector<1x3x8x128xf32> to vector<3x8x128xf32>
    %103 = vector.shape_cast %100 : vector<3x8x128xf32> to vector<1x3x8x128xf32>
    tpu.vector_store %arg2[%c20, %c0_72, %c0_73, %c0_74], %103 {strides = array<i32>} : memref<21x3x8x128xf32, #tpu.memory_space<vmem>>, vector<1x3x8x128xf32>,
    return
  }
  func.func @transform_0(%arg0: i32) -> (i32, i32, i32) {
    %c0_i32 = arith.constant 0 : i32
    %c0_i32_0 = arith.constant 0 : i32
    %c0_i32_1 = arith.constant 0 : i32
    return %c0_i32, %arg0, %c0_i32_0 : i32, i32, i32
  }
  func.func @transform_1(%arg0: i32) -> (i32, i32, i32, i32) {
    %c0_i32 = arith.constant 0 : i32
    %c0_i32_0 = arith.constant 0 : i32
    %c0_i32_1 = arith.constant 0 : i32
    %c0_i32_2 = arith.constant 0 : i32
    return %c0_i32, %c0_i32_0, %arg0, %c0_i32_1 : i32, i32, i32, i32
  }
}

</mosaic_0001>

<bundles_post_ra>
// kernel: nerf_positional_embedding.1
= control target key start
LH: loop header
LB: loop body
LE: loop exit
PB: predicated region body
PF: predicated region fallthrough
CT: control target
= control target key end

     0   :  { %s7455_s6 = smov 0   ;;  %s7457_s7 = smov 0   ;;  %s10637_s0 = inlined_call_operand.vmem [shape: f32[3,24,128], index: 0, kind: input, shape index: {}]   ;;  %s10638_s1 = inlined_call_operand.vmem [shape: f32[21,3,24,128], index: 1, kind: output, shape index: {}]  }
   0x1   :  { %s7459_s8 = smov 0  }
   0x2 LB: > { %s6821_s9 = sadd.s32 4294967295, %s7437_s8   ;;  %s7472_s10 = sadd.s32 1, %s7437_s8   ;;  %s7437_s8 = sphi %s7459_s8, %s10703_s8   ;;  %s7433_s7 = sphi %s7457_s7, %s10702_s7   ;;  %s7429_s6 = sphi %s7455_s6, %s10701_s6  }
   0x3   : > { %s15_s11 = ssub.s32 %s7437_s8, %s7472_s10  ;;  %s18_s12 = sadd.s32 1, %s7433_s7 }
   0x4   : > { %p16_p0 = scmp.eq.s32.totalorder %s15_s11, 0  ;;  %p25_p1 = scmp.ne.s32.totalorder %s7433_s7, %s7429_s6 }
   0x5   : > { %p26_p2 = scmp.eq.s32.totalorder %s7437_s8, 0  ;;  %p55_p3 = scmp.eq.s32.totalorder %s6821_s9, 2 }
   0x6   : > { %s7483_s13 = scalar_select %p16_p0, %s7433_s7, %s18_s12  }
   0x7   : > { %p27_p4 = por %p26_p2, %p25_p1  ;;  %p7485_p5 = por %p55_p3, %p25_p1 }
   0x8   : > { %p6824_p6 = scmp.ge.s32.totalorder %s7437_s8, 3 }
   0xa   : > { %77 = sbr.rel (%p6824_p6) target bundleno = 24 (0x18), region = 16 }
  0x11   : > { %80 = sbr.rel (!%p27_p4) target bundleno = 24 (0x18), region = 20  ;;  %s82_s15 = sand.u32 (%p27_p4), 1, %s7433_s7  }
  0x12   : > { %s6825_s16 = sshll.u32 (%p27_p4), %s7437_s8, 3  ;;  %s7130_s17 = smul.u32 (%p27_p4), 24, %s82_s15 }
  0x13   : > { %s86_s20 = scalar_lea.vmem (%p27_p4), %s10637_s0, %s6825_s16 }
  0x14   : > { %v118_v0 = vld [vmem:[%s86_s20] sm:$0xff] (%p27_p4)  ;;  %v120_v1 = vld [vmem:[%s86_s20 + $0x18] sm:$0xff] (%p27_p4)  ;;  %v122_v2 = vld [vmem:[%s86_s20 + $0x30] sm:$0xff] (%p27_p4)  ;;  %s84_s21 = scalar_lea.vmem (%p27_p4), [#allocation2], %s7130_s17 }
  0x15   : > { %119 = vst [vmem:[%s84_s21] sm:$0xff] (%p27_p4), %v118_v0  ;;  %121 = vst [vmem:[%s84_s21 + $0x8] sm:$0xff] (%p27_p4), %v120_v1 }
  0x16   : > { %123 = vst [vmem:[%s84_s21 + $0x10] sm:$0xff] (%p27_p4), %v122_v2 }
  0x18 PF: > { %p6826_p7 = scmp.ge.s32.totalorder %s7437_s8, 1  ;;  %p128_p8 = scmp.lt.s32.totalorder %s7437_s8, 4 }
  0x1a   : > { %p129_p9 = pnand %p6826_p7, %p128_p8 }
  0x1b   : > { %s135_s22 = sand.u32 (!%p129_p9), 1, %s7429_s6   ;;  %v7439_v33 = vmov (!%p129_p9), 683565275   ;;  %v7440_v35 = vmov (!%p129_p9), 2475754826  }
  0x1c   : > { %132 = sbr.rel (%p129_p9) target bundleno = 875 (0x36b), region = 58  ;;  %v7441_v37 = vmov (!%p129_p9), 2131351028   ;;  %v7442_v39 = vmov (!%p129_p9), 2102212464  }
  0x1d   : > { %s7131_s23 = smul.u32 (!%p129_p9), 24, %s135_s22  ;;  %v7443_v41 = vmov (!%p129_p9), 920167782   ;;  %v7444_v49 = vmov (!%p129_p9), 1326507024  }
  0x1e   : > { %s7132_s24 = smul.u32 (!%p129_p9), 504, %s135_s22 }
  0x1f   : > { %s137_s25 = scalar_lea.vmem (!%p129_p9), [#allocation2], %s7131_s23 }
  0x20   : > { %v7498_v3 = vld [vmem:[%s137_s25] sm:$0xff] (!%p129_p9)  ;;  %v7500_v4 = vld [vmem:[%s137_s25 + $0x8] sm:$0xff] (!%p129_p9)  ;;  %v7502_v5 = vld [vmem:[%s137_s25 + $0x10] sm:$0xff] (!%p129_p9)  ;;  %s7504_s26 = scalar_lea.vmem (!%p129_p9), [#allocation3], %s7132_s24 }
  0x21   : > { %156 = vst [vmem:[%s7504_s26] sm:$0xff] (!%p129_p9), %v7498_v3  ;;  %157 = vst [vmem:[%s7504_s26 + $0x8] sm:$0xff] (!%p129_p9), %v7500_v4  ;;  %v159_v6 = vand.u32 (!%p129_p9), 2147483647, %v7498_v3  ;;  %v162_v7 = vand.u32 (!%p129_p9), 2139095040, %v7498_v3  ;;  %v263_v8 = vand.u32 (!%p129_p9), 2147483647, %v7500_v4 }
  0x22   : > { %158 = vst [vmem:[%s7504_s26 + $0x10] sm:$0xff] (!%p129_p9), %v7502_v5  ;;  %v266_v9 = vand.u32 (!%p129_p9), 2139095040, %v7500_v4  ;;  %v370_v14 = vand.u32 (!%p129_p9), 2139095040, %v7502_v5  ;;  %v367_v27 = vand.u32 (!%p129_p9), 2147483647, %v7502_v5  ;;  %vm161_vm13 = vcmp.lt.s32.totalorder (!%p129_p9), %v7498_v3, 0 }
  0x23   : > { %v163_v10 = vshrl.u32 %v162_v7, 23  ;;  %v166_v11 = vand.u32 8388607, %v159_v6  ;;  %v270_v13 = vand.u32 8388607, %v263_v8  ;;  %s7127_s27 = sshll.u32 (%p7485_p5), %s6821_s9, 3 }
  0x24   : > { %v267_v12 = vshrl.u32 %v266_v9, 23  ;;  %v371_v17 = vshrl.u32 %v370_v14, 23  ;;  %vm7628_vm15 = vcmp.le.f32.partialorder %v159_v6, 0.7853982  ;;  %s10502_s30 = scalar_lea.vmem (%p7485_p5), %s10638_s1, %s7127_s27 }
  0x25   : > { %v6827_v15 = vadd.s32 4294967169, %v163_v10  ;;  %v167_v19 = vor.u32 8388608, %v166_v11  ;;  %v271_v20 = vor.u32 8388608, %v270_v13 }
  0x26   : > { %v6831_v16 = vadd.s32 4294967169, %v267_v12  ;;  %v6835_v22 = vadd.s32 4294967169, %v371_v17 }
  0x27   : > { %v169_v18 = vadd.s32 1, %v6827_v15  ;;  %v7522_v28 = vshll.u32 %v167_v19, 8  ;;  %v7524_v30 = vshll.u32 %v271_v20, 8 }
  0x28   : > { %v273_v21 = vadd.s32 1, %v6831_v16  ;;  %v7526_v31 = vadd.s32 1, %v6835_v22 }
  0x29   : > { %vm170_vm0 = vcmp.gt.s32.totalorder %v169_v18, 0 }
  0x2a   : > { %v171_v23 = vsel %vm170_vm0, %v169_v18, 0  ;;  %vm274_vm1 = vcmp.gt.s32.totalorder %v273_v21, 0  ;;  %vm378_vm6 = vcmp.gt.s32.totalorder %v7526_v31, 0 }
  0x2b   : > { %v172_v24 = vshrl.u32 %v171_v23, 5  ;;  %v173_v25 = vand.u32 31, %v171_v23  ;;  %v275_v26 = vsel %vm274_vm1, %v273_v21, 0 }
  0x2c   : > { %v277_v29 = vand.u32 31, %v275_v26  ;;  %v7533_v43 = vshrl.u32 %v275_v26, 5 }
  0x2d   : > { %v174_v32 = vsub.s32 32, %v173_v25  ;;  %v176_v34 = vshll.u32 %v7439_v33, %v173_v25  ;;  %v179_v36 = vshll.u32 %v7440_v35, %v173_v25  ;;  %v182_v38 = vshll.u32 %v7441_v37, %v173_v25 }
  0x2e   : > { %v185_v40 = vshll.u32 %v7442_v39, %v173_v25  ;;  %v188_v42 = vshll.u32 %v7443_v41, %v173_v25  ;;  %vm191_vm2 = vcmp.lt.s32.totalorder %v172_v24, 1  ;;  %vm192_vm3 = vcmp.lt.s32.totalorder %v172_v24, 2 }
  0x2f   : > { %v175_v44 = vshrl.u32 %v7439_v33, %v174_v32  ;;  %v177_v45 = vshrl.u32 %v7440_v35, %v174_v32  ;;  %v180_v46 = vshrl.u32 %v7441_v37, %v174_v32  ;;  %v183_v47 = vshrl.u32 %v7442_v39, %v174_v32 }
  0x30   : > { %v186_v48 = vshrl.u32 %v7443_v41, %v174_v32  ;;  %v189_v50 = vshrl.u32 %v7444_v49, %v174_v32  ;;  %vm194_vm4 = vcmp.lt.s32.totalorder %v172_v24, 4  ;;  %v278_v54 = vsub.s32 32, %v277_v29 }
  0x31   : > { %v178_v51 = vor.u32 %v177_v45, %v176_v34  ;;  %v181_v52 = vor.u32 %v180_v46, %v179_v36  ;;  %v184_v53 = vor.u32 %v183_v47, %v182_v38  ;;  %vm193_vm5 = vcmp.lt.s32.totalorder %v172_v24, 3 }
  0x32   : > { %v187_v55 = vor.u32 %v186_v48, %v185_v40  ;;  %v190_v56 = vor.u32 %v189_v50, %v188_v42  ;;  %v280_v57 = vshll.u32 %v7439_v33, %v277_v29  ;;  %v283_v1 = vshll.u32 %v7440_v35, %v277_v29 }
  0x33   : > { %v195_v58 = vsel %vm191_vm2, %v175_v44, %v178_v51  ;;  %v196_v59 = vsel %vm194_vm4, %v184_v53, 2102212464  ;;  %v199_v60 = vsel %vm191_vm2, %v178_v51, %v181_v52  ;;  %v203_v61 = vsel %vm191_vm2, %v181_v52, %v184_v53 }
  0x34   : > { %v197_v62 = vsel %vm193_vm5, %v181_v52, %v196_v59  ;;  %v200_v63 = vsel %vm194_vm4, %v187_v55, 920167782  ;;  %v204_v0 = vsel %vm194_vm4, %v190_v56, 1326507024  ;;  %v279_v9 = vshrl.u32 %v7439_v33, %v278_v54 }
  0x35   : > { %v201_v2 = vsel %vm193_vm5, %v184_v53, %v200_v63  ;;  %v205_v7 = vsel %vm193_vm5, %v187_v55, %v204_v0  ;;  %v281_v10 = vshrl.u32 %v7440_v35, %v278_v54  ;;  %v198_v11 = vsel %vm192_vm3, %v195_v58, %v197_v62 }
  0x36   : > { %v202_v12 = vsel %vm192_vm3, %v199_v60, %v201_v2  ;;  %v206_v13 = vsel %vm192_vm3, %v203_v61, %v205_v7  ;;  %v284_v14 = vshrl.u32 %v7441_v37, %v278_v54  ;;  %v286_v21 = vshll.u32 %v7441_v37, %v277_v29 }
  0x37   : > { %v7554_v15 = vmul.u32.u64.low %v7522_v28, %v206_v13  ;;  %v7555_v16 = vmul.u32.u64.high %v7522_v28, %v206_v13, %v7554_v15  ;;  %v7558_v17 = vmul.u32.u64.low %v7522_v28, %v202_v12  ;;  %v7559_v18 = vmul.u32.u64.high %v7522_v28, %v202_v12, %v7558_v17 }
  0x38   : > { %v282_v19 = vor.u32 %v281_v10, %v280_v57  ;;  %v285_v20 = vor.u32 %v284_v14, %v283_v1  ;;  %v287_v22 = vshrl.u32 %v7442_v39, %v278_v54  ;;  %v289_v23 = vshll.u32 %v7442_v39, %v277_v29 }
  0x39   : > { %v290_v24 = vshrl.u32 %v7443_v41, %v278_v54  ;;  %v292_v25 = vshll.u32 %v7443_v41, %v277_v29  ;;  %v293_v26 = vshrl.u32 %v7444_v49, %v278_v54  ;;  %v214_v32 = vmul.u32 %v7522_v28, %v198_v11 }
  0x3a   : > { %v288_v34 = vor.u32 %v287_v22, %v286_v21  ;;  %vm295_vm7 = vcmp.lt.s32.totalorder %v7533_v43, 1  ;;  %vm296_vm8 = vcmp.lt.s32.totalorder %v7533_v43, 2  ;;  %vm216_vm9 = vc.u32 %v7555_v16, %v7558_v17 }
  0x3b   : > { %v217_v36 = vadd.s32 1, %v7559_v18  ;;  %v291_v38 = vor.u32 %v290_v24, %v289_v23  ;;  %vm297_vm10 = vcmp.lt.s32.totalorder %v7533_v43, 3  ;;  %v294_v40 = vor.u32 %v293_v26, %v292_v25 }
  0x3c   : > { %vm298_vm11 = vcmp.lt.s32.totalorder %v7533_v43, 4  ;;  %v299_v29 = vsel %vm295_vm7, %v279_v9, %v282_v19  ;;  %v303_v42 = vsel %vm295_vm7, %v282_v19, %v285_v20  ;;  %v307_v46 = vsel %vm295_vm7, %v285_v20, %v288_v34 }
  0x3d   : > { %v218_v28 = vsel %vm216_vm9, %v217_v36, %v7559_v18  ;;  %v300_v44 = vsel %vm298_vm11, %v288_v34, 2102212464  ;;  %v304_v45 = vsel %vm298_vm11, %v291_v38, 920167782  ;;  %v308_v51 = vsel %vm298_vm11, %v294_v40, 1326507024 }
  0x3e   : > { %v219_v47 = vadd.s32 %v218_v28, %v214_v32  ;;  %v301_v48 = vsel %vm297_vm10, %v285_v20, %v300_v44  ;;  %v305_v50 = vsel %vm297_vm10, %v288_v34, %v304_v45  ;;  %v309_v54 = vsel %vm297_vm10, %v291_v38, %v308_v51 }
  0x3f   : > { %v302_v52 = vsel %vm296_vm8, %v299_v29, %v301_v48  ;;  %v306_v53 = vsel %vm296_vm8, %v303_v42, %v305_v50  ;;  %v379_v55 = vsel %vm378_vm6, %v7526_v31, 0  ;;  %v310_v57 = vsel %vm296_vm8, %v307_v46, %v309_v54 }
  0x40   : > { %v220_v56 = vadd.s32 536870912, %v219_v47  ;;  %v7587_v58 = vmul.u32.u64.low %v7524_v30, %v306_v53  ;;  %v7588_v59 = vmul.u32.u64.high %v7524_v30, %v306_v53, %v7587_v58  ;;  %v374_v63 = vand.u32 8388607, %v367_v27 }
  0x41   : > { %v7592_v60 = vmul.u32.u64.low %v7524_v30, %v310_v57  ;;  %v7593_v61 = vmul.u32.u64.high %v7524_v30, %v310_v57, %v7592_v60  ;;  %v381_v0 = vand.u32 31, %v379_v55  ;;  %v7598_v31 = vmul.f32 2.0, %v7498_v3 }
  0x42   : > { %v221_v62 = vshrl.u32 %v220_v56, 30  ;;  %v318_v43 = vmul.u32 %v7524_v30, %v302_v52  ;;  %v321_v2 = vadd.s32 1, %v7588_v59  ;;  %v375_v11 = vor.u32 8388608, %v374_v63 }
  0x43   : > { %v382_v7 = vsub.s32 32, %v381_v0  ;;  %vm320_vm12 = vc.u32 %v7593_v61, %v7587_v58  ;;  %v794_v12 = vand.u32 2139095040, %v7598_v31  ;;  %v7609_v14 = vshrl.u32 %v379_v55, 5 }
  0x44   : > { %v222_v1 = vshll.u32 %v221_v62, 30  ;;  %v322_v10 = vsel %vm320_vm12, %v321_v2, %v7588_v59  ;;  %v384_v30 = vshll.u32 %v7439_v33, %v381_v0  ;;  %v387_v19 = vshll.u32 %v7440_v35, %v381_v0 }
  0x45   : > { %v323_v13 = vadd.s32 %v322_v10, %v318_v43  ;;  %v385_v18 = vshrl.u32 %v7440_v35, %v382_v7  ;;  %v388_v20 = vshrl.u32 %v7441_v37, %v382_v7  ;;  %v390_v22 = vshll.u32 %v7441_v37, %v381_v0 }
  0x46   : > { %v7604_v9 = vsub.s32 %v219_v47, %v222_v1  ;;  %v391_v23 = vshrl.u32 %v7442_v39, %v382_v7  ;;  %v393_v24 = vshll.u32 %v7442_v39, %v381_v0  ;;  %v394_v26 = vshrl.u32 %v7443_v41, %v382_v7 }
  0x47   : > { %v324_v21 = vadd.s32 536870912, %v323_v13  ;;  %v7621_v32 = vshll.u32 %v375_v11, 8  ;;  %v795_v34 = vshrl.u32 %v794_v12, 23  ;;  %v396_v38 = vshll.u32 %v7443_v41, %v381_v0 }
  0x48   : > { %v225_v15 = vsub.s32 0, %v7604_v9  ;;  %v397_v40 = vshrl.u32 %v7444_v49, %v382_v7  ;;  %vm402_vm14 = vcmp.lt.s32.totalorder %v7609_v14, 4  ;;  %v245_v28 = vsub.s32 4, %v221_v62 }
  0x49   : > { %v325_v36 = vshrl.u32 %v324_v21, 30  ;;  %v386_v44 = vor.u32 %v385_v18, %v384_v30  ;;  %v389_v45 = vor.u32 %v388_v20, %v387_v19  ;;  %v392_v47 = vor.u32 %v391_v23, %v390_v22 }
  0x4a   : > { %v6828_v25 = vmin.u32 %v225_v15, %v7604_v9  ;;  %v395_v48 = vor.u32 %v394_v26, %v393_v24  ;;  %vm399_vm0 = vcmp.lt.s32.totalorder %v7609_v14, 1  ;;  %v215_v50 = vadd.s32 %v7558_v17, %v7555_v16 }
  0x4b   : > { %v326_v46 = vshll.u32 %v325_v36, 30  ;;  %v398_v52 = vor.u32 %v397_v40, %v396_v38  ;;  %vm401_vm1 = vcmp.lt.s32.totalorder %v7609_v14, 3  ;;  %v383_v53 = vshrl.u32 %v7439_v33, %v382_v7 }
  0x4c   : > { %v227_v42 = vclz %v6828_v25  ;;  %vm400_vm2 = vcmp.lt.s32.totalorder %v7609_v14, 2  ;;  %v408_v54 = vsel %vm402_vm14, %v395_v48, 920167782  ;;  %v246_v55 = vsel %vm161_vm13, %v245_v28, %v221_v62 }
  0x4d   : > { %v7636_v6 = vsub.s32 %v323_v13, %v326_v46  ;;  %vm265_vm4 = vcmp.lt.s32.totalorder %v7500_v4, 0  ;;  %v404_v16 = vsel %vm402_vm14, %v392_v47, 2102212464  ;;  %v407_v17 = vsel %vm399_vm0, %v386_v44, %v389_v45 }
  0x4e   : > { %v6829_v51 = vadd.s32 4294967294, %v227_v42  ;;  %v409_v59 = vsel %vm401_vm1, %v392_v47, %v408_v54  ;;  %v411_v60 = vsel %vm399_vm0, %v389_v45, %v392_v47  ;;  %v412_v43 = vsel %vm402_vm14, %v398_v52, 1326507024 }
  0x4f   : > { %v329_v57 = vsub.s32 0, %v7636_v6  ;;  %v403_v2 = vsel %vm399_vm0, %v383_v53, %v386_v44  ;;  %v405_v7 = vsel %vm401_vm1, %v389_v45, %v404_v16  ;;  %v413_v10 = vsel %vm401_vm1, %v395_v48, %v412_v43 }
  0x50   : > { %vm6830_vm3 = vcmp.lt.s32.totalorder %v6829_v51, 0  ;;  %v414_v13 = vsel %vm400_vm2, %v411_v60, %v413_v10  ;;  %v248_v30 = vsel %vm7628_vm15, 0, %v246_v55  ;;  %v349_v18 = vsub.s32 4, %v325_v36 }
  0x51   : > { %v230_v56 = vsel %vm6830_vm3, 0, %v6829_v51  ;;  %v6832_v1 = vmin.u32 %v329_v57, %v7636_v6  ;;  %v6857_v19 = vadd.s32 4294967169, %v795_v34  ;;  %v406_v25 = vsel %vm400_vm2, %v403_v2, %v405_v7 }
  0x52   : > { %v231_v63 = vsub.s32 32, %v230_v56  ;;  %v232_v62 = vshll.u32 %v7604_v9, %v230_v56  ;;  %v235_v0 = vsub.s32 4294967266, %v230_v56  ;;  %v410_v9 = vsel %vm400_vm2, %v407_v17, %v409_v59 }
  0x53   : > { %v331_v15 = vclz %v6832_v1  ;;  %v7671_v22 = vmul.u32.u64.low %v7621_v32, %v414_v13  ;;  %v7672_v23 = vmul.u32.u64.high %v7621_v32, %v414_v13, %v7671_v22  ;;  %vm7682_vm5 = vcmp.le.f32.partialorder %v263_v8, 0.7853982 }
  0x54   : > { %v233_v11 = vshrl.u32 %v215_v50, %v231_v63  ;;  %v236_v12 = vadd.s32 127, %v235_v0  ;;  %v7677_v26 = vmul.u32.u64.low %v7621_v32, %v410_v9  ;;  %v7678_v38 = vmul.u32.u64.high %v7621_v32, %v410_v9, %v7677_v26 }
  0x55   : > { %v6833_v24 = vadd.s32 4294967294, %v331_v15  ;;  %v319_v28 = vadd.s32 %v7587_v58, %v7593_v61  ;;  %v252_v44 = vadd.s32 3, %v248_v30  ;;  %v350_v14 = vsel %vm265_vm4, %v349_v18, %v325_v36 }
  0x56   : > { %v234_v20 = vor.u32 %v233_v11, %v232_v62  ;;  %v237_v21 = vshll.u32 %v236_v12, 23  ;;  %v801_v45 = vadd.s32 1, %v6857_v19  ;;  %v422_v48 = vmul.u32 %v7621_v32, %v406_v25 }
  0x57   : > { %vm6834_vm6 = vcmp.lt.s32.totalorder %v6833_v24, 0  ;;  %vm424_vm7 = vc.u32 %v7672_v23, %v7677_v26  ;;  %v425_v52 = vadd.s32 1, %v7678_v38  ;;  %v352_v58 = vsel %vm7682_vm5, 0, %v350_v14 }
  0x58   : > { %v238_v40 = vor.u32 4788187, %v237_v21  ;;  %v241_v42 = vcvt.s32.f32 %v234_v20  ;;  %v334_v47 = vsel %vm6834_vm6, 0, %v6833_v24  ;;  %v791_v61 = vand.u32 2147483647, %v7598_v31 }
  0x59   : > { %v335_v50 = vsub.s32 32, %v334_v47  ;;  %v336_v8 = vshll.u32 %v7636_v6, %v334_v47  ;;  %v339_v51 = vsub.s32 4294967266, %v334_v47  ;;  %v426_v55 = vsel %vm424_vm7, %v425_v52, %v7678_v38 }
  0x5a   : > { %v239_v46 = vand.u32 2147483647, %v238_v40  ;;  %vm802_vm8 = vcmp.gt.s32.totalorder %v801_v45, 0  ;;  %v427_v16 = vadd.s32 %v426_v55, %v422_v48  ;;  %v7698_v56 = vand.u32 3, %v252_v44 }
  0x5b   : > { %v337_v36 = vshrl.u32 %v319_v28, %v335_v50  ;;  %v340_v54 = vadd.s32 127, %v339_v51  ;;  %v803_v17 = vsel %vm802_vm8, %v801_v45, 0  ;;  %v356_v63 = vadd.s32 3, %v352_v58 }
  0x5c   : > { %v242_v53 = vmul.f32 %v241_v42, %v239_v46  ;;  %v805_v59 = vand.u32 31, %v803_v17  ;;  %v428_v62 = vadd.s32 536870912, %v427_v16  ;;  %v7702_v0 = vand.u32 3, %v248_v30 }
  0x5d   : > { %v338_v6 = vor.u32 %v337_v36, %v336_v8  ;;  %v341_v57 = vshll.u32 %v340_v54, 23  ;;  %v798_v7 = vand.u32 8388607, %v791_v61  ;;  %vm10639_vm9 = vcmp.lt.s32.totalorder %v7502_v5, 0 }
  0x5e   : > { %v243_v32 = vxor.u32 2147483648, %v242_v53  ;;  %v429_v10 = vshrl.u32 %v428_v62, 30  ;;  %v806_v11 = vsub.s32 32, %v805_v59  ;;  %vm258_vm10 = vcmp.eq.s32.totalorder %v7698_v56, 2 }
  0x5f   : > { %v342_v1 = vor.u32 4788187, %v341_v57  ;;  %v345_v2 = vcvt.s32.f32 %v338_v6  ;;  %v7711_v9 = vand.u32 3, %v356_v63  ;;  %vm573_vm11 = vcmp.eq.s32.totalorder %v7702_v0, 2 }
  0x60   : > { %v244_v60 = vsel %vm161_vm13, %v243_v32, %v242_v53  ;;  %v430_v13 = vshll.u32 %v429_v10, 30  ;;  %v7714_v29 = vand.u32 3, %v352_v58  ;;  %vm255_vm12 = vcmp.eq.s32.totalorder %v7698_v56, 0 }
  0x61   : > { %v247_v43 = vsel %vm7628_vm15, %v7498_v3, %v244_v60  ;;  %v343_v12 = vand.u32 2147483647, %v342_v1  ;;  %v7718_v15 = vadd.s32 %v7677_v26, %v7672_v23  ;;  %vm570_vm13 = vcmp.eq.s32.totalorder %v7702_v0, 0 }
  0x62   : > { %7283 = vcosq.f32 %v247_v43  ;;  %v799_v18 = vor.u32 8388608, %v798_v7  ;;  %v808_v19 = vshll.u32 %v7439_v33, %v805_v59  ;;  %vm254_vm14 = vcmp.lt.s32.totalorder %v7698_v56, 2 }
  0x63   : > { %7285 = vsinq.f32 %v247_v43  ;;  %v346_v30 = vmul.f32 %v345_v2, %v343_v12  ;;  %v7723_v20 = vsub.s32 %v427_v16, %v430_v13  ;;  %v453_v21 = vsub.s32 4, %v429_v10 }
  0x64   : > { %vm569_vm15 = vcmp.lt.s32.totalorder %v7702_v0, 2  ;;  %v809_v22 = vshrl.u32 %v7440_v35, %v806_v11  ;;  %v811_v24 = vshll.u32 %v7440_v35, %v805_v59  ;;  %vm251_vm0 = vweird.f32 %v7498_v3 }
  0x65   : > { %v347_v23 = vxor.u32 2147483648, %v346_v30  ;;  %v812_v25 = vshrl.u32 %v7441_v37, %v806_v11  ;;  %v814_v26 = vshll.u32 %v7441_v37, %v805_v59  ;;  %v815_v38 = vshrl.u32 %v7442_v39, %v806_v11 }
  0x66   : > { %v433_v40 = vsub.s32 0, %v7723_v20  ;;  %v7733_v42 = vshrl.u32 %v803_v17, 5  ;;  %v817_v28 = vshll.u32 %v7442_v39, %v805_v59  ;;  %v818_v44 = vshrl.u32 %v7443_v41, %v806_v11 }
  0x67   : > { %v348_v14 = vsel %vm265_vm4, %v347_v23, %v346_v30  ;;  %v820_v45 = vshll.u32 %v7443_v41, %v805_v59  ;;  %v821_v46 = vshrl.u32 %v7444_v49, %v806_v11  ;;  %v7741_v47 = vshll.u32 %v799_v18, 8 }
  0x68   : > { %v351_v48 = vsel %vm7682_vm5, %v7500_v4, %v348_v14  ;;  %v6836_v50 = vmin.u32 %v433_v40, %v7723_v20  ;;  %v807_v8 = vshrl.u32 %v7439_v33, %v806_v11  ;;  %v810_v51 = vor.u32 %v809_v22, %v808_v19 }
  0x69   : > { %7287 = vcosq.f32 %v351_v48  ;;  %v454_v52 = vsel %vm10639_vm9, %v453_v21, %v429_v10  ;;  %v813_v53 = vor.u32 %v812_v25, %v811_v24  ;;  %v816_v58 = vor.u32 %v815_v38, %v814_v26 }
  0x6a   : > { %7289 = vsinq.f32 %v351_v48  ;;  %v435_v54 = vclz %v6836_v50  ;;  %v819_v55 = vor.u32 %v818_v44, %v817_v28  ;;  %vm823_vm1 = vcmp.lt.s32.totalorder %v7733_v42, 1 }
  0x6b   : > { %vm362_vm2 = vcmp.eq.s32.totalorder %v7711_v9, 2  ;;  %v822_v16 = vor.u32 %v821_v46, %v820_v45  ;;  %vm824_vm4 = vcmp.lt.s32.totalorder %v7733_v42, 2  ;;  %vm826_vm5 = vcmp.lt.s32.totalorder %v7733_v42, 4 }
  0x6c   : > { %v7284_v36 = vpop.eup %7283  ;;  %vm7758_vm7 = vcmp.le.f32.partialorder %v367_v27, 0.7853982  ;;  %v6837_v57 = vadd.s32 4294967294, %v435_v54  ;;  %vm825_vm9 = vcmp.lt.s32.totalorder %v7733_v42, 3  ;;  %v828_v59 = vsel %vm826_vm5, %v816_v58, 2102212464 }
  0x6d   : > { %v7286_v32 = vpop.eup %7285  ;;  %v259_v34 = vxor.u32 2147483648, %v7284_v36  ;;  %vm358_vm3 = vcmp.lt.s32.totalorder %v7711_v9, 2  ;;  %vm672_vm6 = vcmp.lt.s32.totalorder %v7714_v29, 2  ;;  %v827_v27 = vsel %vm823_vm1, %v807_v8, %v810_v51 }
  0x6e   : > { %v256_v17 = vxor.u32 2147483648, %v7286_v32  ;;  %v829_v62 = vsel %vm825_vm9, %v813_v53, %v828_v59  ;;  %vm355_vm8 = vweird.f32 %v7500_v4  ;;  %v831_v2 = vsel %vm823_vm1, %v810_v51, %v813_v53 }
  0x6f   : > { %v260_v60 = vsel %vm258_vm10, %v259_v34, %v7286_v32  ;;  %v575_v63 = vsel %vm573_vm11, %v259_v34, %v7286_v32  ;;  %vm6838_vm10 = vcmp.lt.s32.totalorder %v6837_v57, 0  ;;  %v832_v12 = vsel %vm826_vm5, %v819_v55, 920167782 }
  0x70   : > { %v257_v43 = vsel %vm255_vm12, %v7284_v36, %v256_v17  ;;  %v572_v1 = vsel %vm570_vm13, %v7284_v36, %v256_v17  ;;  %v438_v10 = vsel %vm6838_vm10, 0, %v6837_v57  ;;  %v833_v21 = vsel %vm825_vm9, %v816_v58, %v832_v12 }
  0x71   : > { %v261_v7 = vsel %vm254_vm14, %v257_v43, %v260_v60  ;;  %v576_v11 = vsel %vm569_vm15, %v572_v1, %v575_v63  ;;  %v439_v30 = vsub.s32 32, %v438_v10  ;;  %v440_v18 = vshll.u32 %v7723_v20, %v438_v10 }
  0x72   : > { %v262_v13 = vsel %vm251_vm0, nan, %v261_v7  ;;  %v443_v19 = vsub.s32 4294967266, %v438_v10  ;;  %v577_v56 = vsel %vm251_vm0, nan, %v576_v11  ;;  %v835_v0 = vsel %vm823_vm1, %v813_v53, %v816_v58 }
  0x73   : > { %6839 = vst [vmem:[%s7504_s26 + $0x18] sm:$0xff] %v262_v13  ;;  %v836_v22 = vsel %vm826_vm5, %v822_v16, 1326507024  ;;  %v441_v24 = vshrl.u32 %v7718_v15, %v439_v30  ;;  %6854 = vst [vmem:[%s7504_s26 + $0x30] sm:$0xff] %v577_v56  ;;  %v834_v20 = vsel %vm824_vm4, %v831_v2, %v833_v21  ;;  %v7288_v26 = vpop.eup %7287  ;;  %v7814_v44 = vmul.f32 2.0, %v7500_v4 }
  0x74   : > { %v444_v23 = vadd.s32 127, %v443_v19  ;;  %v837_v25 = vsel %vm825_vm9, %v819_v55, %v836_v22  ;;  %v7810_v40 = vmul.u32.u64.low %v7741_v47, %v834_v20  ;;  %v7811_v28 = vmul.u32.u64.high %v7741_v47, %v834_v20, %v7810_v40  ;;  %v7290_v15 = vpop.eup %7289 }
  0x75   : > { %v838_v38 = vsel %vm824_vm4, %v835_v0, %v837_v25  ;;  %v363_v14 = vxor.u32 2147483648, %v7288_v26  ;;  %v442_v45 = vor.u32 %v441_v24, %v440_v18  ;;  %v830_v48 = vsel %vm824_vm4, %v827_v27, %v829_v62 }
  0x76   : > { %v445_v46 = vshll.u32 %v444_v23, 23  ;;  %v360_v50 = vxor.u32 2147483648, %v7290_v15  ;;  %v456_v8 = vsel %vm7758_vm7, 0, %v454_v52  ;;  %vm10647_vm9 = vcmp.eq.s32.totalorder %v7714_v29, 2 }
  0x77   : > { %v7821_v51 = vmul.u32.u64.low %v7741_v47, %v838_v38  ;;  %v7822_v53 = vmul.u32.u64.high %v7741_v47, %v838_v38, %v7821_v51  ;;  %v364_v58 = vsel %vm362_vm2, %v363_v14, %v7290_v15  ;;  %v449_v54 = vcvt.s32.f32 %v442_v45 }
  0x78   : > { %v446_v36 = vor.u32 4788187, %v445_v46  ;;  %v678_v55 = vsel %vm10647_vm9, %v363_v14, %v7290_v15  ;;  %vm10648_vm11 = vcmp.eq.s32.totalorder %v7711_v9, 0  ;;  %vm10649_vm12 = vcmp.eq.s32.totalorder %v7714_v29, 0 }
  0x79   : > { %v361_v42 = vsel %vm10648_vm11, %v7288_v26, %v360_v50  ;;  %v675_v52 = vsel %vm10649_vm12, %v7288_v26, %v360_v50  ;;  %v846_v32 = vmul.u32 %v7741_v47, %v830_v48  ;;  %v849_v34 = vadd.s32 1, %v7811_v28 }
  0x7a   : > { %v365_v16 = vsel %vm358_vm3, %v361_v42, %v364_v58  ;;  %v447_v17 = vand.u32 2147483647, %v446_v36  ;;  %v679_v57 = vsel %vm672_vm6, %v675_v52, %v678_v55  ;;  %v898_v59 = vand.u32 2139095040, %v7814_v44 }
  0x7b   : > { %v366_v60 = vsel %vm355_vm8, nan, %v365_v16  ;;  %v680_v63 = vsel %vm355_vm8, nan, %v679_v57  ;;  %vm848_vm13 = vc.u32 %v7822_v53, %v7810_v40  ;;  %v460_v62 = vadd.s32 3, %v456_v8 }
  0x7c   : > { %6840 = vst [vmem:[%s7504_s26 + $0x20] sm:$0xff] %v366_v60  ;;  %v450_v47 = vmul.f32 %v449_v54, %v447_v17  ;;  %6855 = vst [vmem:[%s7504_s26 + $0x38] sm:$0xff] %v680_v63  ;;  %v850_v9 = vsel %vm848_vm13, %v849_v34, %v7811_v28  ;;  %v899_v27 = vshrl.u32 %v898_v59, 23  ;;  %v895_v29 = vand.u32 2147483647, %v7814_v44 }
  0x7d   : > { %v851_v43 = vadd.s32 %v850_v9, %v846_v32  ;;  %v7849_v7 = vmul.f32 2.0, %v7502_v5  ;;  %vm10650_vm14 = vcmp.lt.s32.totalorder %v7502_v5, 0  ;;  %v7853_v11 = vand.u32 3, %v456_v8 }
  0x7e   : > { %v451_v1 = vxor.u32 2147483648, %v450_v47  ;;  %v6861_v2 = vadd.s32 4294967169, %v899_v27  ;;  %v7858_v30 = vand.u32 3, %v460_v62  ;;  %v902_v19 = vand.u32 8388607, %v895_v29 }
  0x7f   : > { %v852_v10 = vadd.s32 536870912, %v851_v43  ;;  %v1002_v56 = vand.u32 2139095040, %v7849_v7  ;;  %vm779_vm0 = vcmp.eq.s32.totalorder %v7853_v11, 2  ;;  %vm793_vm1 = vcmp.lt.s32.totalorder %v7598_v31, 0 }
  0x80   : > { %v452_v4 = vsel %vm10650_vm14, %v451_v1, %v450_v47  ;;  %v905_v12 = vadd.s32 1, %v6861_v2  ;;  %vm463_vm2 = vcmp.eq.s32.totalorder %v7858_v30, 0  ;;  %vm466_vm3 = vcmp.eq.s32.totalorder %v7858_v30, 2 }
  0x81   : > { %v455_v13 = vsel %vm7758_vm7, %v7502_v5, %v452_v4  ;;  %v853_v18 = vshrl.u32 %v852_v10, 30  ;;  %vm776_vm4 = vcmp.eq.s32.totalorder %v7853_v11, 0  ;;  %v847_v6 = vadd.s32 %v7810_v40, %v7822_v53 }
  0x82   : > { %7291 = vcosq.f32 %v455_v13  ;;  %vm906_vm15 = vcmp.gt.s32.totalorder %v905_v12, 0  ;;  %v903_v23 = vor.u32 8388608, %v902_v19  ;;  %vm462_vm5 = vcmp.lt.s32.totalorder %v7858_v30, 2 }
  0x83   : > { %7293 = vsinq.f32 %v455_v13  ;;  %v854_v21 = vshll.u32 %v853_v18, 30  ;;  %v907_v0 = vsel %vm906_vm15, %v905_v12, 0  ;;  %vm775_vm6 = vcmp.lt.s32.totalorder %v7853_v11, 2 }
  0x84   : > { %v909_v22 = vand.u32 31, %v907_v0  ;;  %v877_v20 = vsub.s32 4, %v853_v18  ;;  %v7873_v25 = vshrl.u32 %v907_v0, 5  ;;  %v1003_v38 = vshrl.u32 %v1002_v56, 23 }
  0x85   : > { %v7869_v24 = vsub.s32 %v851_v43, %v854_v21  ;;  %vm459_vm7 = vweird.f32 %v7502_v5  ;;  %v999_v58 = vand.u32 2147483647, %v7849_v7  ;;  %v7890_v55 = vshll.u32 %v903_v23, 8 }
  0x86   : > { %v910_v26 = vsub.s32 32, %v909_v22  ;;  %v912_v15 = vshll.u32 %v7439_v33, %v909_v22  ;;  %v915_v40 = vshll.u32 %v7440_v35, %v909_v22  ;;  %v918_v14 = vshll.u32 %v7441_v37, %v909_v22 }
  0x87   : > { %v857_v28 = vsub.s32 0, %v7869_v24  ;;  %v921_v50 = vshll.u32 %v7442_v39, %v909_v22  ;;  %v924_v53 = vshll.u32 %v7443_v41, %v909_v22  ;;  %v6865_v42 = vadd.s32 4294967169, %v1003_v38 }
  0x88   : > { %v913_v45 = vshrl.u32 %v7440_v35, %v910_v26  ;;  %v916_v46 = vshrl.u32 %v7441_v37, %v910_v26  ;;  %v919_v48 = vshrl.u32 %v7442_v39, %v910_v26  ;;  %v922_v51 = vshrl.u32 %v7443_v41, %v910_v26 }
  0x89   : > { %v6858_v8 = vmin.u32 %v857_v28, %v7869_v24  ;;  %v911_v36 = vshrl.u32 %v7439_v33, %v910_v26  ;;  %v925_v54 = vshrl.u32 %v7444_v49, %v910_v26  ;;  %v878_v32 = vsel %vm793_vm1, %v877_v20, %v853_v18 }
  0x8a   : > { %v914_v34 = vor.u32 %v913_v45, %v912_v15  ;;  %v917_v16 = vor.u32 %v916_v46, %v915_v40  ;;  %v920_v57 = vor.u32 %v919_v48, %v918_v14  ;;  %v923_v59 = vor.u32 %v922_v51, %v921_v50 }
  0x8b   : > { %v859_v52 = vclz %v6858_v8  ;;  %v926_v60 = vor.u32 %v925_v54, %v924_v53  ;;  %vm927_vm8 = vcmp.lt.s32.totalorder %v7873_v25, 1  ;;  %vm928_vm10 = vcmp.lt.s32.totalorder %v7873_v25, 2 }
  0x8c   : > { %v7292_v17 = vpop.eup %7291  ;;  %vm930_vm9 = vcmp.lt.s32.totalorder %v7873_v25, 4  ;;  %vm929_vm11 = vcmp.lt.s32.totalorder %v7873_v25, 3  ;;  %v931_v62 = vsel %vm927_vm8, %v911_v36, %v914_v34  ;;  %v935_v10 = vsel %vm927_vm8, %v914_v34, %v917_v16 }
  0x8d   : > { %v7294_v63 = vpop.eup %7293  ;;  %v467_v47 = vxor.u32 2147483648, %v7292_v17  ;;  %v6859_v9 = vadd.s32 4294967294, %v859_v52  ;;  %v932_v43 = vsel %vm930_vm9, %v920_v57, 2102212464  ;;  %v936_v26 = vsel %vm930_vm9, %v923_v59, 920167782 }
  0x8e   : > { %v464_v27 = vxor.u32 2147483648, %v7294_v63  ;;  %v933_v18 = vsel %vm929_vm11, %v917_v16, %v932_v43  ;;  %v937_v11 = vsel %vm929_vm11, %v920_v57, %v936_v26  ;;  %v939_v38 = vsel %vm927_vm8, %v917_v16, %v920_v57 }
  0x8f   : > { %v468_v1 = vsel %vm466_vm3, %v467_v47, %v7294_v63  ;;  %v781_v2 = vsel %vm779_vm0, %v467_v47, %v7294_v63  ;;  %vm6860_vm12 = vcmp.lt.s32.totalorder %v6859_v9, 0  ;;  %v934_v5 = vsel %vm928_vm10, %v931_v62, %v933_v18 }
  0x90   : > { %v465_v4 = vsel %vm463_vm2, %v7292_v17, %v464_v27  ;;  %v778_v12 = vsel %vm776_vm4, %v7292_v17, %v464_v27  ;;  %v862_v13 = vsel %vm6860_vm12, 0, %v6859_v9  ;;  %v938_v15 = vsel %vm928_vm10, %v935_v10, %v937_v11 }
  0x91   : > { %v469_v19 = vsel %vm462_vm5, %v465_v4, %v468_v1  ;;  %v782_v56 = vsel %vm775_vm6, %v778_v12, %v781_v2  ;;  %v863_v21 = vsub.s32 32, %v862_v13  ;;  %v864_v0 = vshll.u32 %v7869_v24, %v862_v13 }
  0x92   : > { %v470_v22 = vsel %vm459_vm7, nan, %v469_v19  ;;  %v783_v23 = vsel %vm459_vm7, nan, %v782_v56  ;;  %v867_v20 = vsub.s32 4294967266, %v862_v13  ;;  %v940_v24 = vsel %vm930_vm9, %v926_v60, 1326507024 }
  0x93   : > { %6841 = vst [vmem:[%s7504_s26 + $0x28] sm:$0xff] %v470_v22  ;;  %6856 = vst [vmem:[%s7504_s26 + $0x40] sm:$0xff] %v783_v23  ;;  %v865_v30 = vshrl.u32 %v847_v6, %v863_v21  ;;  %v941_v40 = vsel %vm929_vm11, %v923_v59, %v940_v24  ;;  %v7942_v45 = vmul.u32.u64.low %v7890_v55, %v938_v15  ;;  %v7943_v46 = vmul.u32.u64.high %v7890_v55, %v938_v15, %v7942_v45 }
  0x94   : > { %v868_v28 = vadd.s32 127, %v867_v20  ;;  %v942_v14 = vsel %vm928_vm10, %v939_v38, %v941_v40  ;;  %v1009_v51 = vadd.s32 1, %v6865_v42  ;;  %vm7952_vm13 = vcmp.le.f32.partialorder %v791_v61, 0.7853982 }
  0x95   : > { %v866_v6 = vor.u32 %v865_v30, %v864_v0  ;;  %v7947_v50 = vmul.u32.u64.low %v7890_v55, %v942_v14  ;;  %v7948_v8 = vmul.u32.u64.high %v7890_v55, %v942_v14, %v7947_v50  ;;  %v1006_v25 = vand.u32 8388607, %v999_v58 }
  0x96   : > { %v869_v48 = vshll.u32 %v868_v28, 23  ;;  %v7959_v36 = vmul.f32 4.0, %v7498_v3  ;;  %v950_v34 = vmul.u32 %v7890_v55, %v934_v5  ;;  %vm1010_vm14 = vcmp.gt.s32.totalorder %v1009_v51, 0 }
  0x97   : > { %v873_v52 = vcvt.s32.f32 %v866_v6  ;;  %v880_v42 = vsel %vm7952_vm13, 0, %v878_v32  ;;  %v953_v16 = vadd.s32 1, %v7943_v46  ;;  %v1011_v61 = vsel %vm1010_vm14, %v1009_v51, 0 }
  0x98   : > { %v870_v54 = vor.u32 4788187, %v869_v48  ;;  %vm952_vm15 = vc.u32 %v7948_v8, %v7942_v45  ;;  %v1007_v59 = vor.u32 8388608, %v1006_v25  ;;  %v1013_v3 = vand.u32 31, %v1011_v61 }
  0x99   : > { %v954_v57 = vsel %vm952_vm15, %v953_v16, %v7943_v46  ;;  %v1423_v60 = vand.u32 2147483647, %v7959_v36  ;;  %v884_v47 = vadd.s32 3, %v880_v42  ;;  %v1426_v9 = vand.u32 2139095040, %v7959_v36 }
  0x9a   : > { %v871_v17 = vand.u32 2147483647, %v870_v54  ;;  %v955_v55 = vadd.s32 %v954_v57, %v950_v34  ;;  %v1012_v27 = vshrl.u32 %v1011_v61, 5  ;;  %v1014_v32 = vsub.s32 32, %v1013_v3 }
  0x9b   : > { %v1016_v62 = vshll.u32 %v7439_v33, %v1013_v3  ;;  %v1019_v43 = vshll.u32 %v7440_v35, %v1013_v3  ;;  %v1022_v10 = vshll.u32 %v7441_v37, %v1013_v3  ;;  %v1025_v4 = vshll.u32 %v7442_v39, %v1013_v3 }
  0x9c   : > { %v874_v63 = vmul.f32 %v873_v52, %v871_v17  ;;  %v956_v2 = vadd.s32 536870912, %v955_v55  ;;  %v1017_v12 = vshrl.u32 %v7440_v35, %v1014_v32  ;;  %v1020_v13 = vshrl.u32 %v7441_v37, %v1014_v32 }
  0x9d   : > { %v1023_v18 = vshrl.u32 %v7442_v39, %v1014_v32  ;;  %v1028_v19 = vshll.u32 %v7443_v41, %v1013_v3  ;;  %v1026_v0 = vshrl.u32 %v7443_v41, %v1014_v32  ;;  %v1029_v22 = vshrl.u32 %v7444_v49, %v1014_v32 }
  0x9e   : > { %v875_v1 = vxor.u32 2147483648, %v874_v63  ;;  %v957_v21 = vshrl.u32 %v956_v2, 30  ;;  %v1018_v20 = vor.u32 %v1017_v12, %v1016_v62  ;;  %v1021_v26 = vor.u32 %v1020_v13, %v1019_v43 }
  0x9f   : > { %vm1031_vm0 = vcmp.lt.s32.totalorder %v1012_v27, 1  ;;  %vm897_vm2 = vcmp.lt.s32.totalorder %v7814_v44, 0  ;;  %v1024_v11 = vor.u32 %v1023_v18, %v1022_v10  ;;  %v1027_v38 = vor.u32 %v1026_v0, %v1025_v4 }
  0xa0   : > { %v876_v56 = vsel %vm793_vm1, %v875_v1, %v874_v63  ;;  %v958_v30 = vshll.u32 %v957_v21, 30  ;;  %v1030_v24 = vor.u32 %v1029_v22, %v1028_v19  ;;  %vm1033_vm1 = vcmp.lt.s32.totalorder %v1012_v27, 3 }
  0xa1   : > { %v879_v23 = vsel %vm7952_vm13, %v7598_v31, %v876_v56  ;;  %vm1034_vm3 = vcmp.lt.s32.totalorder %v1012_v27, 4  ;;  %v1015_v5 = vshrl.u32 %v7439_v33, %v1014_v32  ;;  %vm1032_vm4 = vcmp.lt.s32.totalorder %v1012_v27, 2 }
  0xa2   : > { %7295 = vcosq.f32 %v879_v23  ;;  %v7986_v28 = vsub.s32 %v955_v55, %v958_v30  ;;  %v1047_v15 = vshll.u32 %v1007_v59, 8  ;;  %vm7991_vm5 = vcmp.le.f32.partialorder %v895_v29, 0.7853982 }
  0xa3   : > { %7297 = vsinq.f32 %v879_v23  ;;  %v1036_v6 = vsel %vm1034_vm3, %v1024_v11, 2102212464  ;;  %v1039_v14 = vsel %vm1031_vm0, %v1018_v20, %v1021_v26  ;;  %v1040_v46 = vsel %vm1034_vm3, %v1027_v38, 920167782 }
  0xa4   : > { %v1427_v48 = vshrl.u32 %v1426_v9, 23  ;;  %v885_v50 = vand.u32 3, %v884_v47  ;;  %v961_v51 = vsub.s32 0, %v7986_v28  ;;  %v1041_v53 = vsel %vm1033_vm1, %v1024_v11, %v1040_v46 }
  0xa5   : > { %v1200_v25 = vand.u32 3, %v880_v42  ;;  %vm883_vm6 = vweird.f32 %v7598_v31  ;;  %v981_v54 = vsub.s32 4, %v957_v21  ;;  %v1042_v29 = vsel %vm1032_vm4, %v1039_v14, %v1041_v53 }
  0xa6   : > { %v1043_v52 = vsel %vm1031_vm0, %v1021_v26, %v1024_v11  ;;  %v1044_v34 = vsel %vm1034_vm3, %v1030_v24, 1326507024  ;;  %v6862_v16 = vmin.u32 %v961_v51, %v7986_v28  ;;  %v1035_v61 = vsel %vm1031_vm0, %v1015_v5, %v1018_v20 }
  0xa7   : > { %v1037_v17 = vsel %vm1033_vm1, %v1021_v26, %v1036_v6  ;;  %v1045_v57 = vsel %vm1033_vm1, %v1027_v38, %v1044_v34  ;;  %v8009_v42 = vmul.u32.u64.low %v1047_v15, %v1042_v29  ;;  %v8010_v3 = vmul.u32.u64.high %v1047_v15, %v1042_v29, %v8009_v42 }
  0xa8   : > { %v1046_v59 = vsel %vm1032_vm4, %v1043_v52, %v1045_v57  ;;  %v6887_v63 = vadd.s32 4294967169, %v1427_v48  ;;  %vm886_vm7 = vcmp.lt.s32.totalorder %v885_v50, 2  ;;  %vm887_vm8 = vcmp.eq.s32.totalorder %v885_v50, 0 }
  0xa9   : > { %vm890_vm10 = vcmp.eq.s32.totalorder %v885_v50, 2  ;;  %v963_v47 = vclz %v6862_v16  ;;  %v982_v55 = vsel %vm897_vm2, %v981_v54, %v957_v21  ;;  %v1038_v9 = vsel %vm1032_vm4, %v1035_v61, %v1037_v17 }
  0xaa   : > { %v8016_v32 = vmul.u32.u64.low %v1047_v15, %v1046_v59  ;;  %v8017_v62 = vmul.u32.u64.high %v1047_v15, %v1046_v59, %v8016_v32  ;;  %vm1201_vm9 = vcmp.lt.s32.totalorder %v1200_v25, 2  ;;  %vm1202_vm11 = vcmp.eq.s32.totalorder %v1200_v25, 0 }
  0xab   : > { %v6863_v1 = vadd.s32 4294967294, %v963_v47  ;;  %v1433_v2 = vadd.s32 1, %v6887_v63  ;;  %v951_v12 = vadd.s32 %v7942_v45, %v7948_v8  ;;  %v1057_v13 = vadd.s32 1, %v8010_v3 }
  0xac   : > { %v7296_v43 = vpop.eup %7295  ;;  %vm1205_vm12 = vcmp.eq.s32.totalorder %v1200_v25, 2  ;;  %v984_v27 = vsel %vm7991_vm5, 0, %v982_v55  ;;  %v1054_v19 = vmul.u32 %v1047_v15, %v1038_v9  ;;  %vm1056_vm14 = vc.u32 %v8017_v62, %v8009_v42  ;;  %v8046_v25 = vld [vmem:[%s7504_s26 + $0x8] sm:$0xff] }
  0xad   : > { %v7298_v10 = vpop.eup %7297  ;;  %v891_v4 = vxor.u32 2147483648, %v7296_v43  ;;  %vm6864_vm13 = vcmp.lt.s32.totalorder %v6863_v1, 0  ;;  %vm1434_vm15 = vcmp.gt.s32.totalorder %v1433_v2, 0  ;;  %v1058_v20 = vsel %vm1056_vm14, %v1057_v13, %v8010_v3 }
  0xae   : > { %v888_v18 = vxor.u32 2147483648, %v7298_v10  ;;  %v966_v21 = vsel %vm6864_vm13, 0, %v6863_v1  ;;  %v1059_v5 = vadd.s32 %v1058_v20, %v1054_v19  ;;  %v988_v15 = vadd.s32 3, %v984_v27 }
  0xaf   : > { %v892_v56 = vsel %vm890_vm10, %v891_v4, %v7298_v10  ;;  %v967_v45 = vsub.s32 32, %v966_v21  ;;  %v968_v8 = vshll.u32 %v7986_v28, %v966_v21  ;;  %v971_v22 = vsub.s32 4294967266, %v966_v21 }
  0xb0   : > { %v889_v0 = vsel %vm887_vm8, %v7296_v43, %v888_v18  ;;  %v1204_v26 = vsel %vm1202_vm11, %v7296_v43, %v888_v18  ;;  %v1207_v30 = vsel %vm1205_vm12, %v891_v4, %v7298_v10  ;;  %v1430_v6 = vand.u32 8388607, %v1423_v60 }
  0xb1   : > { %v893_v23 = vsel %vm886_vm7, %v889_v0, %v892_v56  ;;  %v969_v38 = vshrl.u32 %v951_v12, %v967_v45  ;;  %v972_v24 = vadd.s32 127, %v971_v22  ;;  %v1208_v28 = vsel %vm1201_vm9, %v1204_v26, %v1207_v30 }
  0xb2   : > { %v894_v11 = vsel %vm883_vm6, nan, %v893_v23  ;;  %v1435_v14 = vsel %vm1434_vm15, %v1433_v2, 0  ;;  %v1060_v50 = vadd.s32 536870912, %v1059_v5  ;;  %v1209_v51 = vsel %vm883_vm6, nan, %v1208_v28 }
  0xb3   : > { %6869 = vst [vmem:[%s7504_s26 + $0x48] sm:$0xff] %v894_v11  ;;  %v970_v46 = vor.u32 %v969_v38, %v968_v8  ;;  %v973_v48 = vshll.u32 %v972_v24, 23  ;;  %6884 = vst [vmem:[%s7504_s26 + $0x60] sm:$0xff] %v1209_v51  ;;  %v1437_v53 = vand.u32 31, %v1435_v14  ;;  %v8049_v16 = vmul.f32 4.0, %v8046_v25 }
  0xb4   : > { %v8043_v52 = vshrl.u32 %v1060_v50, 30  ;;  %v8051_v17 = vand.u32 3, %v988_v15  ;;  %v1431_v59 = vor.u32 8388608, %v1430_v6  ;;  %v8062_v1 = vand.u32 3, %v984_v27 }
  0xb5   : > { %v974_v54 = vor.u32 4788187, %v973_v48  ;;  %v977_v29 = vcvt.s32.f32 %v970_v46  ;;  %v1438_v34 = vsub.s32 32, %v1437_v53  ;;  %v1440_v31 = vshll.u32 %v7439_v33, %v1437_v53 }
  0xb6   : > { %v1062_v57 = vshll.u32 %v8043_v52, 30  ;;  %v1443_v63 = vshll.u32 %v7440_v35, %v1437_v53  ;;  %v1446_v47 = vshll.u32 %v7441_v37, %v1437_v53  ;;  %v1436_v2 = vshrl.u32 %v1435_v14, 5 }
  0xb7   : > { %v975_v61 = vand.u32 2147483647, %v974_v54  ;;  %v1441_v3 = vshrl.u32 %v7440_v35, %v1438_v34  ;;  %v1444_v32 = vshrl.u32 %v7441_v37, %v1438_v34  ;;  %v1447_v43 = vshrl.u32 %v7442_v39, %v1438_v34 }
  0xb8   : > { %v8058_v9 = vsub.s32 %v1059_v5, %v1062_v57  ;;  %v1449_v10 = vshll.u32 %v7442_v39, %v1437_v53  ;;  %v1450_v4 = vshrl.u32 %v7443_v41, %v1438_v34  ;;  %v8067_v18 = vshll.u32 %v1431_v59, 8 }
  0xb9   : > { %v978_v55 = vmul.f32 %v977_v29, %v975_v61  ;;  %v1530_v19 = vand.u32 2139095040, %v8049_v16  ;;  %v1439_v56 = vshrl.u32 %v7439_v33, %v1438_v34  ;;  %v1442_v21 = vor.u32 %v1441_v3, %v1440_v31 }
  0xba   : > { %v1065_v13 = vsub.s32 0, %v8058_v9  ;;  %v1452_v0 = vshll.u32 %v7443_v41, %v1437_v53  ;;  %v1453_v27 = vshrl.u32 %v7444_v49, %v1438_v34  ;;  %v1445_v22 = vor.u32 %v1444_v32, %v1443_v63 }
  0xbb   : > { %v979_v12 = vxor.u32 2147483648, %v978_v55  ;;  %v1448_v23 = vor.u32 %v1447_v43, %v1446_v47  ;;  %vm1001_vm0 = vcmp.lt.s32.totalorder %v7849_v7, 0  ;;  %v1451_v26 = vor.u32 %v1450_v4, %v1449_v10 }
  0xbc   : > { %v6866_v8 = vmin.u32 %v1065_v13, %v8058_v9  ;;  %v1454_v30 = vor.u32 %v1453_v27, %v1452_v0  ;;  %vm1455_vm1 = vcmp.lt.s32.totalorder %v1436_v2, 1  ;;  %v1055_v11 = vadd.s32 %v8009_v42, %v8017_v62 }
  0xbd   : > { %v980_v45 = vsel %vm897_vm2, %v979_v12, %v978_v55  ;;  %v1531_v24 = vshrl.u32 %v1530_v19, 23  ;;  %v1085_v5 = vsub.s32 4, %v8043_v52  ;;  %vm1456_vm2 = vcmp.lt.s32.totalorder %v1436_v2, 2 }
  0xbe   : > { %v983_v20 = vsel %vm7991_vm5, %v7814_v44, %v980_v45  ;;  %v1067_v38 = vclz %v6866_v8  ;;  %vm1457_vm3 = vcmp.lt.s32.totalorder %v1436_v2, 3  ;;  %vm8085_vm4 = vcmp.le.f32.partialorder %v999_v58, 0.7853982 }
  0xbf   : > { %7299 = vcosq.f32 %v983_v20  ;;  %vm1458_vm5 = vcmp.lt.s32.totalorder %v1436_v2, 4  ;;  %v1459_v28 = vsel %vm1455_vm1, %v1439_v56, %v1442_v21  ;;  %v1463_v6 = vsel %vm1455_vm1, %v1442_v21, %v1445_v22 }
  0xc0   : > { %7301 = vsinq.f32 %v983_v20  ;;  %v6867_v15 = vadd.s32 4294967294, %v1067_v38  ;;  %vm991_vm6 = vcmp.eq.s32.totalorder %v8051_v17, 0  ;;  %v1460_v42 = vsel %vm1458_vm5, %v1448_v23, 2102212464 }
  0xc1   : > { %v1464_v62 = vsel %vm1458_vm5, %v1451_v26, 920167782  ;;  %v1467_v14 = vsel %vm1455_vm1, %v1445_v22, %v1448_v23  ;;  %v1468_v46 = vsel %vm1458_vm5, %v1454_v30, 1326507024  ;;  %vm990_vm7 = vcmp.lt.s32.totalorder %v8051_v17, 2 }
  0xc2   : > { %vm6868_vm8 = vcmp.lt.s32.totalorder %v6867_v15, 0  ;;  %v1461_v58 = vsel %vm1457_vm3, %v1445_v22, %v1460_v42  ;;  %v1465_v48 = vsel %vm1457_vm3, %v1448_v23, %v1464_v62  ;;  %v1469_v50 = vsel %vm1457_vm3, %v1451_v26, %v1468_v46 }
  0xc3   : > { %vm987_vm10 = vweird.f32 %v7814_v44  ;;  %vm994_vm9 = vcmp.eq.s32.totalorder %v8051_v17, 2  ;;  %v1070_v51 = vsel %vm6868_vm8, 0, %v6867_v15  ;;  %v1466_v53 = vsel %vm1456_vm2, %v1463_v6, %v1465_v48 }
  0xc4   : > { %v1470_v54 = vsel %vm1456_vm2, %v1467_v14, %v1469_v50  ;;  %v1071_v29 = vsub.s32 32, %v1070_v51  ;;  %v1072_v34 = vshll.u32 %v8058_v9, %v1070_v51  ;;  %v1075_v61 = vsub.s32 4294967266, %v1070_v51 }
  0xc5   : > { %v1462_v57 = vsel %vm1456_vm2, %v1459_v28, %v1461_v58  ;;  %v8101_v59 = vmul.u32.u64.low %v8067_v18, %v1470_v54  ;;  %v8102_v31 = vmul.u32.u64.high %v8067_v18, %v1470_v54, %v8101_v59  ;;  %v1086_v32 = vsel %vm1001_vm0, %v1085_v5, %v8043_v52 }
  0xc6   : > { %v8105_v3 = vmul.u32.u64.low %v8067_v18, %v1466_v53  ;;  %v8106_v63 = vmul.u32.u64.high %v8067_v18, %v1466_v53, %v8105_v3  ;;  %v1073_v47 = vshrl.u32 %v1055_v11, %v1071_v29  ;;  %v1076_v55 = vadd.s32 127, %v1075_v61 }
  0xc7   : > { %v6891_v43 = vadd.s32 4294967169, %v1531_v24  ;;  %vm1304_vm11 = vcmp.lt.s32.totalorder %v8062_v1, 2  ;;  %vm1305_vm12 = vcmp.eq.s32.totalorder %v8062_v1, 0  ;;  %vm1308_vm13 = vcmp.eq.s32.totalorder %v8062_v1, 2 }
  0xc8   : > { %v1527_v9 = vand.u32 2147483647, %v8049_v16  ;;  %v1074_v10 = vor.u32 %v1073_v47, %v1072_v34  ;;  %v1077_v4 = vshll.u32 %v1076_v55, 23  ;;  %v1478_v12 = vmul.u32 %v8067_v18, %v1462_v57 }
  0xc9   : > { %v7300_v2 = vpop.eup %7299  ;;  %v1537_v13 = vadd.s32 1, %v6891_v43  ;;  %v1088_v52 = vsel %vm8085_vm4, 0, %v1086_v32  ;;  %vm1480_vm14 = vc.u32 %v8102_v31, %v8105_v3  ;;  %v1481_v21 = vadd.s32 1, %v8106_v63 }
  0xca   : > { %v7302_v19 = vpop.eup %7301  ;;  %v995_v56 = vxor.u32 2147483648, %v7300_v2  ;;  %v1078_v27 = vor.u32 4788187, %v1077_v4  ;;  %v1081_v45 = vcvt.s32.f32 %v1074_v10  ;;  %v1534_v5 = vand.u32 8388607, %v1527_v9 }
  0xcb   : > { %v992_v0 = vxor.u32 2147483648, %v7302_v19  ;;  %vm1538_vm15 = vcmp.gt.s32.totalorder %v1537_v13, 0  ;;  %v1482_v22 = vsel %vm1480_vm14, %v1481_v21, %v8106_v63  ;;  %v1092_v14 = vadd.s32 3, %v1088_v52 }
  0xcc   : > { %v996_v8 = vsel %vm994_vm9, %v995_v56, %v7302_v19  ;;  %v1310_v18 = vsel %vm1308_vm13, %v995_v56, %v7302_v19  ;;  %v1539_v23 = vsel %vm1538_vm15, %v1537_v13, 0  ;;  %v1079_v26 = vand.u32 2147483647, %v1078_v27 }
  0xcd   : > { %v993_v20 = vsel %vm991_vm6, %v7300_v2, %v992_v0  ;;  %v1307_v30 = vsel %vm1305_vm12, %v7300_v2, %v992_v0  ;;  %v1483_v11 = vadd.s32 %v1482_v22, %v1478_v12  ;;  %v1541_v15 = vand.u32 31, %v1539_v23 }
  0xce   : > { %v997_v38 = vsel %vm990_vm7, %v993_v20, %v996_v8  ;;  %v1311_v24 = vsel %vm1304_vm11, %v1307_v30, %v1310_v18  ;;  %v1082_v6 = vmul.f32 %v1081_v45, %v1079_v26  ;;  %v8143_v17 = vshrl.u32 %v1539_v23, 5  ;;  %v8189_v26 = vld [vmem:[%s7504_s26 + $0x10] sm:$0xff] }
  0xcf   : > { %v998_v28 = vsel %vm987_vm10, nan, %v997_v38  ;;  %v1312_v42 = vsel %vm987_vm10, nan, %v1311_v24  ;;  %v1484_v62 = vadd.s32 536870912, %v1483_v11  ;;  %v1542_v46 = vsub.s32 32, %v1541_v15 }
  0xd0   : > { %6870 = vst [vmem:[%s7504_s26 + $0x50] sm:$0xff] %v998_v28  ;;  %6885 = vst [vmem:[%s7504_s26 + $0x68] sm:$0xff] %v1312_v42  ;;  %v1544_v1 = vshll.u32 %v7439_v33, %v1541_v15  ;;  %v1083_v58 = vxor.u32 2147483648, %v1082_v6  ;;  %v1547_v50 = vshll.u32 %v7440_v35, %v1541_v15  ;;  %v1553_v51 = vshll.u32 %v7442_v39, %v1541_v15 }
  0xd1   : > { %v8146_v48 = vshrl.u32 %v1484_v62, 30  ;;  %v1545_v53 = vshrl.u32 %v7440_v35, %v1542_v46  ;;  %v1548_v44 = vshrl.u32 %v7441_v37, %v1542_v46  ;;  %v1550_v54 = vshll.u32 %v7441_v37, %v1541_v15 }
  0xd2   : > { %v1551_v29 = vshrl.u32 %v7442_v39, %v1542_v46  ;;  %v1084_v34 = vsel %vm1001_vm0, %v1083_v58, %v1082_v6  ;;  %v1535_v57 = vor.u32 8388608, %v1534_v5  ;;  %v1554_v59 = vshrl.u32 %v7443_v41, %v1542_v46 }
  0xd3   : > { %v1486_v61 = vshll.u32 %v8146_v48, 30  ;;  %v1087_v63 = vsel %vm8085_vm4, %v7849_v7, %v1084_v34  ;;  %v8161_v47 = vand.u32 3, %v1088_v52  ;;  %v1546_v55 = vor.u32 %v1545_v53, %v1544_v1 }
  0xd4   : > { %v1556_v32 = vshll.u32 %v7443_v41, %v1541_v15  ;;  %7303 = vcosq.f32 %v1087_v63  ;;  %v1549_v2 = vor.u32 %v1548_v44, %v1547_v50  ;;  %v1555_v10 = vor.u32 %v1554_v59, %v1553_v51 }
  0xd5   : > { %v8164_v43 = vsub.s32 %v1483_v11, %v1486_v61  ;;  %7305 = vsinq.f32 %v1087_v63  ;;  %vm1425_vm0 = vcmp.lt.s32.totalorder %v7959_v36, 0  ;;  %v1552_v4 = vor.u32 %v1551_v29, %v1550_v54 }
  0xd6   : > { %v1557_v12 = vshrl.u32 %v7444_v49, %v1542_v46  ;;  %vm1559_vm1 = vcmp.lt.s32.totalorder %v8143_v17, 1  ;;  %v1093_v40 = vand.u32 3, %v1092_v14  ;;  %vm1561_vm2 = vcmp.lt.s32.totalorder %v8143_v17, 3 }
  0xd7   : > { %v1489_v13 = vsub.s32 0, %v8164_v43  ;;  %v8171_v19 = vshll.u32 %v1535_v57, 8  ;;  %vm1408_vm3 = vcmp.eq.s32.totalorder %v8161_v47, 0  ;;  %v1543_v56 = vshrl.u32 %v7439_v33, %v1542_v46 }
  0xd8   : > { %v1558_v52 = vor.u32 %v1557_v12, %v1556_v32  ;;  %vm1560_vm4 = vcmp.lt.s32.totalorder %v8143_v17, 2  ;;  %vm1562_vm5 = vcmp.lt.s32.totalorder %v8143_v17, 4  ;;  %vm1407_vm6 = vcmp.lt.s32.totalorder %v8161_v47, 2 }
  0xd9   : > { %v6888_v21 = vmin.u32 %v1489_v13, %v8164_v43  ;;  %v1564_v0 = vsel %vm1562_vm5, %v1552_v4, 2102212464  ;;  %v1567_v27 = vsel %vm1559_vm1, %v1546_v55, %v1549_v2  ;;  %v1568_v45 = vsel %vm1562_vm5, %v1555_v10, 920167782 }
  0xda   : > { %vm1091_vm7 = vweird.f32 %v7849_v7  ;;  %vm1411_vm8 = vcmp.eq.s32.totalorder %v8161_v47, 2  ;;  %v1569_v8 = vsel %vm1561_vm2, %v1552_v4, %v1568_v45  ;;  %v1571_v18 = vsel %vm1559_vm1, %v1549_v2, %v1552_v4 }
  0xdb   : > { %v1572_v22 = vsel %vm1562_vm5, %v1558_v52, 1326507024  ;;  %vm1094_vm10 = vcmp.lt.s32.totalorder %v1093_v40, 2  ;;  %v1491_v23 = vclz %v6888_v21  ;;  %v1509_v20 = vsub.s32 4, %v8146_v48 }
  0xdc   : > { %v8192_v30 = vmul.f32 4.0, %v8189_v26  ;;  %v1563_v11 = vsel %vm1559_vm1, %v1543_v56, %v1546_v55  ;;  %v1565_v38 = vsel %vm1561_vm2, %v1549_v2, %v1564_v0  ;;  %v1570_v24 = vsel %vm1560_vm4, %v1567_v27, %v1569_v8 }
  0xdd   : > { %v1573_v5 = vsel %vm1561_vm2, %v1555_v10, %v1572_v22  ;;  %vm8204_vm9 = vcmp.le.f32.partialorder %v1423_v60, 0.7853982  ;;  %v6889_v28 = vadd.s32 4294967294, %v1491_v23  ;;  %vm1095_vm11 = vcmp.eq.s32.totalorder %v1093_v40, 0 }
  0xde   : > { %v1574_v6 = vsel %vm1560_vm4, %v1571_v18, %v1573_v5  ;;  %v8211_v42 = vmul.u32.u64.low %v8171_v19, %v1570_v24  ;;  %v8212_v62 = vmul.u32.u64.high %v8171_v19, %v1570_v24, %v8211_v42  ;;  %vm1098_vm12 = vcmp.eq.s32.totalorder %v1093_v40, 2  ;;  %v7304_v1 = vpop.eup %7303 }
  0xdf   : > { %v8215_v14 = vmul.u32.u64.low %v8171_v19, %v1574_v6  ;;  %v8216_v46 = vmul.u32.u64.high %v8171_v19, %v1574_v6, %v8215_v14  ;;  %v1479_v60 = vadd.s32 %v8105_v3, %v8102_v31  ;;  %vm6890_vm13 = vcmp.lt.s32.totalorder %v6889_v28, 0  ;;  %v7306_v51 = vpop.eup %7305 }
  0xe0   : > { %v1510_v58 = vsel %vm1425_vm0, %v1509_v20, %v8146_v48  ;;  %v1566_v50 = vsel %vm1560_vm4, %v1563_v11, %v1565_v38  ;;  %v1099_v53 = vxor.u32 2147483648, %v7304_v1  ;;  %v1494_v44 = vsel %vm6890_vm13, 0, %v6889_v28  ;;  %v8254_v20 = vld [vmem:[%s7504_s26] sm:$0xff] }
  0xe1   : > { %v1631_v54 = vand.u32 2147483647, %v8192_v30  ;;  %v1634_v29 = vand.u32 2139095040, %v8192_v30  ;;  %v1096_v34 = vxor.u32 2147483648, %v7306_v51  ;;  %v1495_v61 = vsub.s32 32, %v1494_v44 }
  0xe2   : > { %v1496_v57 = vshll.u32 %v8164_v43, %v1494_v44  ;;  %v1499_v31 = vsub.s32 4294967266, %v1494_v44  ;;  %v1100_v3 = vsel %vm1098_vm12, %v1099_v53, %v7306_v51  ;;  %v1413_v48 = vsel %vm1411_vm8, %v1099_v53, %v7306_v51 }
  0xe3   : > { %v1582_v17 = vmul.u32 %v8171_v19, %v1566_v50  ;;  %vm1584_vm14 = vc.u32 %v8216_v46, %v8211_v42  ;;  %v1097_v59 = vsel %vm1095_vm11, %v7304_v1, %v1096_v34  ;;  %v1410_v63 = vsel %vm1408_vm3, %v7304_v1, %v1096_v34 }
  0xe4   : > { %v1497_v55 = vshrl.u32 %v1479_v60, %v1495_v61  ;;  %v1500_v32 = vadd.s32 127, %v1499_v31  ;;  %v1101_v43 = vsel %vm1094_vm10, %v1097_v59, %v1100_v3  ;;  %v1414_v2 = vsel %vm1407_vm6, %v1410_v63, %v1413_v48 }
  0xe5   : > { %v1585_v10 = vadd.s32 1, %v8212_v62  ;;  %v1635_v4 = vshrl.u32 %v1634_v29, 23  ;;  %v1102_v12 = vsel %vm1091_vm7, nan, %v1101_v43  ;;  %v1415_v13 = vsel %vm1091_vm7, nan, %v1414_v2 }
  0xe6   : > { %v1498_v19 = vor.u32 %v1497_v55, %v1496_v57  ;;  %v1501_v56 = vshll.u32 %v1500_v32, 23  ;;  %6871 = vst [vmem:[%s7504_s26 + $0x58] sm:$0xff] %v1102_v12  ;;  %6886 = vst [vmem:[%s7504_s26 + $0x70] sm:$0xff] %v1415_v13  ;;  %v1512_v40 = vsel %vm8204_vm9, 0, %v1510_v58  ;;  %v1638_v21 = vand.u32 8388607, %v1631_v54 }
  0xe7   : > { %v1586_v47 = vsel %vm1584_vm14, %v1585_v10, %v8212_v62  ;;  %v6895_v52 = vadd.s32 4294967169, %v1635_v4  ;;  %v1516_v18 = vadd.s32 3, %v1512_v40  ;;  %v8257_v11 = vmul.f32 8.0, %v8254_v20 }
  0xe8   : > { %v1502_v0 = vor.u32 4788187, %v1501_v56  ;;  %v1505_v27 = vcvt.s32.f32 %v1498_v19  ;;  %v1587_v7 = vadd.s32 %v1586_v47, %v1582_v17  ;;  %v1639_v23 = vor.u32 8388608, %v1638_v21 }
  0xe9   : > { %v1641_v45 = vadd.s32 1, %v6895_v52  ;;  %v8261_v62 = vand.u32 3, %v1516_v18  ;;  %v8264_v1 = vand.u32 3, %v1512_v40  ;;  %v8267_v60 = vadd.s32 %v8211_v42, %v8216_v46 }
  0xea   : > { %v1503_v8 = vand.u32 2147483647, %v1502_v0  ;;  %v1588_v22 = vadd.s32 536870912, %v1587_v7  ;;  %v8269_v50 = vshll.u32 %v1639_v23, 8  ;;  %v2058_v51 = vand.u32 2139095040, %v8257_v11 }
  0xeb   : > { %vm1642_vm15 = vcmp.gt.s32.totalorder %v1641_v45, 0  ;;  %vm1529_vm1 = vcmp.lt.s32.totalorder %v8049_v16, 0  ;;  %vm1519_vm2 = vcmp.eq.s32.totalorder %v8261_v62, 0  ;;  %vm1834_vm3 = vcmp.eq.s32.totalorder %v8264_v1, 0 }
  0xec   : > { %v1506_v38 = vmul.f32 %v1505_v27, %v1503_v8  ;;  %v8259_v24 = vshrl.u32 %v1588_v22, 30  ;;  %v1643_v5 = vsel %vm1642_vm15, %v1641_v45, 0  ;;  %v2059_v59 = vshrl.u32 %v2058_v51, 23 }
  0xed   : > { %v1645_v28 = vand.u32 31, %v1643_v5  ;;  %v1644_v3 = vshrl.u32 %v1643_v5, 5  ;;  %vm1518_vm4 = vcmp.lt.s32.totalorder %v8261_v62, 2  ;;  %vm1833_vm6 = vcmp.lt.s32.totalorder %v8264_v1, 2 }
  0xee   : > { %v1507_v6 = vxor.u32 2147483648, %v1506_v38  ;;  %v1590_v14 = vshll.u32 %v8259_v24, 30  ;;  %v1613_v19 = vsub.s32 4, %v8259_v24  ;;  %vm1837_vm7 = vcmp.eq.s32.totalorder %v8264_v1, 2 }
  0xef   : > { %v1646_v58 = vsub.s32 32, %v1645_v28  ;;  %v1648_v29 = vshll.u32 %v7439_v33, %v1645_v28  ;;  %v1651_v34 = vshll.u32 %v7440_v35, %v1645_v28  ;;  %v1654_v46 = vshll.u32 %v7441_v37, %v1645_v28 }
  0xf0   : > { %v1508_v53 = vsel %vm1425_vm0, %v1507_v6, %v1506_v38  ;;  %v8274_v44 = vsub.s32 %v1587_v7, %v1590_v14  ;;  %v1657_v57 = vshll.u32 %v7442_v39, %v1645_v28  ;;  %vm1522_vm0 = vcmp.eq.s32.totalorder %v8261_v62, 2 }
  0xf1   : > { %v1511_v61 = vsel %vm8204_vm9, %v7959_v36, %v1508_v53  ;;  %v1649_v42 = vshrl.u32 %v7440_v35, %v1646_v58  ;;  %v1652_v48 = vshrl.u32 %v7441_v37, %v1646_v58  ;;  %v1655_v17 = vshrl.u32 %v7442_v39, %v1646_v58 }
  0xf2   : > { %7307 = vcosq.f32 %v1511_v61  ;;  %v1593_v31 = vsub.s32 0, %v8274_v44  ;;  %v1658_v15 = vshrl.u32 %v7443_v41, %v1646_v58  ;;  %v1647_v55 = vshrl.u32 %v7439_v33, %v1646_v58 }
  0xf3   : > { %7309 = vsinq.f32 %v1511_v61  ;;  %v1650_v32 = vor.u32 %v1649_v42, %v1648_v29  ;;  %v1660_v43 = vshll.u32 %v7443_v41, %v1645_v28  ;;  %v1653_v2 = vor.u32 %v1652_v48, %v1651_v34 }
  0xf4   : > { %v6892_v63 = vmin.u32 %v1593_v31, %v8274_v44  ;;  %v1656_v10 = vor.u32 %v1655_v17, %v1654_v46  ;;  %v1659_v4 = vor.u32 %v1658_v15, %v1657_v57  ;;  %v1661_v12 = vshrl.u32 %v7444_v49, %v1646_v58 }
  0xf5   : > { %vm1663_vm5 = vcmp.lt.s32.totalorder %v1644_v3, 1  ;;  %vm1515_vm8 = vweird.f32 %v7959_v36  ;;  %vm1665_vm10 = vcmp.lt.s32.totalorder %v1644_v3, 3  ;;  %vm1666_vm9 = vcmp.lt.s32.totalorder %v1644_v3, 4 }
  0xf6   : > { %v1595_v13 = vclz %v6892_v63  ;;  %v1662_v56 = vor.u32 %v1661_v12, %v1660_v43  ;;  %v6917_v40 = vadd.s32 4294967169, %v2059_v59  ;;  %vm1664_vm11 = vcmp.lt.s32.totalorder %v1644_v3, 2 }
  0xf7   : > { %v1667_v52 = vsel %vm1663_vm5, %v1647_v55, %v1650_v32  ;;  %v1668_v21 = vsel %vm1666_vm9, %v1656_v10, 2102212464  ;;  %v1671_v0 = vsel %vm1663_vm5, %v1650_v32, %v1653_v2  ;;  %v1672_v27 = vsel %vm1666_vm9, %v1659_v4, 920167782 }
  0xf8   : > { %v6893_v47 = vadd.s32 4294967294, %v1595_v13  ;;  %v1675_v7 = vsel %vm1663_vm5, %v1653_v2, %v1656_v10  ;;  %v1676_v45 = vsel %vm1666_vm9, %v1662_v56, 1326507024  ;;  %vm8303_vm12 = vcmp.le.f32.partialorder %v1527_v9, 0.7853982 }
  0xf9   : > { %v1669_v18 = vsel %vm1665_vm10, %v1653_v2, %v1668_v21  ;;  %v1673_v22 = vsel %vm1665_vm10, %v1656_v10, %v1672_v27  ;;  %v1677_v23 = vsel %vm1665_vm10, %v1659_v4, %v1676_v45  ;;  %v1614_v5 = vsel %vm1529_vm1, %v1613_v19, %v8259_v24 }
  0xfa   : > { %vm6894_vm13 = vcmp.lt.s32.totalorder %v6893_v47, 0  ;;  %v1678_v28 = vsel %vm1664_vm11, %v1675_v7, %v1677_v23  ;;  %v2055_v6 = vand.u32 2147483647, %v8257_v11  ;;  %v1674_v53 = vsel %vm1664_vm11, %v1671_v0, %v1673_v22 }
  0xfb   : > { %v1598_v38 = vsel %vm6894_vm13, 0, %v6893_v47  ;;  %v1670_v61 = vsel %vm1664_vm11, %v1667_v52, %v1669_v18  ;;  %v8316_v42 = vmul.u32.u64.low %v8269_v50, %v1678_v28  ;;  %v8317_v46 = vmul.u32.u64.high %v8269_v50, %v1678_v28, %v8316_v42 }
  0xfc   : > { %v7308_v14 = vpop.eup %7307  ;;  %v1599_v58 = vsub.s32 32, %v1598_v38  ;;  %v1600_v9 = vshll.u32 %v8274_v44, %v1598_v38  ;;  %v1603_v51 = vsub.s32 4294967266, %v1598_v38  ;;  %v2065_v48 = vadd.s32 1, %v6917_v40 }
  0xfd   : > { %v7310_v29 = vpop.eup %7309  ;;  %v1523_v34 = vxor.u32 2147483648, %v7308_v14  ;;  %v8323_v17 = vmul.u32.u64.low %v8269_v50, %v1674_v53  ;;  %v8324_v15 = vmul.u32.u64.high %v8269_v50, %v1674_v53, %v8323_v17  ;;  %v1686_v43 = vmul.u32 %v8269_v50, %v1670_v61 }
  0xfe   : > { %v1520_v24 = vxor.u32 2147483648, %v7310_v29  ;;  %v1601_v57 = vshrl.u32 %v8267_v60, %v1599_v58  ;;  %v1604_v31 = vadd.s32 127, %v1603_v51  ;;  %v1616_v62 = vsel %vm8303_vm12, 0, %v1614_v5 }
  0xff   : > { %v1524_v44 = vsel %vm1522_vm0, %v1523_v34, %v7310_v29  ;;  %v1839_v3 = vsel %vm1837_vm7, %v1523_v34, %v7310_v29  ;;  %vm1688_vm14 = vc.u32 %v8317_v46, %v8323_v17  ;;  %v1689_v50 = vadd.s32 1, %v8324_v15 }
 0x100   : > { %v1521_v59 = vsel %vm1519_vm2, %v7308_v14, %v1520_v24  ;;  %v1602_v63 = vor.u32 %v1601_v57, %v1600_v9  ;;  %v1605_v60 = vshll.u32 %v1604_v31, 23  ;;  %v1836_v55 = vsel %vm1834_vm3, %v7308_v14, %v1520_v24 }
 0x101   : > { %v1525_v32 = vsel %vm1518_vm4, %v1521_v59, %v1524_v44  ;;  %v1840_v2 = vsel %vm1833_vm6, %v1836_v55, %v1839_v3  ;;  %vm2066_vm15 = vcmp.gt.s32.totalorder %v2065_v48, 0  ;;  %v1690_v1 = vsel %vm1688_vm14, %v1689_v50, %v8324_v15 }
 0x102   : > { %v1526_v10 = vsel %vm1515_vm8, nan, %v1525_v32  ;;  %v1606_v4 = vor.u32 4788187, %v1605_v60  ;;  %v1609_v12 = vcvt.s32.f32 %v1602_v63  ;;  %v1841_v13 = vsel %vm1515_vm8, nan, %v1840_v2 }
 0x103   : > { %6899 = vst [vmem:[%s7504_s26 + $0x78] sm:$0xff] %v1526_v10  ;;  %6914 = vst [vmem:[%s7504_s26 + $0x90] sm:$0xff] %v1841_v13  ;;  %v2067_v56 = vsel %vm2066_vm15, %v2065_v48, 0  ;;  %v8351_v47 = vmul.f32 8.0, %v8046_v25  ;;  %v1620_v21 = vadd.s32 3, %v1616_v62  ;;  %v1691_v36 = vadd.s32 %v1690_v1, %v1686_v43 }
 0x104   : > { %v1607_v19 = vand.u32 2147483647, %v1606_v4  ;;  %v2069_v40 = vand.u32 31, %v2067_v56  ;;  %v2062_v0 = vand.u32 8388607, %v2055_v6  ;;  %v8355_v27 = vshrl.u32 %v2067_v56, 5 }
 0x105   : > { %v1692_v23 = vadd.s32 536870912, %v1691_v36  ;;  %v8372_v61 = vand.u32 3, %v1620_v21  ;;  %v2159_v57 = vand.u32 2147483647, %v8351_v47  ;;  %vm1633_vm3 = vcmp.lt.s32.totalorder %v8192_v30, 0 }
 0x106   : > { %v1610_v52 = vmul.f32 %v1609_v12, %v1607_v19  ;;  %v2070_v7 = vsub.s32 32, %v2069_v40  ;;  %v2072_v45 = vshll.u32 %v7439_v33, %v2069_v40  ;;  %v2075_v18 = vshll.u32 %v7440_v35, %v2069_v40 }
 0x107   : > { %v2078_v38 = vshll.u32 %v7441_v37, %v2069_v40  ;;  %v2081_v25 = vshll.u32 %v7442_v39, %v2069_v40  ;;  %v2084_v58 = vshll.u32 %v7443_v41, %v2069_v40  ;;  %v1693_v51 = vshrl.u32 %v1692_v23, 30 }
 0x108   : > { %v1611_v22 = vxor.u32 2147483648, %v1610_v52  ;;  %v2073_v5 = vshrl.u32 %v7440_v35, %v2070_v7  ;;  %v2076_v28 = vshrl.u32 %v7441_v37, %v2070_v7  ;;  %v2079_v14 = vshrl.u32 %v7442_v39, %v2070_v7 }
 0x109   : > { %v2082_v53 = vshrl.u32 %v7443_v41, %v2070_v7  ;;  %v2085_v29 = vshrl.u32 %v7444_v49, %v2070_v7  ;;  %v1694_v42 = vshll.u32 %v1693_v51, 30  ;;  %v2063_v24 = vor.u32 8388608, %v2062_v0 }
 0x10a   : > { %v1612_v9 = vsel %vm1529_vm1, %v1611_v22, %v1610_v52  ;;  %v2074_v31 = vor.u32 %v2073_v5, %v2072_v45  ;;  %v2077_v3 = vor.u32 %v2076_v28, %v2075_v18  ;;  %v2080_v59 = vor.u32 %v2079_v14, %v2078_v38 }
 0x10b   : > { %v1615_v34 = vsel %vm8303_vm12, %v8049_v16, %v1612_v9  ;;  %v2083_v48 = vor.u32 %v2082_v53, %v2081_v25  ;;  %v2086_v44 = vor.u32 %v2085_v29, %v2084_v58  ;;  %v8375_v15 = vsub.s32 %v1691_v36, %v1694_v42 }
 0x10c   : > { %7311 = vcosq.f32 %v1615_v34  ;;  %vm2090_vm1 = vcmp.lt.s32.totalorder %v8355_v27, 4  ;;  %vm1623_vm0 = vcmp.eq.s32.totalorder %v8372_v61, 0  ;;  %vm1626_vm2 = vcmp.eq.s32.totalorder %v8372_v61, 2 }
 0x10d   : > { %7313 = vsinq.f32 %v1615_v34  ;;  %v1935_v8 = vand.u32 3, %v1616_v62  ;;  %vm2087_vm4 = vcmp.lt.s32.totalorder %v8355_v27, 1  ;;  %vm1622_vm5 = vcmp.lt.s32.totalorder %v8372_v61, 2 }
 0x10e   : > { %v1697_v63 = vsub.s32 0, %v8375_v15  ;;  %v2071_v60 = vshrl.u32 %v7439_v33, %v2070_v7  ;;  %vm2089_vm6 = vcmp.lt.s32.totalorder %v8355_v27, 3  ;;  %v8386_v55 = vshll.u32 %v2063_v24, 8 }
 0x10f   : > { %vm1619_vm7 = vweird.f32 %v8049_v16  ;;  %vm2088_vm8 = vcmp.lt.s32.totalorder %v8355_v27, 2  ;;  %v2096_v32 = vsel %vm2090_vm1, %v2083_v48, 920167782  ;;  %v2100_v43 = vsel %vm2090_vm1, %v2086_v44, 1326507024 }
 0x110   : > { %v2162_v2 = vand.u32 2139095040, %v8351_v47  ;;  %v6896_v10 = vmin.u32 %v1697_v63, %v8375_v15  ;;  %v2092_v4 = vsel %vm2090_vm1, %v2080_v59, 2102212464  ;;  %v2095_v12 = vsel %vm2087_vm4, %v2074_v31, %v2077_v3 }
 0x111   : > { %v2099_v13 = vsel %vm2087_vm4, %v2077_v3, %v2080_v59  ;;  %v1687_v62 = vadd.s32 %v8323_v17, %v8317_v46  ;;  %vm1936_vm10 = vcmp.lt.s32.totalorder %v1935_v8, 2  ;;  %v2097_v50 = vsel %vm2089_vm6, %v2080_v59, %v2096_v32 }
 0x112   : > { %v2101_v19 = vsel %vm2089_vm6, %v2083_v48, %v2100_v43  ;;  %vm8410_vm9 = vcmp.le.f32.partialorder %v1631_v54, 0.7853982  ;;  %v1699_v1 = vclz %v6896_v10  ;;  %v1717_v40 = vsub.s32 4, %v1693_v51 }
 0x113   : > { %vm1937_vm11 = vcmp.eq.s32.totalorder %v1935_v8, 0  ;;  %v2091_v52 = vsel %vm2087_vm4, %v2071_v60, %v2074_v31  ;;  %v2093_v46 = vsel %vm2089_vm6, %v2077_v3, %v2092_v4  ;;  %v2098_v17 = vsel %vm2088_vm8, %v2095_v12, %v2097_v50 }
 0x114   : > { %v2102_v21 = vsel %vm2088_vm8, %v2099_v13, %v2101_v19  ;;  %v2163_v36 = vshrl.u32 %v2162_v2, 23  ;;  %v6897_v0 = vadd.s32 4294967294, %v1699_v1  ;;  %vm1940_vm12 = vcmp.eq.s32.totalorder %v1935_v8, 2 }
 0x115   : > { %v8423_v7 = vmul.u32.u64.low %v8386_v55, %v2102_v21  ;;  %v8424_v45 = vmul.u32.u64.high %v8386_v55, %v2102_v21, %v8423_v7  ;;  %v8427_v23 = vmul.u32.u64.low %v8386_v55, %v2098_v17  ;;  %v8428_v38 = vmul.u32.u64.high %v8386_v55, %v2098_v17, %v8427_v23 }
 0x116   : > { %v7312_v54 = vpop.eup %7311  ;;  %v6921_v25 = vadd.s32 4294967169, %v2163_v36  ;;  %vm6898_vm13 = vcmp.lt.s32.totalorder %v6897_v0, 0  ;;  %v1718_v28 = vsel %vm1633_vm3, %v1717_v40, %v1693_v51  ;;  %v2094_v14 = vsel %vm2088_vm8, %v2091_v52, %v2093_v46 }
 0x117   : > { %v7314_v18 = vpop.eup %7313  ;;  %v1627_v22 = vxor.u32 2147483648, %v7312_v54  ;;  %v1702_v9 = vsel %vm6898_vm13, 0, %v6897_v0  ;;  %v2110_v48 = vmul.u32 %v8386_v55, %v2094_v14  ;;  %vm2112_vm14 = vc.u32 %v8424_v45, %v8427_v23 }
 0x118   : > { %v1624_v5 = vxor.u32 2147483648, %v7314_v18  ;;  %v2169_v29 = vadd.s32 1, %v6921_v25  ;;  %v1703_v42 = vsub.s32 32, %v1702_v9  ;;  %v1704_v24 = vshll.u32 %v8375_v15, %v1702_v9 }
 0x119   : > { %v1628_v58 = vsel %vm1626_vm2, %v1627_v22, %v7314_v18  ;;  %v1942_v53 = vsel %vm1940_vm12, %v1627_v22, %v7314_v18  ;;  %v1707_v31 = vsub.s32 4294967266, %v1702_v9  ;;  %v1720_v61 = vsel %vm8410_vm9, 0, %v1718_v28 }
 0x11a   : > { %v1625_v34 = vsel %vm1623_vm0, %v7312_v54, %v1624_v5  ;;  %v1939_v27 = vsel %vm1937_vm11, %v7312_v54, %v1624_v5  ;;  %v1705_v3 = vshrl.u32 %v1687_v62, %v1703_v42  ;;  %v2113_v60 = vadd.s32 1, %v8428_v38 }
 0x11b   : > { %v1629_v51 = vsel %vm1622_vm5, %v1625_v34, %v1628_v58  ;;  %v1708_v59 = vadd.s32 127, %v1707_v31  ;;  %v1943_v63 = vsel %vm1936_vm10, %v1939_v27, %v1942_v53  ;;  %vm2170_vm15 = vcmp.gt.s32.totalorder %v2169_v29, 0 }
 0x11c   : > { %v1630_v44 = vsel %vm1619_vm7, nan, %v1629_v51  ;;  %v1944_v15 = vsel %vm1619_vm7, nan, %v1943_v63  ;;  %v1706_v55 = vor.u32 %v1705_v3, %v1704_v24  ;;  %v2171_v43 = vsel %vm2170_vm15, %v2169_v29, 0 }
 0x11d   : > { %6900 = vst [vmem:[%s7504_s26 + $0x80] sm:$0xff] %v1630_v44  ;;  %v1709_v32 = vshll.u32 %v1708_v59, 23  ;;  %6915 = vst [vmem:[%s7504_s26 + $0x98] sm:$0xff] %v1944_v15  ;;  %v2114_v2 = vsel %vm2112_vm14, %v2113_v60, %v8428_v38  ;;  %v2166_v8 = vand.u32 8388607, %v2159_v57  ;;  %v2173_v10 = vand.u32 31, %v2171_v43 }
 0x11e   : > { %v1713_v12 = vcvt.s32.f32 %v1706_v55  ;;  %v1724_v13 = vadd.s32 3, %v1720_v61  ;;  %v2115_v62 = vadd.s32 %v2114_v2, %v2110_v48  ;;  %v8459_v50 = vshrl.u32 %v2171_v43, 5 }
 0x11f   : > { %v1710_v4 = vor.u32 4788187, %v1709_v32  ;;  %v2174_v16 = vsub.s32 32, %v2173_v10  ;;  %v2176_v19 = vshll.u32 %v7439_v33, %v2173_v10  ;;  %v2179_v1 = vshll.u32 %v7440_v35, %v2173_v10 }
 0x120   : > { %v2116_v52 = vadd.s32 536870912, %v2115_v62  ;;  %v2182_v46 = vshll.u32 %v7441_v37, %v2173_v10  ;;  %v2185_v17 = vshll.u32 %v7442_v39, %v2173_v10  ;;  %v2188_v0 = vshll.u32 %v7443_v41, %v2173_v10 }
 0x121   : > { %v1711_v40 = vand.u32 2147483647, %v1710_v4  ;;  %v2177_v21 = vshrl.u32 %v7440_v35, %v2174_v16  ;;  %v2180_v36 = vshrl.u32 %v7441_v37, %v2174_v16  ;;  %v2183_v54 = vshrl.u32 %v7442_v39, %v2174_v16 }
 0x122   : > { %v8469_v18 = vshrl.u32 %v2116_v52, 30  ;;  %v2186_v22 = vshrl.u32 %v7443_v41, %v2174_v16  ;;  %v2189_v38 = vshrl.u32 %v7444_v49, %v2174_v16  ;;  %v8473_v25 = vand.u32 3, %v1724_v13 }
 0x123   : > { %v1714_v7 = vmul.f32 %v1713_v12, %v1711_v40  ;;  %v8475_v5 = vand.u32 3, %v1720_v61  ;;  %v2167_v28 = vor.u32 8388608, %v2166_v8  ;;  %v8478_v14 = vmul.f32 8.0, %v8189_v26 }
 0x124   : > { %v2118_v9 = vshll.u32 %v8469_v18, 30  ;;  %v2178_v53 = vor.u32 %v2177_v21, %v2176_v19  ;;  %v2181_v29 = vor.u32 %v2180_v36, %v2179_v1  ;;  %v2175_v34 = vshrl.u32 %v7439_v33, %v2174_v16 }
 0x125   : > { %v1715_v58 = vxor.u32 2147483648, %v1714_v7  ;;  %v2184_v42 = vor.u32 %v2183_v54, %v2182_v46  ;;  %v2187_v24 = vor.u32 %v2186_v22, %v2185_v17  ;;  %vm2191_vm1 = vcmp.lt.s32.totalorder %v8459_v50, 1 }
 0x126   : > { %v8485_v51 = vsub.s32 %v2115_v62, %v2118_v9  ;;  %v2190_v27 = vor.u32 %v2189_v38, %v2188_v0  ;;  %vm2194_vm0 = vcmp.lt.s32.totalorder %v8459_v50, 4  ;;  %vm2192_vm2 = vcmp.lt.s32.totalorder %v8459_v50, 2 }
 0x127   : > { %v1716_v31 = vsel %vm1633_vm3, %v1715_v58, %v1714_v7  ;;  %vm2193_vm4 = vcmp.lt.s32.totalorder %v8459_v50, 3  ;;  %v2266_v48 = vand.u32 2139095040, %v8478_v14  ;;  %v2196_v3 = vsel %vm2194_vm0, %v2184_v42, 2102212464 }
 0x128   : > { %v1719_v26 = vsel %vm8410_vm9, %v8192_v30, %v1716_v31  ;;  %v2121_v44 = vsub.s32 0, %v8485_v51  ;;  %v2199_v59 = vsel %vm2191_vm1, %v2178_v53, %v2181_v29  ;;  %vm2057_vm3 = vcmp.lt.s32.totalorder %v8257_v11, 0 }
 0x129   : > { %7315 = vcosq.f32 %v1719_v26  ;;  %v2195_v56 = vsel %vm2191_vm1, %v2175_v34, %v2178_v53  ;;  %v2200_v63 = vsel %vm2194_vm0, %v2187_v24, 920167782  ;;  %v2207_v61 = vshll.u32 %v2167_v28, 8 }
 0x12a   : > { %7317 = vsinq.f32 %v1719_v26  ;;  %v6918_v15 = vmin.u32 %v2121_v44, %v8485_v51  ;;  %v2201_v60 = vsel %vm2193_vm4, %v2184_v42, %v2200_v63  ;;  %v2203_v55 = vsel %vm2191_vm1, %v2181_v29, %v2184_v42 }
 0x12b   : > { %v2204_v32 = vsel %vm2194_vm0, %v2190_v27, 1326507024  ;;  %v2197_v43 = vsel %vm2193_vm4, %v2181_v29, %v2196_v3  ;;  %v2202_v2 = vsel %vm2192_vm2, %v2199_v59, %v2201_v60  ;;  %v2267_v10 = vshrl.u32 %v2266_v48, 23 }
 0x12c   : > { %v2205_v8 = vsel %vm2193_vm4, %v2187_v24, %v2204_v32  ;;  %vm2039_vm5 = vcmp.lt.s32.totalorder %v8475_v5, 2  ;;  %vm2040_vm6 = vcmp.eq.s32.totalorder %v8475_v5, 0  ;;  %vm8521_vm7 = vcmp.le.f32.partialorder %v2055_v6, 0.7853982 }
 0x12d   : > { %v2123_v12 = vclz %v6918_v15  ;;  %v2141_v13 = vsub.s32 4, %v8469_v18  ;;  %vm1723_vm8 = vweird.f32 %v8192_v30  ;;  %v2206_v62 = vsel %vm2192_vm2, %v2203_v55, %v2205_v8 }
 0x12e   : > { %v8529_v16 = vmul.u32.u64.low %v2207_v61, %v2202_v2  ;;  %v8530_v19 = vmul.u32.u64.high %v2207_v61, %v2202_v2, %v8529_v16  ;;  %v6925_v1 = vadd.s32 4294967169, %v2267_v10  ;;  %v2198_v6 = vsel %vm2192_vm2, %v2195_v56, %v2197_v43 }
 0x12f   : > { %v6919_v40 = vadd.s32 4294967294, %v2123_v12  ;;  %v8535_v52 = vmul.u32.u64.low %v2207_v61, %v2206_v62  ;;  %v8536_v46 = vmul.u32.u64.high %v2207_v61, %v2206_v62, %v8535_v52  ;;  %vm1726_vm10 = vcmp.lt.s32.totalorder %v8473_v25, 2 }
 0x130   : > { %vm2043_vm9 = vcmp.eq.s32.totalorder %v8475_v5, 2  ;;  %v2263_v17 = vand.u32 2147483647, %v8478_v14  ;;  %v2273_v21 = vadd.s32 1, %v6925_v1  ;;  %vm1727_vm11 = vcmp.eq.s32.totalorder %v8473_v25, 0 }
 0x131   : > { %vm1730_vm12 = vcmp.eq.s32.totalorder %v8473_v25, 2  ;;  %v2111_v36 = vadd.s32 %v8427_v23, %v8424_v45  ;;  %vm6920_vm13 = vcmp.lt.s32.totalorder %v6919_v40, 0  ;;  %v2214_v54 = vmul.u32 %v2207_v61, %v2198_v6 }
 0x132   : > { %v2126_v50 = vsel %vm6920_vm13, 0, %v6919_v40  ;;  %v2217_v0 = vadd.s32 1, %v8530_v19  ;;  %vm2274_vm14 = vcmp.gt.s32.totalorder %v2273_v21, 0  ;;  %v2142_v58 = vsel %vm2057_vm3, %v2141_v13, %v8469_v18 }
 0x133   : > { %v7316_v7 = vpop.eup %7315  ;;  %v2127_v22 = vsub.s32 32, %v2126_v50  ;;  %v2128_v38 = vshll.u32 %v8485_v51, %v2126_v50  ;;  %v2131_v28 = vsub.s32 4294967266, %v2126_v50  ;;  %vm2216_vm15 = vc.u32 %v8536_v46, %v8529_v16 }
 0x134   : > { %v7318_v9 = vpop.eup %7317  ;;  %v1731_v53 = vxor.u32 2147483648, %v7316_v7  ;;  %v2270_v45 = vand.u32 8388607, %v2263_v17  ;;  %v2275_v23 = vsel %vm2274_vm14, %v2273_v21, 0  ;;  %v2218_v24 = vsel %vm2216_vm15, %v2217_v0, %v8530_v19 }
 0x135   : > { %v1728_v29 = vxor.u32 2147483648, %v7318_v9  ;;  %v2129_v34 = vshrl.u32 %v2111_v36, %v2127_v22  ;;  %v2132_v42 = vadd.s32 127, %v2131_v28  ;;  %v8561_v51 = vsel %vm8521_vm7, 0, %v2142_v58 }
 0x136   : > { %v1732_v31 = vsel %vm1730_vm12, %v1731_v53, %v7318_v9  ;;  %v2045_v18 = vsel %vm2043_vm9, %v1731_v53, %v7318_v9  ;;  %v2219_v27 = vadd.s32 %v2218_v24, %v2214_v54  ;;  %v2277_v61 = vand.u32 31, %v2275_v23 }
 0x137   : > { %v1729_v26 = vsel %vm1727_vm11, %v7316_v7, %v1728_v29  ;;  %v2042_v48 = vsel %vm2040_vm6, %v7316_v7, %v1728_v29  ;;  %v2130_v44 = vor.u32 %v2129_v34, %v2128_v38  ;;  %v2133_v3 = vshll.u32 %v2132_v42, 23 }
 0x138   : > { %v1733_v59 = vsel %vm1726_vm10, %v1729_v26, %v1732_v31  ;;  %v2046_v56 = vsel %vm2039_vm5, %v2042_v48, %v2045_v18  ;;  %v2220_v63 = vadd.s32 536870912, %v2219_v27  ;;  %v2148_v43 = vadd.s32 3, %v8561_v51 }
 0x139   : > { %v1734_v15 = vsel %vm1723_vm8, nan, %v1733_v59  ;;  %v2047_v60 = vsel %vm1723_vm8, nan, %v2046_v56  ;;  %v2134_v55 = vor.u32 4788187, %v2133_v3  ;;  %v2137_v32 = vcvt.s32.f32 %v2130_v44 }
 0x13a   : > { %6901 = vst [vmem:[%s7504_s26 + $0x88] sm:$0xff] %v1734_v15  ;;  %6916 = vst [vmem:[%s7504_s26 + $0xa0] sm:$0xff] %v2047_v60  ;;  %v8578_v2 = vshrl.u32 %v2220_v63, 30  ;;  %v2271_v25 = vor.u32 8388608, %v2270_v45  ;;  %v2278_v8 = vsub.s32 32, %v2277_v61  ;;  %v2276_v10 = vshrl.u32 %v2275_v23, 5 }
 0x13b   : > { %v2135_v5 = vand.u32 2147483647, %v2134_v55  ;;  %v2280_v12 = vshll.u32 %v7439_v33, %v2277_v61  ;;  %v2283_v13 = vshll.u32 %v7440_v35, %v2277_v61  ;;  %v2286_v19 = vshll.u32 %v7441_v37, %v2277_v61 }
 0x13c   : > { %v2222_v62 = vshll.u32 %v8578_v2, 30  ;;  %v2281_v30 = vshrl.u32 %v7440_v35, %v2278_v8  ;;  %v2289_v1 = vshll.u32 %v7442_v39, %v2277_v61  ;;  %v2284_v6 = vshrl.u32 %v7441_v37, %v2278_v8 }
 0x13d   : > { %v2138_v40 = vmul.f32 %v2137_v32, %v2135_v5  ;;  %v2287_v52 = vshrl.u32 %v7442_v39, %v2278_v8  ;;  %v2290_v21 = vshrl.u32 %v7443_v41, %v2278_v8  ;;  %v2292_v50 = vshll.u32 %v7443_v41, %v2277_v61 }
 0x13e   : > { %v8589_v36 = vsub.s32 %v2219_v27, %v2222_v62  ;;  %v2293_v54 = vshrl.u32 %v7444_v49, %v2278_v8  ;;  %v8593_v7 = vand.u32 3, %v2148_v43  ;;  %v8595_v22 = vshll.u32 %v2271_v25, 8 }
 0x13f   : > { %v2139_v0 = vxor.u32 2147483648, %v2138_v40  ;;  %v2279_v28 = vshrl.u32 %v7439_v33, %v2278_v8  ;;  %v2282_v58 = vor.u32 %v2281_v30, %v2280_v12  ;;  %v2285_v9 = vor.u32 %v2284_v6, %v2283_v13 }
 0x140   : > { %v2225_v38 = vsub.s32 0, %v8589_v36  ;;  %vm2161_vm1 = vcmp.lt.s32.totalorder %v8351_v47, 0  ;;  %v2288_v45 = vor.u32 %v2287_v52, %v2286_v19  ;;  %v2291_v23 = vor.u32 %v2290_v21, %v2289_v1 }
 0x141   : > { %v2140_v53 = vsel %vm2057_vm3, %v2139_v0, %v2138_v40  ;;  %vm2295_vm0 = vcmp.lt.s32.totalorder %v2276_v10, 1  ;;  %v2294_v42 = vor.u32 %v2293_v54, %v2292_v50  ;;  %vm2298_vm2 = vcmp.lt.s32.totalorder %v2276_v10, 4 }
 0x142   : > { %v2143_v29 = vsel %vm8521_vm7, %v8257_v11, %v2140_v53  ;;  %v6922_v34 = vmin.u32 %v2225_v38, %v8589_v36  ;;  %vm2296_vm4 = vcmp.lt.s32.totalorder %v2276_v10, 2  ;;  %vm2297_vm5 = vcmp.lt.s32.totalorder %v2276_v10, 3 }
 0x143   : > { %7319 = vcosq.f32 %v2143_v29  ;;  %v2300_v24 = vsel %vm2298_vm2, %v2288_v45, 2102212464  ;;  %vm8609_vm3 = vcmp.le.f32.partialorder %v2159_v57, 0.7853982  ;;  %v2299_v4 = vsel %vm2295_vm0, %v2279_v28, %v2282_v58 }
 0x144   : > { %7321 = vsinq.f32 %v2143_v29  ;;  %v2227_v18 = vclz %v6922_v34  ;;  %v2303_v27 = vsel %vm2295_vm0, %v2282_v58, %v2285_v9  ;;  %v2301_v26 = vsel %vm2297_vm5, %v2285_v9, %v2300_v24 }
 0x145   : > { %v2304_v48 = vsel %vm2298_vm2, %v2291_v23, 920167782  ;;  %v2307_v44 = vsel %vm2295_vm0, %v2285_v9, %v2288_v45  ;;  %v2464_v3 = vand.u32 3, %v8561_v51  ;;  %v2245_v56 = vsub.s32 4, %v8578_v2 }
 0x146   : > { %v6923_v59 = vadd.s32 4294967294, %v2227_v18  ;;  %v2305_v57 = vsel %vm2297_vm5, %v2288_v45, %v2304_v48  ;;  %v2308_v63 = vsel %vm2298_vm2, %v2294_v42, 1326507024  ;;  %vm2150_vm6 = vcmp.lt.s32.totalorder %v8593_v7, 2 }
 0x147   : > { %v2215_v61 = vadd.s32 %v8529_v16, %v8536_v46  ;;  %v2302_v15 = vsel %vm2296_vm4, %v2299_v4, %v2301_v26  ;;  %v2306_v60 = vsel %vm2296_vm4, %v2303_v27, %v2305_v57  ;;  %v2309_v55 = vsel %vm2297_vm5, %v2291_v23, %v2308_v63 }
 0x148   : > { %vm2147_vm7 = vweird.f32 %v8257_v11  ;;  %vm6924_vm8 = vcmp.lt.s32.totalorder %v6923_v59, 0  ;;  %v2310_v51 = vsel %vm2296_vm4, %v2307_v44, %v2309_v55  ;;  %v8640_v46 = vmul.f32 16.0, %v8254_v20 }
 0x149   : > { %v8631_v32 = vmul.u32.u64.low %v8595_v22, %v2306_v60  ;;  %v8632_v43 = vmul.u32.u64.high %v8595_v22, %v2306_v60, %v8631_v32  ;;  %v2230_v25 = vsel %vm6924_vm8, 0, %v6923_v59  ;;  %v2246_v10 = vsel %vm2161_vm1, %v2245_v56, %v8578_v2 }
 0x14a   : > { %v8636_v8 = vmul.u32.u64.low %v8595_v22, %v2310_v51  ;;  %v8637_v16 = vmul.u32.u64.high %v8595_v22, %v2310_v51, %v8636_v8  ;;  %v2231_v5 = vsub.s32 32, %v2230_v25  ;;  %v2232_v12 = vshll.u32 %v8589_v36, %v2230_v25 }
 0x14b   : > { %v2235_v13 = vsub.s32 4294967266, %v2230_v25  ;;  %vm2151_vm10 = vcmp.eq.s32.totalorder %v8593_v7, 0  ;;  %vm2154_vm9 = vcmp.eq.s32.totalorder %v8593_v7, 2  ;;  %v2318_v62 = vmul.u32 %v8595_v22, %v2302_v15 }
 0x14c   : > { %vm2465_vm11 = vcmp.lt.s32.totalorder %v2464_v3, 2  ;;  %v2233_v30 = vshrl.u32 %v2215_v61, %v2231_v5  ;;  %v2321_v20 = vadd.s32 1, %v8632_v43  ;;  %vm2466_vm12 = vcmp.eq.s32.totalorder %v2464_v3, 0  ;;  %v8674_v61 = vld [vmem:[%s7504_s26 + $0x8] sm:$0xff] }
 0x14d   : > { %v2236_v19 = vadd.s32 127, %v2235_v13  ;;  %v7320_v1 = vpop.eup %7319  ;;  %v2248_v40 = vsel %vm8609_vm3, 0, %v2246_v10  ;;  %vm2320_vm13 = vc.u32 %v8637_v16, %v8631_v32  ;;  %vm2469_vm14 = vcmp.eq.s32.totalorder %v2464_v3, 2 }
 0x14e   : > { %v2690_v2 = vand.u32 2139095040, %v8640_v46  ;;  %v7322_v6 = vpop.eup %7321  ;;  %v2155_v52 = vxor.u32 2147483648, %v7320_v1  ;;  %v2234_v21 = vor.u32 %v2233_v30, %v2232_v12  ;;  %v2322_v50 = vsel %vm2320_vm13, %v2321_v20, %v8632_v43 }
 0x14f   : > { %v2237_v36 = vshll.u32 %v2236_v19, 23  ;;  %v2152_v54 = vxor.u32 2147483648, %v7322_v6  ;;  %v2323_v0 = vadd.s32 %v2322_v50, %v2318_v62  ;;  %v2687_v22 = vand.u32 2147483647, %v8640_v46 }
 0x150   : > { %v2691_v38 = vshrl.u32 %v2690_v2, 23  ;;  %v2156_v28 = vsel %vm2154_vm9, %v2155_v52, %v7322_v6  ;;  %v2241_v9 = vcvt.s32.f32 %v2234_v21  ;;  %v2471_v53 = vsel %vm2469_vm14, %v2155_v52, %v7322_v6 }
 0x151   : > { %v2238_v58 = vor.u32 4788187, %v2237_v36  ;;  %v2153_v45 = vsel %vm2151_vm10, %v7320_v1, %v2152_v54  ;;  %v2324_v23 = vadd.s32 536870912, %v2323_v0  ;;  %v2468_v29 = vsel %vm2466_vm12, %v7320_v1, %v2152_v54 }
 0x152   : > { %v6947_v34 = vadd.s32 4294967169, %v2691_v38  ;;  %v2157_v42 = vsel %vm2150_vm6, %v2153_v45, %v2156_v28  ;;  %v2472_v18 = vsel %vm2465_vm11, %v2468_v29, %v2471_v53  ;;  %v2252_v59 = vadd.s32 3, %v2248_v40 }
 0x153   : > { %v2239_v24 = vand.u32 2147483647, %v2238_v58  ;;  %v2158_v4 = vsel %vm2147_vm7, nan, %v2157_v42  ;;  %v2325_v27 = vshrl.u32 %v2324_v23, 30  ;;  %v2473_v26 = vsel %vm2147_vm7, nan, %v2472_v18 }
 0x154   : > { %v2697_v48 = vadd.s32 1, %v6947_v34  ;;  %6929 = vst [vmem:[%s7504_s26 + $0xa8] sm:$0xff] %v2158_v4  ;;  %6944 = vst [vmem:[%s7504_s26 + $0xc0] sm:$0xff] %v2473_v26  ;;  %v2694_v7 = vand.u32 8388607, %v2687_v22  ;;  %v8677_v15 = vmul.f32 16.0, %v8674_v61  ;;  %v2319_v31 = vadd.s32 %v8631_v32, %v8637_v16 }
 0x155   : > { %v2242_v44 = vmul.f32 %v2241_v9, %v2239_v24  ;;  %v2326_v56 = vshll.u32 %v2325_v27, 30  ;;  %v2349_v57 = vsub.s32 4, %v2325_v27  ;;  %v8683_v51 = vand.u32 3, %v2252_v59 }
 0x156   : > { %vm2698_vm15 = vcmp.gt.s32.totalorder %v2697_v48, 0  ;;  %v8685_v43 = vand.u32 3, %v2248_v40  ;;  %v2695_v25 = vor.u32 8388608, %v2694_v7  ;;  %vm2265_vm0 = vcmp.lt.s32.totalorder %v8478_v14, 0 }
 0x157   : > { %v2243_v3 = vxor.u32 2147483648, %v2242_v44  ;;  %v2699_v63 = vsel %vm2698_vm15, %v2697_v48, 0  ;;  %v8679_v11 = vsub.s32 %v2323_v0, %v2326_v56  ;;  %v2350_v12 = vsel %vm2265_vm0, %v2349_v57, %v2325_v27 }
 0x158   : > { %v2701_v60 = vand.u32 31, %v2699_v63  ;;  %v2794_v10 = vand.u32 2139095040, %v8677_v15  ;;  %vm2258_vm2 = vcmp.eq.s32.totalorder %v8683_v51, 2  ;;  %vm2572_vm4 = vcmp.eq.s32.totalorder %v8685_v43, 2 }
 0x159   : > { %v2244_v55 = vsel %vm2161_vm1, %v2243_v3, %v2242_v44  ;;  %v2329_v5 = vsub.s32 0, %v8679_v11  ;;  %vm8697_vm1 = vcmp.le.f32.partialorder %v2263_v17, 0.7853982  ;;  %v8709_v40 = vshll.u32 %v2695_v25, 8 }
 0x15a   : > { %v2247_v8 = vsel %vm8609_vm3, %v8351_v47, %v2244_v55  ;;  %v2702_v13 = vsub.s32 32, %v2701_v60  ;;  %v2704_v19 = vshll.u32 %v7439_v33, %v2701_v60  ;;  %v2707_v1 = vshll.u32 %v7440_v35, %v2701_v60 }
 0x15b   : > { %7323 = vcosq.f32 %v2247_v8  ;;  %v6926_v30 = vmin.u32 %v2329_v5, %v8679_v11  ;;  %vm2255_vm5 = vcmp.eq.s32.totalorder %v8683_v51, 0  ;;  %v8714_v32 = vsel %vm8697_vm1, 0, %v2350_v12 }
 0x15c   : > { %7325 = vsinq.f32 %v2247_v8  ;;  %v2705_v20 = vshrl.u32 %v7440_v35, %v2702_v13  ;;  %vm2569_vm3 = vcmp.eq.s32.totalorder %v8685_v43, 0  ;;  %v8717_v16 = vshrl.u32 %v2699_v63, 5 }
 0x15d   : > { %v2331_v17 = vclz %v6926_v30  ;;  %v2791_v2 = vand.u32 2147483647, %v8677_v15  ;;  %vm2254_vm6 = vcmp.lt.s32.totalorder %v8683_v51, 2  ;;  %vm2568_vm7 = vcmp.lt.s32.totalorder %v8685_v43, 2 }
 0x15e   : > { %v2708_v6 = vshrl.u32 %v7441_v37, %v2702_v13  ;;  %v2710_v52 = vshll.u32 %v7441_v37, %v2701_v60  ;;  %v2711_v21 = vshrl.u32 %v7442_v39, %v2702_v13  ;;  %v2795_v36 = vshrl.u32 %v2794_v10, 23 }
 0x15f   : > { %vm2251_vm8 = vweird.f32 %v8351_v47  ;;  %v6927_v50 = vadd.s32 4294967294, %v2331_v17  ;;  %v2713_v54 = vshll.u32 %v7442_v39, %v2701_v60  ;;  %v2714_v0 = vshrl.u32 %v7443_v41, %v2702_v13 }
 0x160   : > { %v2716_v38 = vshll.u32 %v7443_v41, %v2701_v60  ;;  %v2703_v28 = vshrl.u32 %v7439_v33, %v2702_v13  ;;  %v2706_v58 = vor.u32 %v2705_v20, %v2704_v19  ;;  %v2709_v9 = vor.u32 %v2708_v6, %v2707_v1 }
 0x161   : > { %v2717_v53 = vshrl.u32 %v7444_v49, %v2702_v13  ;;  %vm6928_vm10 = vcmp.lt.s32.totalorder %v6927_v50, 0  ;;  %v2712_v45 = vor.u32 %v2711_v21, %v2710_v52  ;;  %v2715_v23 = vor.u32 %v2714_v0, %v2713_v54 }
 0x162   : > { %vm2719_vm9 = vcmp.lt.s32.totalorder %v8717_v16, 1  ;;  %v2334_v29 = vsel %vm6928_vm10, 0, %v6927_v50  ;;  %vm2721_vm11 = vcmp.lt.s32.totalorder %v8717_v16, 3  ;;  %vm2722_vm12 = vcmp.lt.s32.totalorder %v8717_v16, 4 }
 0x163   : > { %v2718_v34 = vor.u32 %v2717_v53, %v2716_v38  ;;  %v2335_v42 = vsub.s32 32, %v2334_v29  ;;  %v2336_v24 = vshll.u32 %v8679_v11, %v2334_v29  ;;  %v2339_v18 = vsub.s32 4294967266, %v2334_v29 }
 0x164   : > { %v2724_v4 = vsel %vm2722_vm12, %v2712_v45, 2102212464  ;;  %vm2720_vm13 = vcmp.lt.s32.totalorder %v8717_v16, 2  ;;  %v2723_v26 = vsel %vm2719_vm9, %v2703_v28, %v2706_v58  ;;  %v2728_v44 = vsel %vm2722_vm12, %v2715_v23, 920167782 }
 0x165   : > { %v7324_v27 = vpop.eup %7323  ;;  %v2725_v48 = vsel %vm2721_vm11, %v2709_v9, %v2724_v4  ;;  %v2337_v56 = vshrl.u32 %v2319_v31, %v2335_v42  ;;  %v2340_v3 = vadd.s32 127, %v2339_v18  ;;  %v2727_v57 = vsel %vm2719_vm9, %v2706_v58, %v2709_v9  ;;  %v8795_v42 = vld [vmem:[%s7504_s26 + $0x10] sm:$0xff] }
 0x166   : > { %v7326_v59 = vpop.eup %7325  ;;  %v2259_v7 = vxor.u32 2147483648, %v7324_v27  ;;  %v2729_v11 = vsel %vm2721_vm11, %v2712_v45, %v2728_v44  ;;  %v2731_v60 = vsel %vm2719_vm9, %v2709_v9, %v2712_v45  ;;  %v2732_v55 = vsel %vm2722_vm12, %v2718_v34, 1326507024 }
 0x167   : > { %v2256_v63 = vxor.u32 2147483648, %v7326_v59  ;;  %v2338_v8 = vor.u32 %v2337_v56, %v2336_v24  ;;  %v2341_v5 = vshll.u32 %v2340_v3, 23  ;;  %v2730_v31 = vsel %vm2720_vm13, %v2727_v57, %v2729_v11 }
 0x168   : > { %v2260_v25 = vsel %vm2258_vm2, %v2259_v7, %v7326_v59  ;;  %v2574_v12 = vsel %vm2572_vm4, %v2259_v7, %v7326_v59  ;;  %v2733_v30 = vsel %vm2721_vm11, %v2715_v23, %v2732_v55  ;;  %v6951_v50 = vadd.s32 4294967169, %v2795_v36 }
 0x169   : > { %v2257_v13 = vsel %vm2255_vm5, %v7324_v27, %v2256_v63  ;;  %v2571_v10 = vsel %vm2569_vm3, %v7324_v27, %v2256_v63  ;;  %v2342_v20 = vor.u32 4788187, %v2341_v5  ;;  %v2345_v1 = vcvt.s32.f32 %v2338_v8 }
 0x16a   : > { %v2261_v19 = vsel %vm2254_vm6, %v2257_v13, %v2260_v25  ;;  %v2575_v17 = vsel %vm2568_vm7, %v2571_v10, %v2574_v12  ;;  %v2734_v21 = vsel %vm2720_vm13, %v2731_v60, %v2733_v30  ;;  %v2798_v43 = vand.u32 8388607, %v2791_v2 }
 0x16b   : > { %v2262_v6 = vsel %vm2251_vm8, nan, %v2261_v19  ;;  %v2576_v52 = vsel %vm2251_vm8, nan, %v2575_v17  ;;  %v2343_v54 = vand.u32 2147483647, %v2342_v20  ;;  %v2726_v38 = vsel %vm2720_vm13, %v2723_v26, %v2725_v48 }
 0x16c   : > { %6930 = vst [vmem:[%s7504_s26 + $0xb0] sm:$0xff] %v2262_v6  ;;  %6945 = vst [vmem:[%s7504_s26 + $0xc8] sm:$0xff] %v2576_v52  ;;  %v8777_v51 = vmul.u32.u64.low %v8709_v40, %v2734_v21  ;;  %v8778_v0 = vmul.u32.u64.high %v8709_v40, %v2734_v21, %v8777_v51  ;;  %v8785_v47 = vmul.u32.u64.low %v8709_v40, %v2730_v31  ;;  %v8786_v28 = vmul.u32.u64.high %v8709_v40, %v2730_v31, %v8785_v47 }
 0x16d   : > { %v2801_v36 = vadd.s32 1, %v6951_v50  ;;  %v2346_v58 = vmul.f32 %v2345_v1, %v2343_v54  ;;  %v2356_v9 = vadd.s32 3, %v8714_v32  ;;  %v2742_v45 = vmul.u32 %v8709_v40, %v2726_v38 }
 0x16e   : > { %vm2744_vm15 = vc.u32 %v8778_v0, %v8785_v47  ;;  %v2745_v16 = vadd.s32 1, %v8786_v28  ;;  %v2799_v29 = vor.u32 8388608, %v2798_v43  ;;  %v8798_v24 = vmul.f32 16.0, %v8795_v42 }
 0x16f   : > { %vm2802_vm14 = vcmp.gt.s32.totalorder %v2801_v36, 0  ;;  %v2347_v53 = vxor.u32 2147483648, %v2346_v58  ;;  %v8802_v4 = vand.u32 3, %v2356_v9  ;;  %v8805_v40 = vand.u32 3, %v8714_v32 }
 0x170   : > { %v2803_v23 = vsel %vm2802_vm14, %v2801_v36, 0  ;;  %v2746_v48 = vsel %vm2744_vm15, %v2745_v16, %v8786_v28  ;;  %v2898_v63 = vand.u32 2139095040, %v8798_v24  ;;  %vm2355_vm4 = vweird.f32 %v8478_v14 }
 0x171   : > { %v2805_v34 = vand.u32 31, %v2803_v23  ;;  %v2348_v18 = vsel %vm2265_vm0, %v2347_v53, %v2346_v58  ;;  %v2804_v27 = vshrl.u32 %v2803_v23, 5  ;;  %v2747_v7 = vadd.s32 %v2746_v48, %v2742_v45 }
 0x172   : > { %v2351_v26 = vsel %vm8697_vm1, %v8478_v14, %v2348_v18  ;;  %vm2672_vm0 = vcmp.eq.s32.totalorder %v8805_v40, 0  ;;  %vm2671_vm1 = vcmp.lt.s32.totalorder %v8805_v40, 2  ;;  %vm2675_vm6 = vcmp.eq.s32.totalorder %v8805_v40, 2 }
 0x173   : > { %v2806_v44 = vsub.s32 32, %v2805_v34  ;;  %v2808_v59 = vshll.u32 %v7439_v33, %v2805_v34  ;;  %7327 = vcosq.f32 %v2351_v26  ;;  %v2811_v56 = vshll.u32 %v7440_v35, %v2805_v34 }
 0x174   : > { %v2814_v3 = vshll.u32 %v7441_v37, %v2805_v34  ;;  %7329 = vsinq.f32 %v2351_v26  ;;  %v2748_v62 = vadd.s32 536870912, %v2747_v7  ;;  %v2817_v60 = vshll.u32 %v7442_v39, %v2805_v34 }
 0x175   : > { %v2809_v32 = vshrl.u32 %v7440_v35, %v2806_v44  ;;  %v2812_v57 = vshrl.u32 %v7441_v37, %v2806_v44  ;;  %v2815_v11 = vshrl.u32 %v7442_v39, %v2806_v44  ;;  %v2818_v55 = vshrl.u32 %v7443_v41, %v2806_v44 }
 0x176   : > { %v2820_v5 = vshll.u32 %v7443_v41, %v2805_v34  ;;  %v2821_v12 = vshrl.u32 %v7444_v49, %v2806_v44  ;;  %v8824_v13 = vshrl.u32 %v2748_v62, 30  ;;  %vm2823_vm2 = vcmp.lt.s32.totalorder %v2804_v27, 1 }
 0x177   : > { %v2810_v25 = vor.u32 %v2809_v32, %v2808_v59  ;;  %v2813_v8 = vor.u32 %v2812_v57, %v2811_v56  ;;  %v2816_v10 = vor.u32 %v2815_v11, %v2814_v3  ;;  %v2819_v31 = vor.u32 %v2818_v55, %v2817_v60 }
 0x178   : > { %v2807_v30 = vshrl.u32 %v7439_v33, %v2806_v44  ;;  %v2822_v19 = vor.u32 %v2821_v12, %v2820_v5  ;;  %vm2825_vm5 = vcmp.lt.s32.totalorder %v2804_v27, 3  ;;  %vm2826_vm3 = vcmp.lt.s32.totalorder %v2804_v27, 4 }
 0x179   : > { %v2750_v20 = vshll.u32 %v8824_v13, 30  ;;  %vm2824_vm7 = vcmp.lt.s32.totalorder %v2804_v27, 2  ;;  %v2828_v1 = vsel %vm2826_vm3, %v2816_v10, 2102212464  ;;  %vm2358_vm8 = vcmp.lt.s32.totalorder %v8802_v4, 2 }
 0x17a   : > { %v2831_v17 = vsel %vm2823_vm2, %v2810_v25, %v2813_v8  ;;  %v2832_v6 = vsel %vm2826_vm3, %v2819_v31, 920167782  ;;  %v2839_v52 = vshll.u32 %v2799_v29, 8  ;;  %v2835_v54 = vsel %vm2823_vm2, %v2813_v8, %v2816_v10 }
 0x17b   : > { %v8834_v21 = vsub.s32 %v2747_v7, %v2750_v20  ;;  %v2833_v50 = vsel %vm2825_vm5, %v2816_v10, %v2832_v6  ;;  %v2899_v51 = vshrl.u32 %v2898_v63, 23  ;;  %v2827_v43 = vsel %vm2823_vm2, %v2807_v30, %v2810_v25 }
 0x17c   : > { %v2829_v38 = vsel %vm2825_vm5, %v2813_v8, %v2828_v1  ;;  %v2834_v28 = vsel %vm2824_vm7, %v2831_v17, %v2833_v50  ;;  %v2836_v36 = vsel %vm2826_vm3, %v2822_v19, 1326507024  ;;  %vm2359_vm10 = vcmp.eq.s32.totalorder %v8802_v4, 0 }
 0x17d   : > { %v7328_v58 = vpop.eup %7327  ;;  %vm2362_vm9 = vcmp.eq.s32.totalorder %v8802_v4, 2  ;;  %v2753_v9 = vsub.s32 0, %v8834_v21  ;;  %v2837_v53 = vsel %vm2825_vm5, %v2819_v31, %v2836_v36  ;;  %v2830_v48 = vsel %vm2824_vm7, %v2827_v43, %v2829_v38 }
 0x17e   : > { %v7330_v45 = vpop.eup %7329  ;;  %v2363_v23 = vxor.u32 2147483648, %v7328_v58  ;;  %v2838_v16 = vsel %vm2824_vm7, %v2835_v54, %v2837_v53  ;;  %v8847_v29 = vmul.u32.u64.low %v2839_v52, %v2834_v28  ;;  %v8848_v34 = vmul.u32.u64.high %v2839_v52, %v2834_v28, %v8847_v29 }
 0x17f   : > { %v2360_v18 = vxor.u32 2147483648, %v7330_v45  ;;  %v6948_v26 = vmin.u32 %v2753_v9, %v8834_v21  ;;  %v6955_v44 = vadd.s32 4294967169, %v2899_v51  ;;  %v2846_v11 = vmul.u32 %v2839_v52, %v2830_v48  ;;  %v8907_v48 = vld [vmem:[%s7504_s26] sm:$0xff] }
 0x180   : > { %v2364_v59 = vsel %vm2362_vm9, %v2363_v23, %v7330_v45  ;;  %v2677_v7 = vsel %vm2675_vm6, %v2363_v23, %v7330_v45  ;;  %v8855_v56 = vmul.u32.u64.low %v2839_v52, %v2838_v16  ;;  %v8856_v3 = vmul.u32.u64.high %v2839_v52, %v2838_v16, %v8855_v56 }
 0x181   : > { %v2361_v32 = vsel %vm2359_vm10, %v7328_v58, %v2360_v18  ;;  %v2674_v57 = vsel %vm2672_vm0, %v7328_v58, %v2360_v18  ;;  %v2755_v63 = vclz %v6948_v26  ;;  %v2849_v8 = vadd.s32 1, %v8848_v34 }
 0x182   : > { %v2365_v27 = vsel %vm2358_vm8, %v2361_v32, %v2364_v59  ;;  %v2678_v62 = vsel %vm2671_vm1, %v2674_v57, %v2677_v7  ;;  %vm2848_vm11 = vc.u32 %v8856_v3, %v8847_v29  ;;  %v2905_v4 = vadd.s32 1, %v6955_v44 }
 0x183   : > { %v2366_v60 = vsel %vm2355_vm4, nan, %v2365_v27  ;;  %v2679_v55 = vsel %vm2355_vm4, nan, %v2678_v62  ;;  %v6949_v25 = vadd.s32 4294967294, %v2755_v63  ;;  %v2743_v40 = vadd.s32 %v8785_v47, %v8778_v0 }
 0x184   : > { %6931 = vst [vmem:[%s7504_s26 + $0xb8] sm:$0xff] %v2366_v60  ;;  %6946 = vst [vmem:[%s7504_s26 + $0xd0] sm:$0xff] %v2679_v55  ;;  %v2850_v5 = vsel %vm2848_vm11, %v2849_v8, %v8848_v34  ;;  %v2895_v12 = vand.u32 2147483647, %v8798_v24  ;;  %v2773_v14 = vsub.s32 4, %v8824_v13  ;;  %vm2906_vm13 = vcmp.gt.s32.totalorder %v2905_v4, 0 }
 0x185   : > { %vm6950_vm12 = vcmp.lt.s32.totalorder %v6949_v25, 0  ;;  %v2851_v31 = vadd.s32 %v2850_v5, %v2846_v11  ;;  %v2907_v1 = vsel %vm2906_vm13, %v2905_v4, 0  ;;  %vm8883_vm14 = vcmp.le.f32.partialorder %v2687_v22, 0.7853982 }
 0x186   : > { %v2758_v10 = vsel %vm6950_vm12, 0, %v6949_v25  ;;  %v2909_v6 = vand.u32 31, %v2907_v1  ;;  %vm2689_vm15 = vcmp.lt.s32.totalorder %v8640_v46, 0  ;;  %v2908_v18 = vshrl.u32 %v2907_v1, 5 }
 0x187   : > { %v2759_v30 = vsub.s32 32, %v2758_v10  ;;  %v2760_v19 = vshll.u32 %v8834_v21, %v2758_v10  ;;  %v2763_v20 = vsub.s32 4294967266, %v2758_v10  ;;  %v2852_v17 = vadd.s32 536870912, %v2851_v31 }
 0x188   : > { %v2774_v50 = vsel %vm2689_vm15, %v2773_v14, %v8824_v13  ;;  %v2902_v21 = vand.u32 8388607, %v2895_v12  ;;  %v2910_v51 = vsub.s32 32, %v2909_v6  ;;  %v2912_v38 = vshll.u32 %v7439_v33, %v2909_v6 }
 0x189   : > { %v2761_v47 = vshrl.u32 %v2743_v40, %v2759_v30  ;;  %v2764_v52 = vadd.s32 127, %v2763_v20  ;;  %v8891_v54 = vshrl.u32 %v2852_v17, 30  ;;  %v2915_v28 = vshll.u32 %v7440_v35, %v2909_v6 }
 0x18a   : > { %v2913_v58 = vshrl.u32 %v7440_v35, %v2910_v51  ;;  %v2918_v9 = vshll.u32 %v7441_v37, %v2909_v6  ;;  %v2921_v13 = vshll.u32 %v7442_v39, %v2909_v6  ;;  %v2916_v23 = vshrl.u32 %v7441_v37, %v2910_v51 }
 0x18b   : > { %v2762_v43 = vor.u32 %v2761_v47, %v2760_v19  ;;  %v2765_v22 = vshll.u32 %v2764_v52, 23  ;;  %v2854_v36 = vshll.u32 %v8891_v54, 30  ;;  %v2919_v16 = vshrl.u32 %v7442_v39, %v2910_v51 }
 0x18c   : > { %v2922_v26 = vshrl.u32 %v7443_v41, %v2910_v51  ;;  %v8910_v44 = vmul.f32 32.0, %v8907_v48  ;;  %v2776_v7 = vsel %vm8883_vm14, 0, %v2774_v50  ;;  %v2903_v56 = vor.u32 8388608, %v2902_v21 }
 0x18d   : > { %v2766_v53 = vor.u32 4788187, %v2765_v22  ;;  %v2769_v45 = vcvt.s32.f32 %v2762_v43  ;;  %v8903_v34 = vsub.s32 %v2851_v31, %v2854_v36  ;;  %v2911_v32 = vshrl.u32 %v7439_v33, %v2910_v51 }
 0x18e   : > { %v2914_v63 = vor.u32 %v2913_v58, %v2912_v38  ;;  %v2917_v27 = vor.u32 %v2916_v23, %v2915_v28  ;;  %v2924_v62 = vshll.u32 %v7443_v41, %v2909_v6  ;;  %v2920_v60 = vor.u32 %v2919_v16, %v2918_v9 }
 0x18f   : > { %v2767_v59 = vand.u32 2147483647, %v2766_v53  ;;  %v2857_v57 = vsub.s32 0, %v8903_v34  ;;  %v2923_v55 = vor.u32 %v2922_v26, %v2921_v13  ;;  %v2925_v25 = vshrl.u32 %v7444_v49, %v2910_v51 }
 0x190   : > { %v2780_v8 = vadd.s32 3, %v2776_v7  ;;  %vm2927_vm0 = vcmp.lt.s32.totalorder %v2908_v18, 1  ;;  %vm2930_vm1 = vcmp.lt.s32.totalorder %v2908_v18, 4  ;;  %vm2929_vm2 = vcmp.lt.s32.totalorder %v2908_v18, 3 }
 0x191   : > { %v2770_v11 = vmul.f32 %v2769_v45, %v2767_v59  ;;  %v6952_v4 = vmin.u32 %v2857_v57, %v8903_v34  ;;  %v2926_v5 = vor.u32 %v2925_v25, %v2924_v62  ;;  %v2932_v10 = vsel %vm2930_vm1, %v2920_v60, 2102212464 }
 0x192   : > { %vm2793_vm4 = vcmp.lt.s32.totalorder %v8677_v15, 0  ;;  %v2847_v14 = vadd.s32 %v8847_v29, %v8856_v3  ;;  %vm2928_vm5 = vcmp.lt.s32.totalorder %v2908_v18, 2  ;;  %v2943_v30 = vshll.u32 %v2903_v56, 8 }
 0x193   : > { %v2771_v40 = vxor.u32 2147483648, %v2770_v11  ;;  %v2859_v31 = vclz %v6952_v4  ;;  %v2931_v20 = vsel %vm2927_vm0, %v2911_v32, %v2914_v63  ;;  %v2935_v1 = vsel %vm2927_vm0, %v2914_v63, %v2917_v27 }
 0x194   : > { %v2936_v17 = vsel %vm2930_vm1, %v2923_v55, 920167782  ;;  %v2933_v52 = vsel %vm2929_vm2, %v2917_v27, %v2932_v10  ;;  %v2939_v50 = vsel %vm2927_vm0, %v2917_v27, %v2920_v60  ;;  %v2940_v21 = vsel %vm2930_vm1, %v2926_v5, 1326507024 }
 0x195   : > { %v2772_v19 = vsel %vm2689_vm15, %v2771_v40, %v2770_v11  ;;  %v6953_v47 = vadd.s32 4294967294, %v2859_v31  ;;  %v2937_v29 = vsel %vm2929_vm2, %v2920_v60, %v2936_v17  ;;  %v2877_v51 = vsub.s32 4, %v8891_v54 }
 0x196   : > { %v2775_v6 = vsel %vm8883_vm14, %v8640_v46, %v2772_v19  ;;  %v2938_v3 = vsel %vm2928_vm5, %v2935_v1, %v2937_v29  ;;  %v2941_v43 = vsel %vm2929_vm2, %v2923_v55, %v2940_v21  ;;  %v2934_v13 = vsel %vm2928_vm5, %v2931_v20, %v2933_v52 }
 0x197   : > { %7331 = vcosq.f32 %v2775_v6  ;;  %vm6954_vm3 = vcmp.lt.s32.totalorder %v6953_v47, 0  ;;  %v2942_v22 = vsel %vm2928_vm5, %v2939_v50, %v2941_v43  ;;  %v2781_v53 = vand.u32 3, %v2780_v8 }
 0x198   : > { %7333 = vsinq.f32 %v2775_v6  ;;  %v2862_v0 = vsel %vm6954_vm3, 0, %v6953_v47  ;;  %v8939_v38 = vmul.u32.u64.low %v2943_v30, %v2938_v3  ;;  %v8940_v28 = vmul.u32.u64.high %v2943_v30, %v2938_v3, %v8939_v38 }
 0x199   : > { %v2863_v36 = vsub.s32 32, %v2862_v0  ;;  %v2864_v58 = vshll.u32 %v8903_v34, %v2862_v0  ;;  %v2867_v9 = vsub.s32 4294967266, %v2862_v0  ;;  %v3322_v16 = vand.u32 2139095040, %v8910_v44 }
 0x19a   : > { %v8945_v45 = vmul.u32.u64.low %v2943_v30, %v2942_v22  ;;  %v8946_v23 = vmul.u32.u64.high %v2943_v30, %v2942_v22, %v8945_v45  ;;  %vm2779_vm6 = vweird.f32 %v8640_v46  ;;  %vm8952_vm7 = vcmp.le.f32.partialorder %v2791_v2, 0.7853982 }
 0x19b   : > { %v2865_v59 = vshrl.u32 %v2847_v14, %v2863_v36  ;;  %v2868_v56 = vadd.s32 127, %v2867_v9  ;;  %v3096_v34 = vand.u32 3, %v2776_v7  ;;  %v2878_v18 = vsel %vm2793_vm4, %v2877_v51, %v8891_v54 }
 0x19c   : > { %v2950_v32 = vmul.u32 %v2943_v30, %v2934_v13  ;;  %v2953_v57 = vadd.s32 1, %v8940_v28  ;;  %v3323_v63 = vshrl.u32 %v3322_v16, 23  ;;  %v3319_v11 = vand.u32 2147483647, %v8910_v44 }
 0x19d   : > { %v2866_v27 = vor.u32 %v2865_v59, %v2864_v58  ;;  %v2869_v62 = vshll.u32 %v2868_v56, 23  ;;  %v8962_v2 = vmul.f32 32.0, %v8674_v61  ;;  %vm2782_vm8 = vcmp.lt.s32.totalorder %v2781_v53, 2 }
 0x19e   : > { %vm2783_vm10 = vcmp.eq.s32.totalorder %v2781_v53, 0  ;;  %vm2952_vm9 = vc.u32 %v8946_v23, %v8939_v38  ;;  %v6977_v7 = vadd.s32 4294967169, %v3323_v63  ;;  %v2880_v54 = vsel %vm8952_vm7, 0, %v2878_v18 }
 0x19f   : > { %v2870_v60 = vor.u32 4788187, %v2869_v62  ;;  %v2873_v55 = vcvt.s32.f32 %v2866_v27  ;;  %v2954_v25 = vsel %vm2952_vm9, %v2953_v57, %v8940_v28  ;;  %vm2786_vm11 = vcmp.eq.s32.totalorder %v2781_v53, 2 }
 0x1a0   : > { %v2955_v4 = vadd.s32 %v2954_v25, %v2950_v32  ;;  %vm3101_vm12 = vcmp.eq.s32.totalorder %v3096_v34, 2  ;;  %v3329_v40 = vadd.s32 1, %v6977_v7  ;;  %vm3097_vm13 = vcmp.lt.s32.totalorder %v3096_v34, 2 }
 0x1a1   : > { %v7332_v8 = vpop.eup %7331  ;;  %v2871_v10 = vand.u32 2147483647, %v2870_v60  ;;  %vm3098_vm14 = vcmp.eq.s32.totalorder %v3096_v34, 0  ;;  %v2884_v31 = vadd.s32 3, %v2880_v54  ;;  %v3326_v29 = vand.u32 8388607, %v3319_v11 }
 0x1a2   : > { %v7334_v61 = vpop.eup %7333  ;;  %v2787_v5 = vxor.u32 2147483648, %v7332_v8  ;;  %v2956_v30 = vadd.s32 536870912, %v2955_v4  ;;  %vm3330_vm15 = vcmp.gt.s32.totalorder %v3329_v40, 0  ;;  %v8984_v58 = vand.u32 3, %v2880_v54 }
 0x1a3   : > { %v2784_v14 = vxor.u32 2147483648, %v7334_v61  ;;  %v2874_v20 = vmul.f32 %v2873_v55, %v2871_v10  ;;  %v3331_v17 = vsel %vm3330_vm15, %v3329_v40, 0  ;;  %v8981_v36 = vand.u32 3, %v2884_v31 }
 0x1a4   : > { %v2788_v19 = vsel %vm2786_vm11, %v2787_v5, %v7334_v61  ;;  %v3103_v1 = vsel %vm3101_vm12, %v2787_v5, %v7334_v61  ;;  %v2957_v47 = vshrl.u32 %v2956_v30, 30  ;;  %v3333_v51 = vand.u32 31, %v3331_v17 }
 0x1a5   : > { %v2785_v6 = vsel %vm2783_vm10, %v7332_v8, %v2784_v14  ;;  %v3100_v52 = vsel %vm3098_vm14, %v7332_v8, %v2784_v14  ;;  %v2875_v50 = vxor.u32 2147483648, %v2874_v20  ;;  %vm2897_vm0 = vcmp.lt.s32.totalorder %v8798_v24, 0 }
 0x1a6   : > { %v2789_v3 = vsel %vm2782_vm8, %v2785_v6, %v2788_v19  ;;  %v3104_v21 = vsel %vm3097_vm13, %v3100_v52, %v3103_v1  ;;  %v2958_v0 = vshll.u32 %v2957_v47, 30  ;;  %v3334_v9 = vsub.s32 32, %v3333_v51 }
 0x1a7   : > { %v2790_v43 = vsel %vm2779_vm6, nan, %v2789_v3  ;;  %v3105_v22 = vsel %vm2779_vm6, nan, %v3104_v21  ;;  %v2876_v28 = vsel %vm2793_vm4, %v2875_v50, %v2874_v20  ;;  %v3327_v46 = vor.u32 8388608, %v3326_v29 }
 0x1a8   : > { %6959 = vst [vmem:[%s7504_s26 + $0xd8] sm:$0xff] %v2790_v43  ;;  %6974 = vst [vmem:[%s7504_s26 + $0xf0] sm:$0xff] %v3105_v22  ;;  %v2879_v13 = vsel %vm8952_vm7, %v8677_v15, %v2876_v28  ;;  %v8990_v53 = vsub.s32 %v2955_v4, %v2958_v0  ;;  %v3336_v45 = vshll.u32 %v7439_v33, %v3333_v51  ;;  %v3426_v59 = vand.u32 2139095040, %v8962_v2 }
 0x1a9   : > { %7335 = vcosq.f32 %v2879_v13  ;;  %v3339_v16 = vshll.u32 %v7440_v35, %v3333_v51  ;;  %v3337_v34 = vshrl.u32 %v7440_v35, %v3334_v9  ;;  %v3342_v26 = vshll.u32 %v7441_v37, %v3333_v51 }
 0x1aa   : > { %7337 = vsinq.f32 %v2879_v13  ;;  %v2961_v56 = vsub.s32 0, %v8990_v53  ;;  %vm2890_vm1 = vcmp.eq.s32.totalorder %v8981_v36, 2  ;;  %vm3204_vm2 = vcmp.eq.s32.totalorder %v8984_v58, 2 }
 0x1ab   : > { %v3332_v18 = vshrl.u32 %v3331_v17, 5  ;;  %v3340_v32 = vshrl.u32 %v7441_v37, %v3334_v9  ;;  %v3343_v57 = vshrl.u32 %v7442_v39, %v3334_v9  ;;  %v3345_v63 = vshll.u32 %v7442_v39, %v3333_v51 }
 0x1ac   : > { %vm2887_vm4 = vcmp.eq.s32.totalorder %v8981_v36, 0  ;;  %v2951_v27 = vadd.s32 %v8939_v38, %v8946_v23  ;;  %v6956_v62 = vmin.u32 %v2961_v56, %v8990_v53  ;;  %v2981_v7 = vsub.s32 4, %v2957_v47 }
 0x1ad   : > { %vm3201_vm5 = vcmp.eq.s32.totalorder %v8984_v58, 0  ;;  %v3423_v60 = vand.u32 2147483647, %v8962_v2  ;;  %vm2886_vm3 = vcmp.lt.s32.totalorder %v8981_v36, 2  ;;  %vm3200_vm6 = vcmp.lt.s32.totalorder %v8984_v58, 2 }
 0x1ae   : > { %v3335_v55 = vshrl.u32 %v7439_v33, %v3334_v9  ;;  %v3346_v54 = vshrl.u32 %v7443_v41, %v3334_v9  ;;  %v9013_v25 = vshll.u32 %v3327_v46, 8  ;;  %v3427_v8 = vshrl.u32 %v3426_v59, 23 }
 0x1af   : > { %vm2883_vm7 = vweird.f32 %v8677_v15  ;;  %v2963_v38 = vclz %v6956_v62  ;;  %v3338_v23 = vor.u32 %v3337_v34, %v3336_v45  ;;  %v3341_v4 = vor.u32 %v3340_v32, %v3339_v16 }
 0x1b0   : > { %v3344_v40 = vor.u32 %v3343_v57, %v3342_v26  ;;  %v3347_v61 = vor.u32 %v3346_v54, %v3345_v63  ;;  %v3348_v5 = vshll.u32 %v7443_v41, %v3333_v51  ;;  %v3349_v10 = vshrl.u32 %v7444_v49, %v3334_v9 }
 0x1b1   : > { %vm3351_vm8 = vcmp.lt.s32.totalorder %v3332_v18, 1  ;;  %v6957_v14 = vadd.s32 4294967294, %v2963_v38  ;;  %v2982_v31 = vsel %vm2897_vm0, %v2981_v7, %v2957_v47  ;;  %vm3353_vm10 = vcmp.lt.s32.totalorder %v3332_v18, 3 }
 0x1b2   : > { %vm3354_vm9 = vcmp.lt.s32.totalorder %v3332_v18, 4  ;;  %v3350_v30 = vor.u32 %v3349_v10, %v3348_v5  ;;  %vm3352_vm11 = vcmp.lt.s32.totalorder %v3332_v18, 2  ;;  %v3355_v19 = vsel %vm3351_vm8, %v3335_v55, %v3338_v23 }
 0x1b3   : > { %v3356_v20 = vsel %vm3354_vm9, %v3344_v40, 2102212464  ;;  %vm6958_vm12 = vcmp.lt.s32.totalorder %v6957_v14, 0  ;;  %v3359_v17 = vsel %vm3351_vm8, %v3338_v23, %v3341_v4  ;;  %v3360_v6 = vsel %vm3354_vm9, %v3347_v61, 920167782  ;;  %v7336_v52 = vpop.eup %7335 }
 0x1b4   : > { %v3357_v1 = vsel %vm3353_vm10, %v3341_v4, %v3356_v20  ;;  %v2966_v29 = vsel %vm6958_vm12, 0, %v6957_v14  ;;  %v3361_v3 = vsel %vm3353_vm10, %v3344_v40, %v3360_v6  ;;  %v3363_v50 = vsel %vm3351_vm8, %v3341_v4, %v3344_v40  ;;  %v7338_v21 = vpop.eup %7337 }
 0x1b5   : > { %v3364_v47 = vsel %vm3354_vm9, %v3350_v30, 1326507024  ;;  %v2891_v51 = vxor.u32 2147483648, %v7336_v52  ;;  %v2967_v43 = vsub.s32 32, %v2966_v29  ;;  %v2968_v0 = vshll.u32 %v8990_v53, %v2966_v29 }
 0x1b6   : > { %v2971_v22 = vsub.s32 4294967266, %v2966_v29  ;;  %v2888_v28 = vxor.u32 2147483648, %v7338_v21  ;;  %v3358_v9 = vsel %vm3352_vm11, %v3355_v19, %v3357_v1  ;;  %v3362_v13 = vsel %vm3352_vm11, %v3359_v17, %v3361_v3 }
 0x1b7   : > { %v3365_v46 = vsel %vm3353_vm10, %v3347_v61, %v3364_v47  ;;  %v2892_v45 = vsel %vm2890_vm1, %v2891_v51, %v7338_v21  ;;  %v2969_v16 = vshrl.u32 %v2951_v27, %v2967_v43  ;;  %v3206_v56 = vsel %vm3204_vm2, %v2891_v51, %v7338_v21 }
 0x1b8   : > { %v2972_v59 = vadd.s32 127, %v2971_v22  ;;  %v2889_v53 = vsel %vm2887_vm4, %v7336_v52, %v2888_v28  ;;  %v3203_v34 = vsel %vm3201_vm5, %v7336_v52, %v2888_v28  ;;  %v3366_v26 = vsel %vm3352_vm11, %v3363_v50, %v3365_v46 }
 0x1b9   : > { %v6981_v32 = vadd.s32 4294967169, %v3427_v8  ;;  %v2893_v57 = vsel %vm2886_vm3, %v2889_v53, %v2892_v45  ;;  %v2970_v63 = vor.u32 %v2969_v16, %v2968_v0  ;;  %v3207_v27 = vsel %vm3200_vm6, %v3203_v34, %v3206_v56 }
 0x1ba   : > { %v2973_v62 = vshll.u32 %v2972_v59, 23  ;;  %v2894_v7 = vsel %vm2883_vm7, nan, %v2893_v57  ;;  %v3208_v55 = vsel %vm2883_vm7, nan, %v3207_v27  ;;  %vm9059_vm13 = vcmp.le.f32.partialorder %v2895_v12, 0.7853982 }
 0x1bb   : > { %v9047_v54 = vmul.u32.u64.low %v9013_v25, %v3366_v26  ;;  %v9048_v38 = vmul.u32.u64.high %v9013_v25, %v3366_v26, %v9047_v54  ;;  %6960 = vst [vmem:[%s7504_s26 + $0xe0] sm:$0xff] %v2894_v7  ;;  %v2977_v8 = vcvt.s32.f32 %v2970_v63  ;;  %6975 = vst [vmem:[%s7504_s26 + $0xf8] sm:$0xff] %v3208_v55  ;;  %v3433_v15 = vadd.s32 1, %v6981_v32 }
 0x1bc   : > { %v2974_v18 = vor.u32 4788187, %v2973_v62  ;;  %v9053_v36 = vmul.u32.u64.low %v9013_v25, %v3362_v13  ;;  %v9054_v23 = vmul.u32.u64.high %v9013_v25, %v3362_v13, %v9053_v36  ;;  %v2984_v40 = vsel %vm9059_vm13, 0, %v2982_v31 }
 0x1bd   : > { %v3430_v61 = vand.u32 8388607, %v3423_v60  ;;  %v3374_v5 = vmul.u32 %v9013_v25, %v3358_v9  ;;  %vm3434_vm15 = vcmp.gt.s32.totalorder %v3433_v15, 0  ;;  %v2988_v30 = vadd.s32 3, %v2984_v40 }
 0x1be   : > { %v2975_v4 = vand.u32 2147483647, %v2974_v18  ;;  %vm3376_vm14 = vc.u32 %v9048_v38, %v9053_v36  ;;  %v3377_v12 = vadd.s32 1, %v9054_v23  ;;  %v3435_v14 = vsel %vm3434_vm15, %v3433_v15, 0 }
 0x1bf   : > { %v9071_v19 = vand.u32 3, %v2984_v40  ;;  %v3437_v20 = vand.u32 31, %v3435_v14  ;;  %v3431_v17 = vor.u32 8388608, %v3430_v61  ;;  %v9075_v6 = vmul.f32 32.0, %v8795_v42 }
 0x1c0   : > { %v2978_v10 = vmul.f32 %v2977_v8, %v2975_v4  ;;  %v3378_v31 = vsel %vm3376_vm14, %v3377_v12, %v9054_v23  ;;  %v9077_v52 = vshrl.u32 %v3435_v14, 5  ;;  %v2989_v34 = vand.u32 3, %v2988_v30 }
 0x1c1   : > { %v3379_v25 = vadd.s32 %v3378_v31, %v3374_v5  ;;  %v3438_v29 = vsub.s32 32, %v3437_v20  ;;  %v3440_v3 = vshll.u32 %v7439_v33, %v3437_v20  ;;  %v3443_v47 = vshll.u32 %v7440_v35, %v3437_v20 }
 0x1c2   : > { %v2979_v1 = vxor.u32 2147483648, %v2978_v10  ;;  %v3446_v21 = vshll.u32 %v7441_v37, %v3437_v20  ;;  %v3449_v51 = vshll.u32 %v7442_v39, %v3437_v20  ;;  %v3452_v22 = vshll.u32 %v7443_v41, %v3437_v20 }
 0x1c3   : > { %v3380_v43 = vadd.s32 536870912, %v3379_v25  ;;  %v3441_v0 = vshrl.u32 %v7440_v35, %v3438_v29  ;;  %v3444_v28 = vshrl.u32 %v7441_v37, %v3438_v29  ;;  %v3447_v9 = vshrl.u32 %v7442_v39, %v3438_v29 }
 0x1c4   : > { %v2980_v50 = vsel %vm2897_vm0, %v2979_v1, %v2978_v10  ;;  %v3450_v13 = vshrl.u32 %v7443_v41, %v3438_v29  ;;  %v3453_v16 = vshrl.u32 %v7444_v49, %v3438_v29  ;;  %vm3455_vm0 = vcmp.lt.s32.totalorder %v9077_v52, 1 }
 0x1c5   : > { %v2983_v42 = vsel %vm9059_vm13, %v8798_v24, %v2980_v50  ;;  %v9093_v46 = vshrl.u32 %v3380_v43, 30  ;;  %v3442_v45 = vor.u32 %v3441_v0, %v3440_v3  ;;  %v3445_v59 = vor.u32 %v3444_v28, %v3443_v47 }
 0x1c6   : > { %7339 = vcosq.f32 %v2983_v42  ;;  %v3448_v56 = vor.u32 %v3447_v9, %v3446_v21  ;;  %v3451_v53 = vor.u32 %v3450_v13, %v3449_v51  ;;  %v3454_v32 = vor.u32 %v3453_v16, %v3452_v22 }
 0x1c7   : > { %7341 = vsinq.f32 %v2983_v42  ;;  %v3382_v26 = vshll.u32 %v9093_v46, 30  ;;  %v9098_v57 = vshll.u32 %v3431_v17, 8  ;;  %vm3456_vm1 = vcmp.lt.s32.totalorder %v9077_v52, 2 }
 0x1c8   : > { %vm3457_vm2 = vcmp.lt.s32.totalorder %v9077_v52, 3  ;;  %vm3458_vm4 = vcmp.lt.s32.totalorder %v9077_v52, 4  ;;  %v3463_v63 = vsel %vm3455_vm0, %v3442_v45, %v3445_v59  ;;  %vm2987_vm5 = vweird.f32 %v8798_v24 }
 0x1c9   : > { %vm3303_vm3 = vcmp.lt.s32.totalorder %v9071_v19, 2  ;;  %v9107_v62 = vsub.s32 %v3379_v25, %v3382_v26  ;;  %v3439_v27 = vshrl.u32 %v7439_v33, %v3438_v29  ;;  %v3464_v7 = vsel %vm3458_vm4, %v3451_v53, 920167782 }
 0x1ca   : > { %vm3304_vm6 = vcmp.eq.s32.totalorder %v9071_v19, 0  ;;  %v3460_v55 = vsel %vm3458_vm4, %v3448_v56, 2102212464  ;;  %v3465_v54 = vsel %vm3457_vm2, %v3448_v56, %v3464_v7  ;;  %v3530_v18 = vand.u32 2139095040, %v9075_v6 }
 0x1cb   : > { %vm3307_vm7 = vcmp.eq.s32.totalorder %v9071_v19, 2  ;;  %vm3321_vm8 = vcmp.lt.s32.totalorder %v8910_v44, 0  ;;  %v3385_v8 = vsub.s32 0, %v9107_v62  ;;  %v3466_v23 = vsel %vm3456_vm1, %v3463_v63, %v3465_v54 }
 0x1cc   : > { %v3467_v58 = vsel %vm3455_vm0, %v3445_v59, %v3448_v56  ;;  %vm2990_vm10 = vcmp.lt.s32.totalorder %v2989_v34, 2  ;;  %v3468_v15 = vsel %vm3458_vm4, %v3454_v32, 1326507024  ;;  %v3459_v5 = vsel %vm3455_vm0, %v3439_v27, %v3442_v45 }
 0x1cd   : > { %v9128_v4 = vmul.u32.u64.low %v9098_v57, %v3466_v23  ;;  %v9129_v40 = vmul.u32.u64.high %v9098_v57, %v3466_v23, %v9128_v4  ;;  %v6978_v61 = vmin.u32 %v3385_v8, %v9107_v62  ;;  %v3461_v10 = vsel %vm3457_vm2, %v3445_v59, %v3460_v55 }
 0x1ce   : > { %v3469_v12 = vsel %vm3457_vm2, %v3451_v53, %v3468_v15  ;;  %vm2991_vm9 = vcmp.eq.s32.totalorder %v2989_v34, 0  ;;  %vm2994_vm11 = vcmp.eq.s32.totalorder %v2989_v34, 2  ;;  %v3531_v20 = vshrl.u32 %v3530_v18, 23 }
 0x1cf   : > { %v3470_v30 = vsel %vm3456_vm1, %v3467_v58, %v3469_v12  ;;  %v3375_v17 = vadd.s32 %v9053_v36, %v9048_v38  ;;  %v3387_v25 = vclz %v6978_v61  ;;  %v3405_v29 = vsub.s32 4, %v9093_v46 }
 0x1d0   : > { %v7340_v14 = vpop.eup %7339  ;;  %v3462_v50 = vsel %vm3456_vm1, %v3459_v5, %v3461_v10  ;;  %v9147_v47 = vmul.u32.u64.low %v9098_v57, %v3470_v30  ;;  %v9148_v21 = vmul.u32.u64.high %v9098_v57, %v3470_v30, %v9147_v47  ;;  %v3527_v38 = vand.u32 2147483647, %v9075_v6 }
 0x1d1   : > { %v7342_v1 = vpop.eup %7341  ;;  %v2995_v31 = vxor.u32 2147483648, %v7340_v14  ;;  %v6979_v43 = vadd.s32 4294967294, %v3387_v25  ;;  %v3481_v52 = vadd.s32 1, %v9129_v40  ;;  %v6985_v22 = vadd.s32 4294967169, %v3531_v20 }
 0x1d2   : > { %v2992_v3 = vxor.u32 2147483648, %v7342_v1  ;;  %v3478_v13 = vmul.u32 %v9098_v57, %v3462_v50  ;;  %v3406_v56 = vsel %vm3321_vm8, %v3405_v29, %v9093_v46  ;;  %vm3480_vm13 = vc.u32 %v9148_v21, %v9128_v4 }
 0x1d3   : > { %v2996_v51 = vsel %vm2994_vm11, %v2995_v31, %v7342_v1  ;;  %v3309_v42 = vsel %vm3307_vm7, %v2995_v31, %v7342_v1  ;;  %vm6980_vm12 = vcmp.lt.s32.totalorder %v6979_v43, 0  ;;  %v3482_v26 = vsel %vm3480_vm13, %v3481_v52, %v9129_v40 }
 0x1d4   : > { %v2993_v36 = vsel %vm2991_vm9, %v7340_v14, %v2992_v3  ;;  %v3306_v0 = vsel %vm3304_vm6, %v7340_v14, %v2992_v3  ;;  %v3390_v59 = vsel %vm6980_vm12, 0, %v6979_v43  ;;  %v3537_v32 = vadd.s32 1, %v6985_v22 }
 0x1d5   : > { %v2997_v28 = vsel %vm2990_vm10, %v2993_v36, %v2996_v51  ;;  %v3310_v9 = vsel %vm3303_vm3, %v3306_v0, %v3309_v42  ;;  %v3391_v53 = vsub.s32 32, %v3390_v59  ;;  %v3392_v19 = vshll.u32 %v9107_v62, %v3390_v59 }
 0x1d6   : > { %v2998_v45 = vsel %vm2987_vm5, nan, %v2997_v28  ;;  %v3311_v16 = vsel %vm2987_vm5, nan, %v3310_v9  ;;  %v3395_v34 = vsub.s32 4294967266, %v3390_v59  ;;  %vm9176_vm14 = vcmp.le.f32.partialorder %v3319_v11, 0.7853982 }
 0x1d7   : > { %6961 = vst [vmem:[%s7504_s26 + $0xe8] sm:$0xff] %v2998_v45  ;;  %6976 = vst [vmem:[%s7504_s26 + $0x100] sm:$0xff] %v3311_v16  ;;  %v3393_v57 = vshrl.u32 %v3375_v17, %v3391_v53  ;;  %v3483_v63 = vadd.s32 %v3482_v26, %v3478_v13  ;;  %v3408_v27 = vsel %vm9176_vm14, 0, %v3406_v56  ;;  %v3534_v62 = vand.u32 8388607, %v3527_v38 }
 0x1d8   : > { %v3396_v46 = vadd.s32 127, %v3395_v34  ;;  %vm3538_vm15 = vcmp.gt.s32.totalorder %v3537_v32, 0  ;;  %v9185_v15 = vmul.f32 64.0, %v8907_v48  ;;  %v3412_v40 = vadd.s32 3, %v3408_v27 }
 0x1d9   : > { %v3394_v7 = vor.u32 %v3393_v57, %v3392_v19  ;;  %v3484_v54 = vadd.s32 536870912, %v3483_v63  ;;  %v3539_v18 = vsel %vm3538_vm15, %v3537_v32, 0  ;;  %v3535_v61 = vor.u32 8388608, %v3534_v62 }
 0x1da   : > { %v3397_v55 = vshll.u32 %v3396_v46, 23  ;;  %v3541_v8 = vand.u32 31, %v3539_v18  ;;  %v9187_v5 = vshrl.u32 %v3539_v18, 5  ;;  %v9199_v47 = vand.u32 3, %v3412_v40 }
 0x1db   : > { %v3401_v11 = vcvt.s32.f32 %v3394_v7  ;;  %v3485_v58 = vshrl.u32 %v3484_v54, 30  ;;  %vm3425_vm0 = vcmp.lt.s32.totalorder %v8962_v2, 0  ;;  %v3479_v51 = vadd.s32 %v9128_v4, %v9148_v21 }
 0x1dc   : > { %v3398_v23 = vor.u32 4788187, %v3397_v55  ;;  %v3542_v10 = vsub.s32 32, %v3541_v8  ;;  %v3544_v30 = vshll.u32 %v7439_v33, %v3541_v8  ;;  %v3547_v20 = vshll.u32 %v7440_v35, %v3541_v8 }
 0x1dd   : > { %v3486_v14 = vshll.u32 %v3485_v58, 30  ;;  %v3550_v17 = vshll.u32 %v7441_v37, %v3541_v8  ;;  %v3553_v3 = vshll.u32 %v7442_v39, %v3541_v8  ;;  %v9204_v42 = vshll.u32 %v3535_v61, 8 }
 0x1de   : > { %v3399_v12 = vand.u32 2147483647, %v3398_v23  ;;  %v3545_v1 = vshrl.u32 %v7440_v35, %v3542_v10  ;;  %v3548_v31 = vshrl.u32 %v7441_v37, %v3542_v10  ;;  %v3551_v48 = vshrl.u32 %v7442_v39, %v3542_v10 }
 0x1df   : > { %v9195_v29 = vsub.s32 %v3483_v63, %v3486_v14  ;;  %v3554_v50 = vshrl.u32 %v7443_v41, %v3542_v10  ;;  %v9206_v43 = vand.u32 3, %v3408_v27  ;;  %v3954_v22 = vand.u32 2139095040, %v9185_v15 }
 0x1e0   : > { %v3402_v25 = vmul.f32 %v3401_v11, %v3399_v12  ;;  %v3546_v52 = vor.u32 %v3545_v1, %v3544_v30  ;;  %v3549_v28 = vor.u32 %v3548_v31, %v3547_v20  ;;  %v3552_v9 = vor.u32 %v3551_v48, %v3550_v17 }
 0x1e1   : > { %v3489_v0 = vsub.s32 0, %v9195_v29  ;;  %v3556_v13 = vshll.u32 %v7443_v41, %v3541_v8  ;;  %v3557_v45 = vshrl.u32 %v7444_v49, %v3542_v10  ;;  %v3555_v21 = vor.u32 %v3554_v50, %v3553_v3 }
 0x1e2   : > { %v3403_v36 = vxor.u32 2147483648, %v3402_v25  ;;  %vm3559_vm1 = vcmp.lt.s32.totalorder %v9187_v5, 1  ;;  %vm9221_vm2 = vcmp.le.f32.partialorder %v3423_v60, 0.7853982  ;;  %v3543_v53 = vshrl.u32 %v7439_v33, %v3542_v10 }
 0x1e3   : > { %v6982_v4 = vmin.u32 %v3489_v0, %v9195_v29  ;;  %v3558_v19 = vor.u32 %v3557_v45, %v3556_v13  ;;  %vm3562_vm4 = vcmp.lt.s32.totalorder %v9187_v5, 4  ;;  %v3509_v26 = vsub.s32 4, %v3485_v58 }
 0x1e4   : > { %v3404_v16 = vsel %vm3321_vm8, %v3403_v36, %v3402_v25  ;;  %vm3561_vm5 = vcmp.lt.s32.totalorder %v9187_v5, 3  ;;  %vm3560_vm3 = vcmp.lt.s32.totalorder %v9187_v5, 2  ;;  %v3564_v32 = vsel %vm3562_vm4, %v3552_v9, 2102212464 }
 0x1e5   : > { %v3407_v59 = vsel %vm9176_vm14, %v8910_v44, %v3404_v16  ;;  %v3491_v34 = vclz %v6982_v4  ;;  %v3567_v60 = vsel %vm3559_vm1, %v3546_v52, %v3549_v28  ;;  %v3568_v57 = vsel %vm3562_vm4, %v3555_v21, 920167782 }
 0x1e6   : > { %7343 = vcosq.f32 %v3407_v59  ;;  %v3571_v46 = vsel %vm3559_vm1, %v3549_v28, %v3552_v9  ;;  %v3955_v63 = vshrl.u32 %v3954_v22, 23  ;;  %v3563_v27 = vsel %vm3559_vm1, %v3543_v53, %v3546_v52 }
 0x1e7   : > { %7345 = vsinq.f32 %v3407_v59  ;;  %v6983_v24 = vadd.s32 4294967294, %v3491_v34  ;;  %v3565_v62 = vsel %vm3561_vm5, %v3549_v28, %v3564_v32  ;;  %v3569_v7 = vsel %vm3561_vm5, %v3552_v9, %v3568_v57 }
 0x1e8   : > { %v3572_v55 = vsel %vm3562_vm4, %v3558_v19, 1326507024  ;;  %vm3414_vm6 = vcmp.lt.s32.totalorder %v9199_v47, 2  ;;  %v3510_v54 = vsel %vm3425_vm0, %v3509_v26, %v3485_v58  ;;  %v3570_v18 = vsel %vm3560_vm3, %v3567_v60, %v3569_v7 }
 0x1e9   : > { %vm6984_vm7 = vcmp.lt.s32.totalorder %v6983_v24, 0  ;;  %v3573_v8 = vsel %vm3561_vm5, %v3555_v21, %v3572_v55  ;;  %vm3411_vm8 = vweird.f32 %v8910_v44  ;;  %v3566_v14 = vsel %vm3560_vm3, %v3563_v27, %v3565_v62  ;;  %v9299_v27 = vld [vmem:[%s7504_s26 + $0x8] sm:$0xff] }
 0x1ea   : > { %v3494_v23 = vsel %vm6984_vm7, 0, %v6983_v24  ;;  %v3574_v11 = vsel %vm3560_vm3, %v3571_v46, %v3573_v8  ;;  %v9256_v40 = vmul.u32.u64.low %v9204_v42, %v3570_v18  ;;  %v9257_v61 = vmul.u32.u64.high %v9204_v42, %v3570_v18, %v9256_v40 }
 0x1eb   : > { %v3495_v10 = vsub.s32 32, %v3494_v23  ;;  %v3496_v58 = vshll.u32 %v9195_v29, %v3494_v23  ;;  %v3499_v12 = vsub.s32 4294967266, %v3494_v23  ;;  %vm3415_vm10 = vcmp.eq.s32.totalorder %v9199_v47, 0 }
 0x1ec   : > { %vm3418_vm9 = vcmp.eq.s32.totalorder %v9199_v47, 2  ;;  %v9266_v30 = vmul.u32.u64.low %v9204_v42, %v3574_v11  ;;  %v9267_v20 = vmul.u32.u64.high %v9204_v42, %v3574_v11, %v9266_v30  ;;  %v3512_v17 = vsel %vm9221_vm2, 0, %v3510_v54 }
 0x1ed   : > { %v3497_v1 = vshrl.u32 %v3479_v51, %v3495_v10  ;;  %v3500_v31 = vadd.s32 127, %v3499_v12  ;;  %v7007_v48 = vadd.s32 4294967169, %v3955_v63  ;;  %v3582_v25 = vmul.u32 %v9204_v42, %v3566_v14 }
 0x1ee   : > { %v3585_v29 = vadd.s32 1, %v9257_v61  ;;  %vm3729_vm11 = vcmp.lt.s32.totalorder %v9206_v43, 2  ;;  %vm3730_vm12 = vcmp.eq.s32.totalorder %v9206_v43, 0  ;;  %vm3733_vm13 = vcmp.eq.s32.totalorder %v9206_v43, 2 }
 0x1ef   : > { %v3498_v3 = vor.u32 %v3497_v1, %v3496_v58  ;;  %v3501_v50 = vshll.u32 %v3500_v31, 23  ;;  %v3961_v36 = vadd.s32 1, %v7007_v48  ;;  %v3516_v52 = vadd.s32 3, %v3512_v17 }
 0x1f0   : > { %v7344_v5 = vpop.eup %7343  ;;  %vm3584_vm14 = vc.u32 %v9267_v20, %v9256_v40  ;;  %v3951_v42 = vand.u32 2147483647, %v9185_v15  ;;  %v9302_v47 = vmul.f32 64.0, %v9299_v27  ;;  %v9309_v54 = vand.u32 3, %v3512_v17 }
 0x1f1   : > { %v7346_v51 = vpop.eup %7345  ;;  %v3419_v0 = vxor.u32 2147483648, %v7344_v5  ;;  %v3502_v28 = vor.u32 4788187, %v3501_v50  ;;  %v3505_v9 = vcvt.s32.f32 %v3498_v3  ;;  %v3586_v13 = vsel %vm3584_vm14, %v3585_v29, %v9257_v61 }
 0x1f2   : > { %v3416_v22 = vxor.u32 2147483648, %v7346_v51  ;;  %v3587_v16 = vadd.s32 %v3586_v13, %v3582_v25  ;;  %vm3962_vm15 = vcmp.gt.s32.totalorder %v3961_v36, 0  ;;  %v9304_v43 = vand.u32 3, %v3516_v52 }
 0x1f3   : > { %v3420_v45 = vsel %vm3418_vm9, %v3419_v0, %v7346_v51  ;;  %v3735_v4 = vsel %vm3733_vm13, %v3419_v0, %v7346_v51  ;;  %v3503_v59 = vand.u32 2147483647, %v3502_v28  ;;  %v3963_v19 = vsel %vm3962_vm15, %v3961_v36, 0 }
 0x1f4   : > { %v3417_v21 = vsel %vm3415_vm10, %v7344_v5, %v3416_v22  ;;  %v3732_v53 = vsel %vm3730_vm12, %v7344_v5, %v3416_v22  ;;  %v3588_v26 = vadd.s32 536870912, %v3587_v16  ;;  %v3965_v46 = vand.u32 31, %v3963_v19 }
 0x1f5   : > { %v3421_v34 = vsel %vm3414_vm6, %v3417_v21, %v3420_v45  ;;  %v3736_v32 = vsel %vm3729_vm11, %v3732_v53, %v3735_v4  ;;  %v3506_v24 = vmul.f32 %v3505_v9, %v3503_v59  ;;  %v3958_v7 = vand.u32 8388607, %v3951_v42 }
 0x1f6   : > { %v3422_v60 = vsel %vm3411_vm8, nan, %v3421_v34  ;;  %v3737_v57 = vsel %vm3411_vm8, nan, %v3736_v32  ;;  %v9295_v63 = vshrl.u32 %v3588_v26, 30  ;;  %v3966_v55 = vsub.s32 32, %v3965_v46 }
 0x1f7   : > { %6989 = vst [vmem:[%s7504_s26 + $0x108] sm:$0xff] %v3422_v60  ;;  %7004 = vst [vmem:[%s7504_s26 + $0x120] sm:$0xff] %v3737_v57  ;;  %v3507_v62 = vxor.u32 2147483648, %v3506_v24  ;;  %v9311_v18 = vshrl.u32 %v3963_v19, 5  ;;  %v3968_v8 = vshll.u32 %v7439_v33, %v3965_v46  ;;  %v3971_v61 = vshll.u32 %v7440_v35, %v3965_v46 }
 0x1f8   : > { %v3590_v44 = vshll.u32 %v9295_v63, 30  ;;  %v3969_v11 = vshrl.u32 %v7440_v35, %v3966_v55  ;;  %v3972_v10 = vshrl.u32 %v7441_v37, %v3966_v55  ;;  %v3974_v14 = vshll.u32 %v7441_v37, %v3965_v46 }
 0x1f9   : > { %v3508_v23 = vsel %vm3425_vm0, %v3507_v62, %v3506_v24  ;;  %v3975_v30 = vshrl.u32 %v7442_v39, %v3966_v55  ;;  %v3959_v1 = vor.u32 8388608, %v3958_v7  ;;  %v3977_v31 = vshll.u32 %v7442_v39, %v3965_v46 }
 0x1fa   : > { %v3511_v58 = vsel %vm9221_vm2, %v8962_v2, %v3508_v23  ;;  %v9322_v12 = vsub.s32 %v3587_v16, %v3590_v44  ;;  %v4055_v17 = vand.u32 2147483647, %v9302_v47  ;;  %vm3529_vm0 = vcmp.lt.s32.totalorder %v9075_v6, 0 }
 0x1fb   : > { %7347 = vcosq.f32 %v3511_v58  ;;  %v3967_v56 = vshrl.u32 %v7439_v33, %v3966_v55  ;;  %v3970_v25 = vor.u32 %v3969_v11, %v3968_v8  ;;  %vm3522_vm1 = vcmp.eq.s32.totalorder %v9304_v43, 2 }
 0x1fc   : > { %7349 = vsinq.f32 %v3511_v58  ;;  %v3593_v48 = vsub.s32 0, %v9322_v12  ;;  %vm3836_vm2 = vcmp.eq.s32.totalorder %v9309_v54, 2  ;;  %v3973_v29 = vor.u32 %v3972_v10, %v3971_v61 }
 0x1fd   : > { %v3978_v5 = vshrl.u32 %v7443_v41, %v3966_v55  ;;  %v3980_v3 = vshll.u32 %v7443_v41, %v3965_v46  ;;  %v3981_v50 = vshrl.u32 %v7444_v49, %v3966_v55  ;;  %vm3519_vm4 = vcmp.eq.s32.totalorder %v9304_v43, 0 }
 0x1fe   : > { %v6986_v36 = vmin.u32 %v3593_v48, %v9322_v12  ;;  %vm3833_vm5 = vcmp.eq.s32.totalorder %v9309_v54, 0  ;;  %v3976_v51 = vor.u32 %v3975_v30, %v3974_v14  ;;  %vm3983_vm3 = vcmp.lt.s32.totalorder %v9311_v18, 1 }
 0x1ff   : > { %v4058_v0 = vand.u32 2139095040, %v9302_v47  ;;  %vm3518_vm6 = vcmp.lt.s32.totalorder %v9304_v43, 2  ;;  %vm3832_vm7 = vcmp.lt.s32.totalorder %v9309_v54, 2  ;;  %v3979_v52 = vor.u32 %v3978_v5, %v3977_v31 }
 0x200   : > { %v3982_v22 = vor.u32 %v3981_v50, %v3980_v3  ;;  %vm3985_vm8 = vcmp.lt.s32.totalorder %v9311_v18, 3  ;;  %vm3986_vm10 = vcmp.lt.s32.totalorder %v9311_v18, 4  ;;  %vm3515_vm9 = vweird.f32 %v8962_v2 }
 0x201   : > { %v3595_v28 = vclz %v6986_v36  ;;  %v3613_v9 = vsub.s32 4, %v9295_v63  ;;  %vm3984_vm11 = vcmp.lt.s32.totalorder %v9311_v18, 2  ;;  %v3999_v13 = vshll.u32 %v3959_v1, 8 }
 0x202   : > { %v3987_v45 = vsel %vm3983_vm3, %v3967_v56, %v3970_v25  ;;  %v3988_v16 = vsel %vm3986_vm10, %v3976_v51, 2102212464  ;;  %v3991_v4 = vsel %vm3983_vm3, %v3970_v25, %v3973_v29  ;;  %v3992_v21 = vsel %vm3986_vm10, %v3979_v52, 920167782 }
 0x203   : > { %vm9358_vm12 = vcmp.le.f32.partialorder %v3527_v38, 0.7853982  ;;  %v6987_v53 = vadd.s32 4294967294, %v3595_v28  ;;  %v3989_v19 = vsel %vm3985_vm8, %v3973_v29, %v3988_v16  ;;  %v3993_v34 = vsel %vm3985_vm8, %v3976_v51, %v3992_v21  ;;  %v9418_v21 = vld [vmem:[%s7504_s26 + $0x10] sm:$0xff] }
 0x204   : > { %v3995_v26 = vsel %vm3983_vm3, %v3973_v29, %v3976_v51  ;;  %v3583_v32 = vadd.s32 %v9256_v40, %v9267_v20  ;;  %v3994_v60 = vsel %vm3984_vm11, %v3991_v4, %v3993_v34  ;;  %v3996_v38 = vsel %vm3986_vm10, %v3982_v22, 1326507024 }
 0x205   : > { %v4059_v24 = vshrl.u32 %v4058_v0, 23  ;;  %vm6988_vm13 = vcmp.lt.s32.totalorder %v6987_v53, 0  ;;  %v3997_v57 = vsel %vm3985_vm8, %v3979_v52, %v3996_v38  ;;  %v7348_v7 = vpop.eup %7347  ;;  %v3614_v40 = vsel %vm3529_vm0, %v3613_v9, %v9295_v63 }
 0x206   : > { %v9376_v46 = vmul.u32.u64.low %v3999_v13, %v3994_v60  ;;  %v9377_v62 = vmul.u32.u64.high %v3999_v13, %v3994_v60, %v9376_v46  ;;  %v3598_v55 = vsel %vm6988_vm13, 0, %v6987_v53  ;;  %v3990_v20 = vsel %vm3984_vm11, %v3987_v45, %v3989_v19  ;;  %v7350_v8 = vpop.eup %7349 }
 0x207   : > { %v3998_v44 = vsel %vm3984_vm11, %v3995_v26, %v3997_v57  ;;  %v3523_v23 = vxor.u32 2147483648, %v7348_v7  ;;  %v3599_v11 = vsub.s32 32, %v3598_v55  ;;  %v3600_v61 = vshll.u32 %v9322_v12, %v3598_v55 }
 0x208   : > { %v3603_v10 = vsub.s32 4294967266, %v3598_v55  ;;  %v3520_v58 = vxor.u32 2147483648, %v7350_v8  ;;  %v9388_v14 = vmul.u32.u64.low %v3999_v13, %v3998_v44  ;;  %v9389_v30 = vmul.u32.u64.high %v3999_v13, %v3998_v44, %v9388_v14 }
 0x209   : > { %v7011_v1 = vadd.s32 4294967169, %v4059_v24  ;;  %v3524_v63 = vsel %vm3522_vm1, %v3523_v23, %v7350_v8  ;;  %v3601_v31 = vshrl.u32 %v3583_v32, %v3599_v11  ;;  %v3838_v18 = vsel %vm3836_vm2, %v3523_v23, %v7350_v8 }
 0x20a   : > { %v3604_v48 = vadd.s32 127, %v3603_v10  ;;  %v3521_v56 = vsel %vm3519_vm4, %v7348_v7, %v3520_v58  ;;  %v3835_v12 = vsel %vm3833_vm5, %v7348_v7, %v3520_v58  ;;  %v4006_v25 = vmul.u32 %v3999_v13, %v3990_v20 }
 0x20b   : > { %v4009_v29 = vadd.s32 1, %v9377_v62  ;;  %v3525_v5 = vsel %vm3518_vm6, %v3521_v56, %v3524_v63  ;;  %v3602_v3 = vor.u32 %v3601_v31, %v3600_v61  ;;  %v3839_v36 = vsel %vm3832_vm7, %v3835_v12, %v3838_v18 }
 0x20c   : > { %v3605_v50 = vshll.u32 %v3604_v48, 23  ;;  %v3526_v51 = vsel %vm3515_vm9, nan, %v3525_v5  ;;  %v3616_v0 = vsel %vm9358_vm12, 0, %v3614_v40  ;;  %v3840_v52 = vsel %vm3515_vm9, nan, %v3839_v36 }
 0x20d   : > { %vm4008_vm14 = vc.u32 %v9389_v30, %v9376_v46  ;;  %6990 = vst [vmem:[%s7504_s26 + $0x110] sm:$0xff] %v3526_v51  ;;  %v3609_v22 = vcvt.s32.f32 %v3602_v3  ;;  %7005 = vst [vmem:[%s7504_s26 + $0x128] sm:$0xff] %v3840_v52  ;;  %v4065_v28 = vadd.s32 1, %v7011_v1  ;;  %v3620_v45 = vadd.s32 3, %v3616_v0 }
 0x20e   : > { %v3606_v43 = vor.u32 4788187, %v3605_v50  ;;  %v4010_v54 = vsel %vm4008_vm14, %v4009_v29, %v9377_v62  ;;  %v4062_v16 = vand.u32 8388607, %v4055_v17  ;;  %v9421_v53 = vmul.f32 64.0, %v9418_v21 }
 0x20f   : > { %v4011_v9 = vadd.s32 %v4010_v54, %v4006_v25  ;;  %vm4066_vm15 = vcmp.gt.s32.totalorder %v4065_v28, 0  ;;  %v9423_v26 = vand.u32 3, %v3616_v0  ;;  %v9425_v38 = vand.u32 3, %v3620_v45 }
 0x210   : > { %v3607_v13 = vand.u32 2147483647, %v3606_v43  ;;  %v4067_v4 = vsel %vm4066_vm15, %v4065_v28, 0  ;;  %v4063_v24 = vor.u32 8388608, %v4062_v16  ;;  %v4162_v40 = vand.u32 2139095040, %v9421_v53 }
 0x211   : > { %v4012_v2 = vadd.s32 536870912, %v4011_v9  ;;  %v4069_v34 = vand.u32 31, %v4067_v4  ;;  %vm3953_vm1 = vcmp.lt.s32.totalorder %v9185_v15, 0  ;;  %v4068_v10 = vshrl.u32 %v4067_v4, 5 }
 0x212   : > { %v3610_v19 = vmul.f32 %v3609_v22, %v3607_v13  ;;  %v9444_v14 = vadd.s32 %v9376_v46, %v9389_v30  ;;  %vm3939_vm2 = vcmp.eq.s32.totalorder %v9423_v26, 2  ;;  %vm3623_vm4 = vcmp.eq.s32.totalorder %v9425_v38, 0 }
 0x213   : > { %v4013_v32 = vshrl.u32 %v4012_v2, 30  ;;  %v4070_v57 = vsub.s32 32, %v4069_v34  ;;  %v4072_v7 = vshll.u32 %v7439_v33, %v4069_v34  ;;  %v4075_v55 = vshll.u32 %v7440_v35, %v4069_v34 }
 0x214   : > { %v3611_v60 = vxor.u32 2147483648, %v3610_v19  ;;  %v4078_v23 = vshll.u32 %v7441_v37, %v4069_v34  ;;  %v4081_v63 = vshll.u32 %v7442_v39, %v4069_v34  ;;  %v4084_v12 = vshll.u32 %v7443_v41, %v4069_v34 }
 0x215   : > { %v4014_v62 = vshll.u32 %v4013_v32, 30  ;;  %v4073_v44 = vshrl.u32 %v7440_v35, %v4070_v57  ;;  %v4076_v8 = vshrl.u32 %v7441_v37, %v4070_v57  ;;  %v4079_v58 = vshrl.u32 %v7442_v39, %v4070_v57 }
 0x216   : > { %v3612_v20 = vsel %vm3529_vm0, %v3611_v60, %v3610_v19  ;;  %v4071_v1 = vshrl.u32 %v7439_v33, %v4070_v57  ;;  %vm3626_vm0 = vcmp.eq.s32.totalorder %v9425_v38, 2  ;;  %v4082_v56 = vshrl.u32 %v7443_v41, %v4070_v57 }
 0x217   : > { %v3615_v11 = vsel %vm9358_vm12, %v9075_v6, %v3612_v20  ;;  %v9439_v61 = vsub.s32 %v4011_v9, %v4014_v62  ;;  %v4074_v31 = vor.u32 %v4073_v44, %v4072_v7  ;;  %v4077_v48 = vor.u32 %v4076_v8, %v4075_v55 }
 0x218   : > { %7351 = vcosq.f32 %v3615_v11  ;;  %v4080_v18 = vor.u32 %v4079_v58, %v4078_v23  ;;  %v4085_v46 = vshrl.u32 %v7444_v49, %v4070_v57  ;;  %vm3936_vm5 = vcmp.eq.s32.totalorder %v9423_v26, 0 }
 0x219   : > { %7353 = vsinq.f32 %v3615_v11  ;;  %v4017_v59 = vsub.s32 0, %v9439_v61  ;;  %vm9458_vm3 = vcmp.le.f32.partialorder %v3951_v42, 0.7853982  ;;  %v4037_v29 = vsub.s32 4, %v4013_v32 }
 0x21a   : > { %vm4087_vm6 = vcmp.lt.s32.totalorder %v4068_v10, 1  ;;  %v4163_v5 = vshrl.u32 %v4162_v40, 23  ;;  %vm3622_vm7 = vcmp.lt.s32.totalorder %v9425_v38, 2  ;;  %vm3935_vm8 = vcmp.lt.s32.totalorder %v9423_v26, 2 }
 0x21b   : > { %v7008_v25 = vmin.u32 %v4017_v59, %v9439_v61  ;;  %v4083_v3 = vor.u32 %v4082_v56, %v4081_v63  ;;  %v4086_v50 = vor.u32 %v4085_v46, %v4084_v12  ;;  %vm4089_vm10 = vcmp.lt.s32.totalorder %v4068_v10, 3 }
 0x21c   : > { %vm4090_vm9 = vcmp.lt.s32.totalorder %v4068_v10, 4  ;;  %vm3619_vm11 = vweird.f32 %v9075_v6  ;;  %vm4088_vm12 = vcmp.lt.s32.totalorder %v4068_v10, 2  ;;  %v4091_v42 = vsel %vm4087_vm6, %v4071_v1, %v4074_v31 }
 0x21d   : > { %v4019_v36 = vclz %v7008_v25  ;;  %v4103_v51 = vshll.u32 %v4063_v24, 8  ;;  %v4092_v0 = vsel %vm4090_vm9, %v4080_v18, 2102212464  ;;  %v4095_v52 = vsel %vm4087_vm6, %v4074_v31, %v4077_v48 }
 0x21e   : > { %v4096_v43 = vsel %vm4090_vm9, %v4083_v3, 920167782  ;;  %v4099_v22 = vsel %vm4087_vm6, %v4077_v48, %v4080_v18  ;;  %v4093_v28 = vsel %vm4089_vm10, %v4077_v48, %v4092_v0  ;;  %v4100_v13 = vsel %vm4090_vm9, %v4086_v50, 1326507024 }
 0x21f   : > { %v7009_v54 = vadd.s32 4294967294, %v4019_v36  ;;  %v4097_v9 = vsel %vm4089_vm10, %v4080_v18, %v4096_v43  ;;  %v4038_v45 = vsel %vm3953_vm1, %v4037_v29, %v4013_v32  ;;  %v4101_v2 = vsel %vm4089_vm10, %v4083_v3, %v4100_v13 }
 0x220   : > { %v4098_v16 = vsel %vm4088_vm12, %v4095_v52, %v4097_v9  ;;  %v7015_v4 = vadd.s32 4294967169, %v4163_v5  ;;  %v4102_v19 = vsel %vm4088_vm12, %v4099_v22, %v4101_v2  ;;  %v4094_v62 = vsel %vm4088_vm12, %v4091_v42, %v4093_v28 }
 0x221   : > { %vm7010_vm13 = vcmp.lt.s32.totalorder %v7009_v54, 0  ;;  %v9476_v34 = vmul.u32.u64.low %v4103_v51, %v4098_v16  ;;  %v9477_v60 = vmul.u32.u64.high %v4103_v51, %v4098_v16, %v9476_v34  ;;  %v9487_v11 = vsel %vm9458_vm3, 0, %v4038_v45 }
 0x222   : > { %v7352_v24 = vpop.eup %7351  ;;  %v4022_v57 = vsel %vm7010_vm13, 0, %v7009_v54  ;;  %v9481_v7 = vmul.u32.u64.low %v4103_v51, %v4102_v19  ;;  %v9482_v55 = vmul.u32.u64.high %v4103_v51, %v4102_v19, %v9481_v7  ;;  %v4159_v58 = vand.u32 2147483647, %v9421_v53 }
 0x223   : > { %v7354_v32 = vpop.eup %7353  ;;  %v3627_v40 = vxor.u32 2147483648, %v7352_v24  ;;  %v4023_v20 = vsub.s32 32, %v4022_v57  ;;  %v4024_v44 = vshll.u32 %v9439_v61, %v4022_v57  ;;  %v4027_v8 = vsub.s32 4294967266, %v4022_v57 }
 0x224   : > { %v3624_v23 = vxor.u32 2147483648, %v7354_v32  ;;  %v4169_v1 = vadd.s32 1, %v7015_v4  ;;  %v4110_v18 = vmul.u32 %v4103_v51, %v4094_v62  ;;  %vm4112_vm14 = vc.u32 %v9482_v55, %v9476_v34 }
 0x225   : > { %v3628_v10 = vsel %vm3626_vm0, %v3627_v40, %v7354_v32  ;;  %v3941_v63 = vsel %vm3939_vm2, %v3627_v40, %v7354_v32  ;;  %v4025_v59 = vshrl.u32 %v9444_v14, %v4023_v20  ;;  %v4028_v61 = vadd.s32 127, %v4027_v8  ;;  %v9530_v40 = vld [vmem:[%s7504_s26] sm:$0xff] }
 0x226   : > { %v3625_v31 = vsel %vm3623_vm4, %v7352_v24, %v3624_v23  ;;  %v3938_v48 = vsel %vm3936_vm5, %v7352_v24, %v3624_v23  ;;  %v4113_v5 = vadd.s32 1, %v9477_v60  ;;  %vm4170_vm15 = vcmp.gt.s32.totalorder %v4169_v1, 0 }
 0x227   : > { %v3629_v56 = vsel %vm3622_vm7, %v3625_v31, %v3628_v10  ;;  %v3942_v12 = vsel %vm3935_vm8, %v3938_v48, %v3941_v63  ;;  %v4026_v46 = vor.u32 %v4025_v59, %v4024_v44  ;;  %v4029_v25 = vshll.u32 %v4028_v61, 23 }
 0x228   : > { %v3630_v14 = vsel %vm3619_vm11, nan, %v3629_v56  ;;  %v3943_v29 = vsel %vm3619_vm11, nan, %v3942_v12  ;;  %v4171_v38 = vsel %vm4170_vm15, %v4169_v1, 0  ;;  %v4114_v36 = vsel %vm4112_vm14, %v4113_v5, %v9477_v60 }
 0x229   : > { %6991 = vst [vmem:[%s7504_s26 + $0x118] sm:$0xff] %v3630_v14  ;;  %7006 = vst [vmem:[%s7504_s26 + $0x130] sm:$0xff] %v3943_v29  ;;  %v4030_v3 = vor.u32 4788187, %v4029_v25  ;;  %v4033_v50 = vcvt.s32.f32 %v4026_v46  ;;  %v4173_v26 = vand.u32 31, %v4171_v38  ;;  %v4044_v51 = vadd.s32 3, %v9487_v11 }
 0x22a   : > { %v4115_v0 = vadd.s32 %v4114_v36, %v4110_v18  ;;  %v4166_v52 = vand.u32 8388607, %v4159_v58  ;;  %v9516_v6 = vshrl.u32 %v4171_v38, 5  ;;  %vm4057_vm0 = vcmp.lt.s32.totalorder %v9302_v47, 0 }
 0x22b   : > { %v4031_v42 = vand.u32 2147483647, %v4030_v3  ;;  %v4174_v43 = vsub.s32 32, %v4173_v26  ;;  %v4176_v22 = vshll.u32 %v7439_v33, %v4173_v26  ;;  %v4179_v54 = vshll.u32 %v7440_v35, %v4173_v26 }
 0x22c   : > { %v4116_v9 = vadd.s32 536870912, %v4115_v0  ;;  %v4182_v13 = vshll.u32 %v7441_v37, %v4173_v26  ;;  %v4185_v45 = vshll.u32 %v7442_v39, %v4173_v26  ;;  %v4188_v19 = vshll.u32 %v7443_v41, %v4173_v26 }
 0x22d   : > { %v4034_v28 = vmul.f32 %v4033_v50, %v4031_v42  ;;  %v4177_v16 = vshrl.u32 %v7440_v35, %v4174_v43  ;;  %v4180_v2 = vshrl.u32 %v7441_v37, %v4174_v43  ;;  %v4183_v4 = vshrl.u32 %v7442_v39, %v4174_v43 }
 0x22e   : > { %v4117_v24 = vshrl.u32 %v4116_v9, 30  ;;  %v4186_v57 = vshrl.u32 %v7443_v41, %v4174_v43  ;;  %v4189_v62 = vshrl.u32 %v7444_v49, %v4174_v43  ;;  %v4167_v7 = vor.u32 8388608, %v4166_v52 }
 0x22f   : > { %v4035_v60 = vxor.u32 2147483648, %v4034_v28  ;;  %v4178_v32 = vor.u32 %v4177_v16, %v4176_v22  ;;  %v9533_v20 = vmul.f32 128.0, %v9530_v40  ;;  %v4181_v23 = vor.u32 %v4180_v2, %v4179_v54 }
 0x230   : > { %v4118_v8 = vshll.u32 %v4117_v24, 30  ;;  %v4184_v1 = vor.u32 %v4183_v4, %v4182_v13  ;;  %v4187_v63 = vor.u32 %v4186_v57, %v4185_v45  ;;  %v4190_v59 = vor.u32 %v4189_v62, %v4188_v19 }
 0x231   : > { %v4036_v44 = vsel %vm3953_vm1, %v4035_v60, %v4034_v28  ;;  %vm4191_vm2 = vcmp.lt.s32.totalorder %v9516_v6, 1  ;;  %v9541_v61 = vand.u32 3, %v4044_v51  ;;  %vm4194_vm4 = vcmp.lt.s32.totalorder %v9516_v6, 4 }
 0x232   : > { %v4039_v10 = vsel %vm9458_vm3, %v9185_v15, %v4036_v44  ;;  %v9543_v31 = vsub.s32 %v4115_v0, %v4118_v8  ;;  %v4141_v48 = vsub.s32 4, %v4117_v24  ;;  %v4175_v18 = vshrl.u32 %v7439_v33, %v4174_v43 }
 0x233   : > { %7355 = vcosq.f32 %v4039_v10  ;;  %vm4193_vm1 = vcmp.lt.s32.totalorder %v9516_v6, 3  ;;  %vm4192_vm5 = vcmp.lt.s32.totalorder %v9516_v6, 2  ;;  %v4196_v56 = vsel %vm4194_vm4, %v4184_v1, 2102212464 }
 0x234   : > { %7357 = vsinq.f32 %v4039_v10  ;;  %v4121_v30 = vsub.s32 0, %v9543_v31  ;;  %v4199_v12 = vsel %vm4191_vm2, %v4178_v32, %v4181_v23  ;;  %v4200_v46 = vsel %vm4194_vm4, %v4187_v63, 920167782 }
 0x235   : > { %v4203_v25 = vsel %vm4191_vm2, %v4181_v23, %v4184_v1  ;;  %v4204_v14 = vsel %vm4194_vm4, %v4190_v59, 1326507024  ;;  %v4207_v29 = vshll.u32 %v4167_v7, 8  ;;  %v4201_v3 = vsel %vm4193_vm1, %v4184_v1, %v4200_v46 }
 0x236   : > { %v7012_v5 = vmin.u32 %v4121_v30, %v9543_v31  ;;  %v4205_v50 = vsel %vm4193_vm1, %v4187_v63, %v4204_v14  ;;  %v4360_v38 = vand.u32 3, %v9487_v11  ;;  %vm4043_vm3 = vweird.f32 %v9185_v15 }
 0x237   : > { %v4195_v36 = vsel %vm4191_vm2, %v4175_v18, %v4178_v32  ;;  %v4197_v26 = vsel %vm4193_vm1, %v4181_v23, %v4196_v56  ;;  %v4202_v42 = vsel %vm4192_vm5, %v4199_v12, %v4201_v3  ;;  %v4206_v51 = vsel %vm4192_vm5, %v4203_v25, %v4205_v50 }
 0x238   : > { %vm9565_vm6 = vcmp.le.f32.partialorder %v4055_v17, 0.7853982  ;;  %v4123_v52 = vclz %v7012_v5  ;;  %v4142_v11 = vsel %vm4057_vm0, %v4141_v48, %v4117_v24  ;;  %v4583_v43 = vand.u32 2147483647, %v9533_v20 }
 0x239   : > { %v9572_v22 = vmul.u32.u64.low %v4207_v29, %v4206_v51  ;;  %v9573_v54 = vmul.u32.u64.high %v4207_v29, %v4206_v51, %v9572_v22  ;;  %v9575_v28 = vmul.u32.u64.low %v4207_v29, %v4202_v42  ;;  %v9576_v9 = vmul.u32.u64.high %v4207_v29, %v4202_v42, %v9575_v28 }
 0x23a   : > { %vm4046_vm7 = vcmp.lt.s32.totalorder %v9541_v61, 2  ;;  %vm4047_vm8 = vcmp.eq.s32.totalorder %v9541_v61, 0  ;;  %v7013_v17 = vadd.s32 4294967294, %v4123_v52  ;;  %v4198_v13 = vsel %vm4192_vm5, %v4195_v36, %v4197_v26 }
 0x23b   : > { %vm4050_vm10 = vcmp.eq.s32.totalorder %v9541_v61, 2  ;;  %v4111_v45 = vadd.s32 %v9476_v34, %v9482_v55  ;;  %vm4361_vm9 = vcmp.lt.s32.totalorder %v4360_v38, 2  ;;  %v4586_v16 = vand.u32 2139095040, %v9533_v20 }
 0x23c   : > { %vm7014_vm11 = vcmp.lt.s32.totalorder %v7013_v17, 0  ;;  %v4144_v4 = vsel %vm9565_vm6, 0, %v4142_v11  ;;  %vm4362_vm12 = vcmp.eq.s32.totalorder %v4360_v38, 0  ;;  %vm4365_vm13 = vcmp.eq.s32.totalorder %v4360_v38, 2 }
 0x23d   : > { %v7356_v2 = vpop.eup %7355  ;;  %v4126_v24 = vsel %vm7014_vm11, 0, %v7013_v17  ;;  %v4214_v6 = vmul.u32 %v4207_v29, %v4198_v13  ;;  %vm4216_vm14 = vc.u32 %v9573_v54, %v9575_v28  ;;  %v4217_v32 = vadd.s32 1, %v9576_v9 }
 0x23e   : > { %v7358_v19 = vpop.eup %7357  ;;  %v4051_v60 = vxor.u32 2147483648, %v7356_v2  ;;  %v4127_v62 = vsub.s32 32, %v4126_v24  ;;  %v4128_v34 = vshll.u32 %v9543_v31, %v4126_v24  ;;  %v4131_v55 = vsub.s32 4294967266, %v4126_v24 }
 0x23f   : > { %v4048_v57 = vxor.u32 2147483648, %v7358_v19  ;;  %v4587_v8 = vshrl.u32 %v4586_v16, 23  ;;  %v4218_v31 = vsel %vm4216_vm14, %v4217_v32, %v9576_v9  ;;  %v4148_v3 = vadd.s32 3, %v4144_v4 }
 0x240   : > { %v4052_v7 = vsel %vm4050_vm10, %v4051_v60, %v7358_v19  ;;  %v4367_v44 = vsel %vm4365_vm13, %v4051_v60, %v7358_v19  ;;  %v4129_v1 = vshrl.u32 %v4111_v45, %v4127_v62  ;;  %v4132_v10 = vadd.s32 127, %v4131_v55 }
 0x241   : > { %v4049_v23 = vsel %vm4047_vm8, %v7356_v2, %v4048_v57  ;;  %v4364_v63 = vsel %vm4362_vm12, %v7356_v2, %v4048_v57  ;;  %v7037_v18 = vadd.s32 4294967169, %v4587_v8  ;;  %v4219_v46 = vadd.s32 %v4218_v31, %v4214_v6 }
 0x242   : > { %v4053_v59 = vsel %vm4046_vm7, %v4049_v23, %v4052_v7  ;;  %v4368_v48 = vsel %vm4361_vm9, %v4364_v63, %v4367_v44  ;;  %v4130_v56 = vor.u32 %v4129_v1, %v4128_v34  ;;  %v4133_v12 = vshll.u32 %v4132_v10, 23 }
 0x243   : > { %v4054_v30 = vsel %vm4043_vm3, nan, %v4053_v59  ;;  %v4369_v25 = vsel %vm4043_vm3, nan, %v4368_v48  ;;  %v4593_v14 = vadd.s32 1, %v7037_v18  ;;  %v4220_v61 = vadd.s32 536870912, %v4219_v46 }
 0x244   : > { %7019 = vst [vmem:[%s7504_s26 + $0x138] sm:$0xff] %v4054_v30  ;;  %v4134_v29 = vor.u32 4788187, %v4133_v12  ;;  %v4137_v5 = vcvt.s32.f32 %v4130_v56  ;;  %7034 = vst [vmem:[%s7504_s26 + $0x150] sm:$0xff] %v4369_v25  ;;  %v4590_v36 = vand.u32 8388607, %v4583_v43  ;;  %v9620_v13 = vadd.s32 %v9575_v28, %v9573_v54 }
 0x245   : > { %vm4594_vm15 = vcmp.gt.s32.totalorder %v4593_v14, 0  ;;  %v4221_v38 = vshrl.u32 %v4220_v61, 30  ;;  %v9611_v51 = vmul.f32 128.0, %v9299_v27  ;;  %v9613_v11 = vand.u32 3, %v4148_v3 }
 0x246   : > { %v4135_v50 = vand.u32 2147483647, %v4134_v29  ;;  %v4595_v26 = vsel %vm4594_vm15, %v4593_v14, 0  ;;  %vm4161_vm2 = vcmp.lt.s32.totalorder %v9421_v53, 0  ;;  %v9616_v22 = vand.u32 3, %v4144_v4 }
 0x247   : > { %v4597_v42 = vand.u32 31, %v4595_v26  ;;  %v4222_v15 = vshll.u32 %v4221_v38, 30  ;;  %v4591_v16 = vor.u32 8388608, %v4590_v36  ;;  %v4690_v60 = vand.u32 2139095040, %v9611_v51 }
 0x248   : > { %v4138_v52 = vmul.f32 %v4137_v5, %v4135_v50  ;;  %v4596_v57 = vshrl.u32 %v4595_v26, 5  ;;  %v4687_v34 = vand.u32 2147483647, %v9611_v51  ;;  %vm9640_vm4 = vcmp.le.f32.partialorder %v4159_v58, 0.7853982 }
 0x249   : > { %v4598_v9 = vsub.s32 32, %v4597_v42  ;;  %v9622_v45 = vsub.s32 %v4219_v46, %v4222_v15  ;;  %v4600_v27 = vshll.u32 %v7439_v33, %v4597_v42  ;;  %v4603_v2 = vshll.u32 %v7440_v35, %v4597_v42 }
 0x24a   : > { %v4139_v17 = vxor.u32 2147483648, %v4138_v52  ;;  %v4606_v19 = vshll.u32 %v7441_v37, %v4597_v42  ;;  %v4245_v32 = vsub.s32 4, %v4221_v38  ;;  %v9645_v44 = vshll.u32 %v4591_v16, 8 }
 0x24b   : > { %v4225_v24 = vsub.s32 0, %v9622_v45  ;;  %v4601_v6 = vshrl.u32 %v7440_v35, %v4598_v9  ;;  %v4604_v54 = vshrl.u32 %v7441_v37, %v4598_v9  ;;  %v4607_v62 = vshrl.u32 %v7442_v39, %v4598_v9 }
 0x24c   : > { %v4140_v4 = vsel %vm4057_vm0, %v4139_v17, %v4138_v52  ;;  %v4599_v0 = vshrl.u32 %v7439_v33, %v4598_v9  ;;  %v4609_v8 = vshll.u32 %v7442_v39, %v4597_v42  ;;  %v4691_v23 = vshrl.u32 %v4690_v60, 23 }
 0x24d   : > { %v4143_v28 = vsel %vm9565_vm6, %v9302_v47, %v4140_v4  ;;  %v7016_v7 = vmin.u32 %v4225_v24, %v9622_v45  ;;  %vm4154_vm0 = vcmp.eq.s32.totalorder %v9613_v11, 2  ;;  %vm4468_vm1 = vcmp.eq.s32.totalorder %v9616_v22, 2 }
 0x24e   : > { %7359 = vcosq.f32 %v4143_v28  ;;  %v4602_v58 = vor.u32 %v4601_v6, %v4600_v27  ;;  %v4605_v10 = vor.u32 %v4604_v54, %v4603_v2  ;;  %v4608_v63 = vor.u32 %v4607_v62, %v4606_v19 }
 0x24f   : > { %7361 = vsinq.f32 %v4143_v28  ;;  %v4227_v1 = vclz %v7016_v7  ;;  %vm4151_vm5 = vcmp.eq.s32.totalorder %v9613_v11, 0  ;;  %vm4465_vm3 = vcmp.eq.s32.totalorder %v9616_v22, 0 }
 0x250   : > { %v4610_v59 = vshrl.u32 %v7443_v41, %v4598_v9  ;;  %v4612_v31 = vshll.u32 %v7443_v41, %v4597_v42  ;;  %v4613_v48 = vshrl.u32 %v7444_v49, %v4598_v9  ;;  %vm4615_vm6 = vcmp.lt.s32.totalorder %v4596_v57, 1 }
 0x251   : > { %vm4150_vm7 = vcmp.lt.s32.totalorder %v9613_v11, 2  ;;  %v7017_v18 = vadd.s32 4294967294, %v4227_v1  ;;  %v4246_v30 = vsel %vm4161_vm2, %v4245_v32, %v4221_v38  ;;  %vm4464_vm8 = vcmp.lt.s32.totalorder %v9616_v22, 2 }
 0x252   : > { %vm4616_vm10 = vcmp.lt.s32.totalorder %v4596_v57, 2  ;;  %vm4618_vm9 = vcmp.lt.s32.totalorder %v4596_v57, 4  ;;  %vm4147_vm11 = vweird.f32 %v9302_v47  ;;  %v4611_v56 = vor.u32 %v4610_v59, %v4609_v8 }
 0x253   : > { %v4614_v12 = vor.u32 %v4613_v48, %v4612_v31  ;;  %vm4617_vm12 = vcmp.lt.s32.totalorder %v4596_v57, 3  ;;  %v4620_v46 = vsel %vm4618_vm9, %v4608_v63, 2102212464  ;;  %vm7018_vm13 = vcmp.lt.s32.totalorder %v7017_v18, 0 }
 0x254   : > { %v4619_v25 = vsel %vm4615_vm6, %v4599_v0, %v4602_v58  ;;  %v4621_v14 = vsel %vm4617_vm12, %v4605_v10, %v4620_v46  ;;  %v4623_v29 = vsel %vm4615_vm6, %v4602_v58, %v4605_v10  ;;  %v4230_v5 = vsel %vm7018_vm13, 0, %v7017_v18 }
 0x255   : > { %v4624_v61 = vsel %vm4618_vm9, %v4611_v56, 920167782  ;;  %v4627_v3 = vsel %vm4615_vm6, %v4605_v10, %v4608_v63  ;;  %v4628_v50 = vsel %vm4618_vm9, %v4614_v12, 1326507024  ;;  %v4231_v38 = vsub.s32 32, %v4230_v5 }
 0x256   : > { %v4232_v36 = vshll.u32 %v9622_v45, %v4230_v5  ;;  %v4235_v26 = vsub.s32 4294967266, %v4230_v5  ;;  %v4625_v42 = vsel %vm4617_vm12, %v4608_v63, %v4624_v61  ;;  %v4248_v52 = vsel %vm9640_vm4, 0, %v4246_v30 }
 0x257   : > { %v4629_v15 = vsel %vm4617_vm12, %v4611_v56, %v4628_v50  ;;  %v7041_v9 = vadd.s32 4294967169, %v4691_v23  ;;  %v9669_v17 = vand.u32 8388607, %v4687_v34  ;;  %v4233_v27 = vshrl.u32 %v9620_v13, %v4231_v38 }
 0x258   : > { %v7360_v16 = vpop.eup %7359  ;;  %v4236_v2 = vadd.s32 127, %v4235_v26  ;;  %v4626_v19 = vsel %vm4616_vm10, %v4623_v29, %v4625_v42  ;;  %v4630_v60 = vsel %vm4616_vm10, %v4627_v3, %v4629_v15  ;;  %v4622_v24 = vsel %vm4616_vm10, %v4619_v25, %v4621_v14 }
 0x259   : > { %v7362_v45 = vpop.eup %7361  ;;  %v4155_v4 = vxor.u32 2147483648, %v7360_v16  ;;  %v9676_v6 = vmul.u32.u64.low %v9645_v44, %v4630_v60  ;;  %v9677_v54 = vmul.u32.u64.high %v9645_v44, %v4630_v60, %v9676_v6  ;;  %v4234_v62 = vor.u32 %v4233_v27, %v4232_v36 }
 0x25a   : > { %v4152_v28 = vxor.u32 2147483648, %v7362_v45  ;;  %v4237_v7 = vshll.u32 %v4236_v2, 23  ;;  %v4697_v32 = vadd.s32 1, %v7041_v9  ;;  %v4638_v31 = vmul.u32 %v9645_v44, %v4622_v24 }
 0x25b   : > { %v4156_v13 = vsel %vm4154_vm0, %v4155_v4, %v7362_v45  ;;  %v4470_v0 = vsel %vm4468_vm1, %v4155_v4, %v7362_v45  ;;  %v9684_v8 = vmul.u32.u64.low %v9645_v44, %v4626_v19  ;;  %v9685_v57 = vmul.u32.u64.high %v9645_v44, %v4626_v19, %v9684_v8 }
 0x25c   : > { %v4153_v23 = vsel %vm4151_vm5, %v7360_v16, %v4152_v28  ;;  %v4238_v1 = vor.u32 4788187, %v4237_v7  ;;  %v4241_v58 = vcvt.s32.f32 %v4234_v62  ;;  %v4467_v10 = vsel %vm4465_vm3, %v7360_v16, %v4152_v28 }
 0x25d   : > { %v4157_v63 = vsel %vm4150_vm7, %v4153_v23, %v4156_v13  ;;  %v4471_v59 = vsel %vm4464_vm8, %v4467_v10, %v4470_v0  ;;  %vm4640_vm14 = vc.u32 %v9677_v54, %v9684_v8  ;;  %vm4698_vm15 = vcmp.gt.s32.totalorder %v4697_v32, 0 }
 0x25e   : > { %v4158_v48 = vsel %vm4147_vm11, nan, %v4157_v63  ;;  %v4239_v18 = vand.u32 2147483647, %v4238_v1  ;;  %v4472_v30 = vsel %vm4147_vm11, nan, %v4471_v59  ;;  %v4641_v11 = vadd.s32 1, %v9685_v57 }
 0x25f   : > { %7020 = vst [vmem:[%s7504_s26 + $0x140] sm:$0xff] %v4158_v48  ;;  %7035 = vst [vmem:[%s7504_s26 + $0x158] sm:$0xff] %v4472_v30  ;;  %v4699_v56 = vsel %vm4698_vm15, %v4697_v32, 0  ;;  %v9707_v44 = vmul.f32 128.0, %v9418_v21  ;;  %v4252_v46 = vadd.s32 3, %v4248_v52  ;;  %v9709_v25 = vand.u32 3, %v4248_v52 }
 0x260   : > { %v4242_v22 = vmul.f32 %v4241_v58, %v4239_v18  ;;  %v4701_v12 = vand.u32 31, %v4699_v56  ;;  %v4642_v14 = vsel %vm4640_vm14, %v4641_v11, %v9685_v57  ;;  %v4695_v29 = vor.u32 8388608, %v9669_v17 }
 0x261   : > { %v4643_v5 = vadd.s32 %v4642_v14, %v4638_v31  ;;  %v9714_v50 = vshrl.u32 %v4699_v56, 5  ;;  %v4253_v45 = vand.u32 3, %v4252_v46  ;;  %vm4568_vm0 = vcmp.eq.s32.totalorder %v9709_v25, 0 }
 0x262   : > { %v4243_v47 = vxor.u32 2147483648, %v4242_v22  ;;  %v4702_v61 = vsub.s32 32, %v4701_v12  ;;  %v4704_v3 = vshll.u32 %v7439_v33, %v4701_v12  ;;  %v4707_v38 = vshll.u32 %v7440_v35, %v4701_v12 }
 0x263   : > { %v4710_v36 = vshll.u32 %v7441_v37, %v4701_v12  ;;  %v4713_v21 = vshll.u32 %v7442_v39, %v4701_v12  ;;  %v4644_v42 = vadd.s32 536870912, %v4643_v5  ;;  %v4716_v15 = vshll.u32 %v7443_v41, %v4701_v12 }
 0x264   : > { %v4244_v26 = vsel %vm4161_vm2, %v4243_v47, %v4242_v22  ;;  %v4705_v52 = vshrl.u32 %v7440_v35, %v4702_v61  ;;  %v4708_v17 = vshrl.u32 %v7441_v37, %v4702_v61  ;;  %v4711_v16 = vshrl.u32 %v7442_v39, %v4702_v61 }
 0x265   : > { %v4247_v9 = vsel %vm9640_vm4, %v9421_v53, %v4244_v26  ;;  %v4714_v27 = vshrl.u32 %v7443_v41, %v4702_v61  ;;  %v9729_v2 = vshrl.u32 %v4644_v42, 30  ;;  %v4717_v60 = vshrl.u32 %v7444_v49, %v4702_v61 }
 0x266   : > { %7363 = vcosq.f32 %v4247_v9  ;;  %v4706_v19 = vor.u32 %v4705_v52, %v4704_v3  ;;  %v4709_v4 = vor.u32 %v4708_v17, %v4707_v38  ;;  %vm4571_vm2 = vcmp.eq.s32.totalorder %v9709_v25, 2 }
 0x267   : > { %7365 = vsinq.f32 %v4247_v9  ;;  %v4715_v24 = vor.u32 %v4714_v27, %v4713_v21  ;;  %v4646_v55 = vshll.u32 %v9729_v2, 30  ;;  %v4712_v6 = vor.u32 %v4711_v16, %v4710_v36 }
 0x268   : > { %vm4719_vm4 = vcmp.lt.s32.totalorder %v9714_v50, 1  ;;  %v4718_v28 = vor.u32 %v4717_v60, %v4716_v15  ;;  %vm4721_vm1 = vcmp.lt.s32.totalorder %v9714_v50, 3  ;;  %vm4722_vm5 = vcmp.lt.s32.totalorder %v9714_v50, 4 }
 0x269   : > { %v4794_v62 = vand.u32 2139095040, %v9707_v44  ;;  %vm4567_vm3 = vcmp.lt.s32.totalorder %v9709_v25, 2  ;;  %v9740_v7 = vsub.s32 %v4643_v5, %v4646_v55  ;;  %v4703_v32 = vshrl.u32 %v7439_v33, %v4702_v61 }
 0x26a   : > { %vm4720_vm6 = vcmp.lt.s32.totalorder %v9714_v50, 2  ;;  %v4727_v13 = vsel %vm4719_vm4, %v4706_v19, %v4709_v4  ;;  %vm4251_vm7 = vweird.f32 %v9421_v53  ;;  %vm4254_vm8 = vcmp.lt.s32.totalorder %v4253_v45, 2 }
 0x26b   : > { %v4724_v0 = vsel %vm4722_vm5, %v4712_v6, 2102212464  ;;  %v4728_v57 = vsel %vm4722_vm5, %v4715_v24, 920167782  ;;  %v4735_v23 = vshll.u32 %v4695_v29, 8  ;;  %v4649_v1 = vsub.s32 0, %v9740_v7 }
 0x26c   : > { %v4729_v58 = vsel %vm4721_vm1, %v4712_v6, %v4728_v57  ;;  %v4731_v10 = vsel %vm4719_vm4, %v4709_v4, %v4712_v6  ;;  %v4791_v63 = vand.u32 2147483647, %v9707_v44  ;;  %vm4255_vm10 = vcmp.eq.s32.totalorder %v4253_v45, 0 }
 0x26d   : > { %v4730_v59 = vsel %vm4720_vm6, %v4727_v13, %v4729_v58  ;;  %v4732_v31 = vsel %vm4722_vm5, %v4718_v28, 1326507024  ;;  %v4795_v48 = vshrl.u32 %v4794_v62, 23  ;;  %v7038_v18 = vmin.u32 %v4649_v1, %v9740_v7 }
 0x26e   : > { %v4723_v30 = vsel %vm4719_vm4, %v4703_v32, %v4706_v19  ;;  %v4725_v11 = vsel %vm4721_vm1, %v4709_v4, %v4724_v0  ;;  %v4733_v56 = vsel %vm4721_vm1, %v4715_v24, %v4732_v31  ;;  %vm4258_vm9 = vcmp.eq.s32.totalorder %v4253_v45, 2 }
 0x26f   : > { %v4734_v22 = vsel %vm4720_vm6, %v4731_v10, %v4733_v56  ;;  %v9770_v12 = vmul.u32.u64.low %v4735_v23, %v4730_v59  ;;  %v9771_v46 = vmul.u32.u64.high %v4735_v23, %v4730_v59, %v9770_v12  ;;  %v7045_v14 = vadd.s32 4294967169, %v4795_v48 }
 0x270   : > { %v7364_v29 = vpop.eup %7363  ;;  %v4639_v47 = vadd.s32 %v9684_v8, %v9677_v54  ;;  %v4651_v5 = vclz %v7038_v18  ;;  %v9778_v61 = vand.u32 8388607, %v4791_v63  ;;  %v4669_v15 = vsub.s32 4, %v9729_v2 }
 0x271   : > { %v7366_v3 = vpop.eup %7365  ;;  %v4259_v38 = vxor.u32 2147483648, %v7364_v29  ;;  %v9780_v36 = vmul.u32.u64.low %v4735_v23, %v4734_v22  ;;  %v9781_v21 = vmul.u32.u64.high %v4735_v23, %v4734_v22, %v9780_v36  ;;  %v4801_v26 = vadd.s32 1, %v7045_v14 }
 0x272   : > { %v4256_v42 = vxor.u32 2147483648, %v7366_v3  ;;  %v7039_v52 = vadd.s32 4294967294, %v4651_v5  ;;  %v4726_v9 = vsel %vm4720_vm6, %v4723_v30, %v4725_v11  ;;  %v4745_v8 = vadd.s32 1, %v9771_v46 }
 0x273   : > { %v4260_v17 = vsel %vm4258_vm9, %v4259_v38, %v7366_v3  ;;  %v4573_v54 = vsel %vm4571_vm2, %v4259_v38, %v7366_v3  ;;  %vm4802_vm11 = vcmp.gt.s32.totalorder %v4801_v26, 0  ;;  %v4742_v24 = vmul.u32 %v4735_v23, %v4726_v9 }
 0x274   : > { %v4257_v16 = vsel %vm4255_vm10, %v7364_v29, %v4256_v42  ;;  %v4570_v27 = vsel %vm4568_vm0, %v7364_v29, %v4256_v42  ;;  %vm7040_vm12 = vcmp.lt.s32.totalorder %v7039_v52, 0  ;;  %v4803_v19 = vsel %vm4802_vm11, %v4801_v26, 0 }
 0x275   : > { %v4261_v60 = vsel %vm4254_vm8, %v4257_v16, %v4260_v17  ;;  %v4574_v50 = vsel %vm4567_vm3, %v4570_v27, %v4573_v54  ;;  %v4654_v4 = vsel %vm7040_vm12, 0, %v7039_v52  ;;  %vm4585_vm13 = vcmp.lt.s32.totalorder %v9533_v20, 0 }
 0x276   : > { %v4262_v55 = vsel %vm4251_vm7, nan, %v4261_v60  ;;  %v4575_v6 = vsel %vm4251_vm7, nan, %v4574_v50  ;;  %v4655_v28 = vsub.s32 32, %v4654_v4  ;;  %v4656_v62 = vshll.u32 %v9740_v7, %v4654_v4 }
 0x277   : > { %7021 = vst [vmem:[%s7504_s26 + $0x148] sm:$0xff] %v4262_v55  ;;  %7036 = vst [vmem:[%s7504_s26 + $0x160] sm:$0xff] %v4575_v6  ;;  %v4659_v45 = vsub.s32 4294967266, %v4654_v4  ;;  %vm4744_vm14 = vc.u32 %v9781_v21, %v9770_v12  ;;  %v4805_v25 = vand.u32 31, %v4803_v19  ;;  %vm9807_vm15 = vcmp.le.f32.partialorder %v4583_v43, 0.7853982 }
 0x278   : > { %v4657_v53 = vshrl.u32 %v4639_v47, %v4655_v28  ;;  %v4670_v7 = vsel %vm4585_vm13, %v4669_v15, %v9729_v2  ;;  %v4746_v13 = vsel %vm4744_vm14, %v4745_v8, %v9771_v46  ;;  %v4799_v23 = vor.u32 8388608, %v9778_v61 }
 0x279   : > { %v4660_v0 = vadd.s32 127, %v4659_v45  ;;  %v4747_v57 = vadd.s32 %v4746_v13, %v4742_v24  ;;  %v4806_v1 = vsub.s32 32, %v4805_v25  ;;  %v4808_v10 = vshll.u32 %v7439_v33, %v4805_v25 }
 0x27a   : > { %v4658_v58 = vor.u32 %v4657_v53, %v4656_v62  ;;  %v4811_v43 = vshll.u32 %v7440_v35, %v4805_v25  ;;  %v4817_v59 = vshll.u32 %v7442_v39, %v4805_v25  ;;  %v4804_v18 = vshrl.u32 %v4803_v19, 5 }
 0x27b   : > { %v4661_v31 = vshll.u32 %v4660_v0, 23  ;;  %v4748_v48 = vadd.s32 536870912, %v4747_v57  ;;  %v4809_v30 = vshrl.u32 %v7440_v35, %v4806_v1  ;;  %v4812_v2 = vshrl.u32 %v7441_v37, %v4806_v1 }
 0x27c   : > { %v4814_v11 = vshll.u32 %v7441_v37, %v4805_v25  ;;  %v4815_v56 = vshrl.u32 %v7442_v39, %v4806_v1  ;;  %v4818_v22 = vshrl.u32 %v7443_v41, %v4806_v1  ;;  %v4665_v14 = vcvt.s32.f32 %v4658_v58 }
 0x27d   : > { %v4662_v46 = vor.u32 4788187, %v4661_v31  ;;  %v4749_v29 = vshrl.u32 %v4748_v48, 30  ;;  %v4820_v47 = vshll.u32 %v7443_v41, %v4805_v25  ;;  %v4810_v5 = vor.u32 %v4809_v30, %v4808_v10 }
 0x27e   : > { %v4813_v61 = vor.u32 %v4812_v2, %v4811_v43  ;;  %v4819_v3 = vor.u32 %v4818_v22, %v4817_v59  ;;  %v4821_v38 = vshrl.u32 %v7444_v49, %v4806_v1  ;;  %v4672_v26 = vsel %vm9807_vm15, 0, %v4670_v7 }
 0x27f   : > { %v4663_v36 = vand.u32 2147483647, %v4662_v46  ;;  %v4750_v42 = vshll.u32 %v4749_v29, 30  ;;  %vm4823_vm2 = vcmp.lt.s32.totalorder %v4804_v18, 1  ;;  %v4807_v52 = vshrl.u32 %v7439_v33, %v4806_v1 }
 0x280   : > { %v4816_v15 = vor.u32 %v4815_v56, %v4814_v11  ;;  %v4822_v9 = vor.u32 %v4821_v38, %v4820_v47  ;;  %vm4826_vm4 = vcmp.lt.s32.totalorder %v4804_v18, 4  ;;  %vm4825_vm0 = vcmp.lt.s32.totalorder %v4804_v18, 3 }
 0x281   : > { %v4666_v17 = vmul.f32 %v4665_v14, %v4663_v36  ;;  %v9829_v54 = vsub.s32 %v4747_v57, %v4750_v42  ;;  %v4839_v8 = vshll.u32 %v4799_v23, 8  ;;  %vm4824_vm1 = vcmp.lt.s32.totalorder %v4804_v18, 2 }
 0x282   : > { %v4828_v16 = vsel %vm4826_vm4, %v4816_v15, 2102212464  ;;  %v4831_v27 = vsel %vm4823_vm2, %v4810_v5, %v4813_v61  ;;  %v4832_v19 = vsel %vm4826_vm4, %v4819_v3, 920167782  ;;  %v4676_v50 = vadd.s32 3, %v4672_v26 }
 0x283   : > { %v4667_v60 = vxor.u32 2147483648, %v4666_v17  ;;  %v4753_v4 = vsub.s32 0, %v9829_v54  ;;  %v4827_v24 = vsel %vm4823_vm2, %v4807_v52, %v4810_v5  ;;  %v4829_v55 = vsel %vm4825_vm0, %v4813_v61, %v4828_v16 }
 0x284   : > { %v4833_v6 = vsel %vm4825_vm0, %v4816_v15, %v4832_v19  ;;  %v4836_v28 = vsel %vm4826_vm4, %v4822_v9, 1326507024  ;;  %v4835_v53 = vsel %vm4823_vm2, %v4813_v61, %v4816_v15  ;;  %v4773_v1 = vsub.s32 4, %v4749_v29 }
 0x285   : > { %v4668_v62 = vsel %vm4585_vm13, %v4667_v60, %v4666_v17  ;;  %v7042_v45 = vmin.u32 %v4753_v4, %v9829_v54  ;;  %v4834_v25 = vsel %vm4824_vm1, %v4831_v27, %v4833_v6  ;;  %v4837_v13 = vsel %vm4825_vm0, %v4819_v3, %v4836_v28 }
 0x286   : > { %v4671_v7 = vsel %vm9807_vm15, %v9533_v20, %v4668_v62  ;;  %v9845_v0 = vmul.u32.u64.low %v4839_v8, %v4834_v25  ;;  %v9846_v57 = vmul.u32.u64.high %v4839_v8, %v4834_v25, %v9845_v0  ;;  %v9850_v58 = vmul.f32 256.0, %v9530_v40 }
 0x287   : > { %7367 = vcosq.f32 %v4671_v7  ;;  %v4755_v23 = vclz %v7042_v45  ;;  %v4677_v10 = vand.u32 3, %v4676_v50  ;;  %v4838_v43 = vsel %vm4824_vm1, %v4835_v53, %v4837_v13  ;;  %v9881_v50 = vld [vmem:[%s7504_s26 + $0x8] sm:$0xff] }
 0x288   : > { %7369 = vsinq.f32 %v4671_v7  ;;  %v4830_v32 = vsel %vm4824_vm1, %v4827_v24, %v4829_v55  ;;  %v9854_v31 = vmul.u32.u64.low %v4839_v8, %v4838_v43  ;;  %v9855_v48 = vmul.u32.u64.high %v4839_v8, %v4838_v43, %v9854_v31 }
 0x289   : > { %v7043_v59 = vadd.s32 4294967294, %v4755_v23  ;;  %vm9859_vm5 = vcmp.le.f32.partialorder %v4687_v34, 0.7853982  ;;  %vm4689_vm3 = vcmp.lt.s32.totalorder %v9611_v51, 0  ;;  %v4743_v40 = vadd.s32 %v9770_v12, %v9781_v21 }
 0x28a   : > { %v4774_v2 = vsel %vm4689_vm3, %v4773_v1, %v4749_v29  ;;  %v4849_v18 = vadd.s32 1, %v9846_v57  ;;  %v5218_v11 = vand.u32 2139095040, %v9850_v58  ;;  %vm4675_vm7 = vweird.f32 %v9533_v20 }
 0x28b   : > { %vm7044_vm6 = vcmp.lt.s32.totalorder %v7043_v59, 0  ;;  %v4846_v34 = vmul.u32 %v4839_v8, %v4830_v32  ;;  %v4992_v22 = vand.u32 3, %v4672_v26  ;;  %v5215_v46 = vand.u32 2147483647, %v9850_v58 }
 0x28c   : > { %v4758_v56 = vsel %vm7044_vm6, 0, %v7043_v59  ;;  %vm4678_vm8 = vcmp.lt.s32.totalorder %v4677_v10, 2  ;;  %vm4679_vm10 = vcmp.eq.s32.totalorder %v4677_v10, 0  ;;  %v4776_v21 = vsel %vm9859_vm5, 0, %v4774_v2 }
 0x28d   : > { %v4759_v14 = vsub.s32 32, %v4758_v56  ;;  %v4760_v47 = vshll.u32 %v9829_v54, %v4758_v56  ;;  %v4763_v12 = vsub.s32 4294967266, %v4758_v56  ;;  %vm4848_vm9 = vc.u32 %v9855_v48, %v9845_v0 }
 0x28e   : > { %v5219_v29 = vshrl.u32 %v5218_v11, 23  ;;  %vm4682_vm11 = vcmp.eq.s32.totalorder %v4677_v10, 2  ;;  %v4850_v3 = vsel %vm4848_vm9, %v4849_v18, %v9846_v57  ;;  %vm4993_vm12 = vcmp.lt.s32.totalorder %v4992_v22, 2 }
 0x28f   : > { %v4761_v5 = vshrl.u32 %v4743_v40, %v4759_v14  ;;  %v4764_v61 = vadd.s32 127, %v4763_v12  ;;  %v4851_v38 = vadd.s32 %v4850_v3, %v4846_v34  ;;  %vm4994_vm13 = vcmp.eq.s32.totalorder %v4992_v22, 0 }
 0x290   : > { %v7067_v36 = vadd.s32 4294967169, %v5219_v29  ;;  %v4780_v15 = vadd.s32 3, %v4776_v21  ;;  %vm4997_vm14 = vcmp.eq.s32.totalorder %v4992_v22, 2  ;;  %v5222_v8 = vand.u32 8388607, %v5215_v46 }
 0x291   : > { %v7368_v26 = vpop.eup %7367  ;;  %v4762_v42 = vor.u32 %v4761_v5, %v4760_v47  ;;  %v4765_v52 = vshll.u32 %v4764_v61, 23  ;;  %v4852_v54 = vadd.s32 536870912, %v4851_v38  ;;  %v9884_v4 = vmul.f32 256.0, %v9881_v50 }
 0x292   : > { %v7370_v9 = vpop.eup %7369  ;;  %v4683_v17 = vxor.u32 2147483648, %v7368_v26  ;;  %v5225_v16 = vadd.s32 1, %v7067_v36  ;;  %v5223_v43 = vor.u32 8388608, %v5222_v8  ;;  %v9900_v40 = vand.u32 3, %v4780_v15 }
 0x293   : > { %v4680_v27 = vxor.u32 2147483648, %v7370_v9  ;;  %v4766_v19 = vor.u32 4788187, %v4765_v52  ;;  %v4769_v60 = vcvt.s32.f32 %v4762_v42  ;;  %v4853_v55 = vshrl.u32 %v4852_v54, 30 }
 0x294   : > { %v4684_v24 = vsel %vm4682_vm11, %v4683_v17, %v7370_v9  ;;  %v4999_v6 = vsel %vm4997_vm14, %v4683_v17, %v7370_v9  ;;  %vm5226_vm15 = vcmp.gt.s32.totalorder %v5225_v16, 0  ;;  %v5322_v31 = vand.u32 2139095040, %v9884_v4 }
 0x295   : > { %v4681_v28 = vsel %vm4679_vm10, %v7368_v26, %v4680_v27  ;;  %v4767_v62 = vand.u32 2147483647, %v4766_v19  ;;  %v4996_v45 = vsel %vm4994_vm13, %v7368_v26, %v4680_v27  ;;  %v5227_v25 = vsel %vm5226_vm15, %v5225_v16, 0 }
 0x296   : > { %v4685_v53 = vsel %vm4678_vm8, %v4681_v28, %v4684_v24  ;;  %v4854_v7 = vshll.u32 %v4853_v55, 30  ;;  %v5000_v13 = vsel %vm4993_vm12, %v4996_v45, %v4999_v6  ;;  %v5229_v32 = vand.u32 31, %v5227_v25 }
 0x297   : > { %v4686_v57 = vsel %vm4675_vm7, nan, %v4685_v53  ;;  %v4770_v23 = vmul.f32 %v4769_v60, %v4767_v62  ;;  %v5001_v1 = vsel %vm4675_vm7, nan, %v5000_v13  ;;  %vm4793_vm2 = vcmp.lt.s32.totalorder %v9707_v44, 0 }
 0x298   : > { %7049 = vst [vmem:[%s7504_s26 + $0x168] sm:$0xff] %v4686_v57  ;;  %v9896_v59 = vsub.s32 %v4851_v38, %v4854_v7  ;;  %7064 = vst [vmem:[%s7504_s26 + $0x180] sm:$0xff] %v5001_v1  ;;  %v4877_v18 = vsub.s32 4, %v4853_v55  ;;  %v9904_v11 = vand.u32 3, %v4776_v21  ;;  %v9906_v20 = vshrl.u32 %v5227_v25, 5 }
 0x299   : > { %v4771_v10 = vxor.u32 2147483648, %v4770_v23  ;;  %v4847_v34 = vadd.s32 %v9845_v0, %v9855_v48  ;;  %v5230_v22 = vsub.s32 32, %v5229_v32  ;;  %v9912_v14 = vshll.u32 %v5223_v43, 8 }
 0x29a   : > { %v4857_v2 = vsub.s32 0, %v9896_v59  ;;  %v5319_v21 = vand.u32 2147483647, %v9884_v4  ;;  %v5323_v29 = vshrl.u32 %v5322_v31, 23  ;;  %v5232_v5 = vshll.u32 %v7439_v33, %v5229_v32 }
 0x29b   : > { %v4772_v56 = vsel %vm4689_vm3, %v4771_v10, %v4770_v23  ;;  %v5235_v61 = vshll.u32 %v7440_v35, %v5229_v32  ;;  %v5238_v3 = vshll.u32 %v7441_v37, %v5229_v32  ;;  %vm9924_vm4 = vcmp.le.f32.partialorder %v4791_v63, 0.7853982 }
 0x29c   : > { %v4775_v47 = vsel %vm9859_vm5, %v9611_v51, %v4772_v56  ;;  %v7046_v12 = vmin.u32 %v4857_v2, %v9896_v59  ;;  %v4878_v30 = vsel %vm4793_vm2, %v4877_v18, %v4853_v55  ;;  %vm5247_vm0 = vcmp.lt.s32.totalorder %v9906_v20, 1 }
 0x29d   : > { %7371 = vcosq.f32 %v4775_v47  ;;  %vm4786_vm1 = vcmp.eq.s32.totalorder %v9900_v40, 2  ;;  %vm5100_vm5 = vcmp.eq.s32.totalorder %v9904_v11, 2  ;;  %v5231_v38 = vshrl.u32 %v7439_v33, %v5230_v22 }
 0x29e   : > { %7373 = vsinq.f32 %v4775_v47  ;;  %v4859_v48 = vclz %v7046_v12  ;;  %v5233_v36 = vshrl.u32 %v7440_v35, %v5230_v22  ;;  %v5236_v26 = vshrl.u32 %v7441_v37, %v5230_v22 }
 0x29f   : > { %v5239_v63 = vshrl.u32 %v7442_v39, %v5230_v22  ;;  %vm4783_vm3 = vcmp.eq.s32.totalorder %v9900_v40, 0  ;;  %vm5097_vm6 = vcmp.eq.s32.totalorder %v9904_v11, 0  ;;  %v5241_v52 = vshll.u32 %v7442_v39, %v5229_v32 }
 0x2a0   : > { %v7047_v42 = vadd.s32 4294967294, %v4859_v48  ;;  %v5242_v15 = vshrl.u32 %v7443_v41, %v5230_v22  ;;  %v5244_v9 = vshll.u32 %v7443_v41, %v5229_v32  ;;  %vm4782_vm7 = vcmp.lt.s32.totalorder %v9900_v40, 2 }
 0x2a1   : > { %vm5096_vm8 = vcmp.lt.s32.totalorder %v9904_v11, 2  ;;  %v5234_v17 = vor.u32 %v5233_v36, %v5232_v5  ;;  %v5237_v54 = vor.u32 %v5236_v26, %v5235_v61  ;;  %v5240_v8 = vor.u32 %v5239_v63, %v5238_v3 }
 0x2a2   : > { %v5245_v16 = vshrl.u32 %v7444_v49, %v5230_v22  ;;  %vm4779_vm10 = vweird.f32 %v9611_v51  ;;  %vm7048_vm9 = vcmp.lt.s32.totalorder %v7047_v42, 0  ;;  %v5243_v27 = vor.u32 %v5242_v15, %v5241_v52 }
 0x2a3   : > { %vm5248_vm11 = vcmp.lt.s32.totalorder %v9906_v20, 2  ;;  %vm5250_vm12 = vcmp.lt.s32.totalorder %v9906_v20, 4  ;;  %v4862_v19 = vsel %vm7048_vm9, 0, %v7047_v42  ;;  %vm5249_vm13 = vcmp.lt.s32.totalorder %v9906_v20, 3 }
 0x2a4   : > { %v5246_v60 = vor.u32 %v5245_v16, %v5244_v9  ;;  %v5252_v24 = vsel %vm5250_vm12, %v5240_v8, 2102212464  ;;  %v4863_v55 = vsub.s32 32, %v4862_v19  ;;  %v4864_v6 = vshll.u32 %v9896_v59, %v4862_v19 }
 0x2a5   : > { %v4867_v28 = vsub.s32 4294967266, %v4862_v19  ;;  %v5251_v62 = vsel %vm5247_vm0, %v5231_v38, %v5234_v17  ;;  %v5253_v45 = vsel %vm5249_vm13, %v5237_v54, %v5252_v24  ;;  %v5255_v25 = vsel %vm5247_vm0, %v5234_v17, %v5237_v54  ;;  %v10010_v24 = vld [vmem:[%s7504_s26 + $0x10] sm:$0xff] }
 0x2a6   : > { %v5256_v53 = vsel %vm5250_vm12, %v5243_v27, 920167782  ;;  %v5259_v7 = vsel %vm5247_vm0, %v5237_v54, %v5240_v8  ;;  %v4865_v13 = vshrl.u32 %v4847_v34, %v4863_v55  ;;  %v5260_v1 = vsel %vm5250_vm12, %v5246_v60, 1326507024 }
 0x2a7   : > { %v4868_v57 = vadd.s32 127, %v4867_v28  ;;  %v5257_v23 = vsel %vm5249_vm13, %v5240_v8, %v5256_v53  ;;  %v7372_v43 = vpop.eup %7371  ;;  %v4880_v59 = vsel %vm9924_vm4, 0, %v4878_v30  ;;  %v5261_v31 = vsel %vm5249_vm13, %v5243_v27, %v5260_v1 }
 0x2a8   : > { %v5258_v32 = vsel %vm5248_vm11, %v5255_v25, %v5257_v23  ;;  %v7071_v10 = vadd.s32 4294967169, %v5323_v29  ;;  %v7374_v2 = vpop.eup %7373  ;;  %v4787_v18 = vxor.u32 2147483648, %v7372_v43  ;;  %v4866_v56 = vor.u32 %v4865_v13, %v4864_v6 }
 0x2a9   : > { %v4869_v34 = vshll.u32 %v4868_v57, 23  ;;  %v5262_v22 = vsel %vm5248_vm11, %v5259_v7, %v5261_v31  ;;  %v4784_v47 = vxor.u32 2147483648, %v7374_v2  ;;  %v5254_v12 = vsel %vm5248_vm11, %v5251_v62, %v5253_v45 }
 0x2aa   : > { %v9977_v5 = vmul.u32.u64.low %v9912_v14, %v5262_v22  ;;  %v9978_v61 = vmul.u32.u64.high %v9912_v14, %v5262_v22, %v9977_v5  ;;  %v4788_v3 = vsel %vm4786_vm1, %v4787_v18, %v7374_v2  ;;  %v4873_v48 = vcvt.s32.f32 %v4866_v56 }
 0x2ab   : > { %v4870_v29 = vor.u32 4788187, %v4869_v34  ;;  %v5102_v30 = vsel %vm5100_vm5, %v4787_v18, %v7374_v2  ;;  %v4785_v38 = vsel %vm4783_vm3, %v7372_v43, %v4784_v47  ;;  %v5099_v20 = vsel %vm5097_vm6, %v7372_v43, %v4784_v47 }
 0x2ac   : > { %v9989_v36 = vmul.u32.u64.low %v9912_v14, %v5258_v32  ;;  %v9990_v26 = vmul.u32.u64.high %v9912_v14, %v5258_v32, %v9989_v36  ;;  %v4789_v63 = vsel %vm4782_vm7, %v4785_v38, %v4788_v3  ;;  %v5103_v52 = vsel %vm5096_vm8, %v5099_v20, %v5102_v30 }
 0x2ad   : > { %v4871_v42 = vand.u32 2147483647, %v4870_v29  ;;  %v5329_v15 = vadd.s32 1, %v7071_v10  ;;  %v4790_v9 = vsel %vm4779_vm10, nan, %v4789_v63  ;;  %v4884_v17 = vadd.s32 3, %v4880_v59 }
 0x2ae   : > { %v5104_v54 = vsel %vm4779_vm10, nan, %v5103_v52  ;;  %7050 = vst [vmem:[%s7504_s26 + $0x170] sm:$0xff] %v4790_v9  ;;  %v5270_v16 = vmul.u32 %v9912_v14, %v5254_v12  ;;  %vm5272_vm14 = vc.u32 %v9978_v61, %v9989_v36  ;;  %v5273_v40 = vadd.s32 1, %v9990_v26 }
 0x2af   : > { %v4874_v8 = vmul.f32 %v4873_v48, %v4871_v42  ;;  %7065 = vst [vmem:[%s7504_s26 + $0x188] sm:$0xff] %v5104_v54  ;;  %vm5330_vm15 = vcmp.gt.s32.totalorder %v5329_v15, 0  ;;  %v5326_v19 = vand.u32 8388607, %v5319_v21  ;;  %v10013_v51 = vmul.f32 256.0, %v10010_v24 }
 0x2b0   : > { %v5331_v11 = vsel %vm5330_vm15, %v5329_v15, 0  ;;  %v10015_v55 = vand.u32 3, %v4884_v17  ;;  %v10017_v14 = vand.u32 3, %v4880_v59  ;;  %v5274_v6 = vsel %vm5272_vm14, %v5273_v40, %v9990_v26 }
 0x2b1   : > { %v4875_v27 = vxor.u32 2147483648, %v4874_v8  ;;  %v5333_v60 = vand.u32 31, %v5331_v11  ;;  %v10020_v28 = vshrl.u32 %v5331_v11, 5  ;;  %v5275_v45 = vadd.s32 %v5274_v6, %v5270_v16 }
 0x2b2   : > { %v5327_v43 = vor.u32 8388608, %v5326_v19  ;;  %vm5199_vm0 = vcmp.lt.s32.totalorder %v10017_v14, 2  ;;  %vm4883_vm1 = vweird.f32 %v9707_v44  ;;  %vm5200_vm7 = vcmp.eq.s32.totalorder %v10017_v14, 0 }
 0x2b3   : > { %v4876_v62 = vsel %vm4793_vm2, %v4875_v27, %v4874_v8  ;;  %v5334_v25 = vsub.s32 32, %v5333_v60  ;;  %v5336_v53 = vshll.u32 %v7439_v33, %v5333_v60  ;;  %v5339_v13 = vshll.u32 %v7440_v35, %v5333_v60 }
 0x2b4   : > { %v4879_v7 = vsel %vm9924_vm4, %v9707_v44, %v4876_v62  ;;  %v5342_v57 = vshll.u32 %v7441_v37, %v5333_v60  ;;  %v5345_v23 = vshll.u32 %v7442_v39, %v5333_v60  ;;  %v5276_v1 = vadd.s32 536870912, %v5275_v45 }
 0x2b5   : > { %7375 = vcosq.f32 %v4879_v7  ;;  %v5337_v59 = vshrl.u32 %v7440_v35, %v5334_v25  ;;  %v5340_v32 = vshrl.u32 %v7441_v37, %v5334_v25  ;;  %v5343_v31 = vshrl.u32 %v7442_v39, %v5334_v25 }
 0x2b6   : > { %7377 = vsinq.f32 %v4879_v7  ;;  %v5346_v10 = vshrl.u32 %v7443_v41, %v5334_v25  ;;  %v5277_v0 = vshrl.u32 %v5276_v1, 30  ;;  %v5348_v18 = vshll.u32 %v7443_v41, %v5333_v60 }
 0x2b7   : > { %v5338_v2 = vor.u32 %v5337_v59, %v5336_v53  ;;  %v5349_v56 = vshrl.u32 %v7444_v49, %v5334_v25  ;;  %vm5217_vm2 = vcmp.lt.s32.totalorder %v9850_v58, 0  ;;  %v5341_v34 = vor.u32 %v5340_v32, %v5339_v13 }
 0x2b8   : > { %v5344_v22 = vor.u32 %v5343_v31, %v5342_v57  ;;  %v5347_v47 = vor.u32 %v5346_v10, %v5345_v23  ;;  %vm5351_vm4 = vcmp.lt.s32.totalorder %v10020_v28, 1  ;;  %v5278_v12 = vshll.u32 %v5277_v0, 30 }
 0x2b9   : > { %v5335_v5 = vshrl.u32 %v7439_v33, %v5334_v25  ;;  %v5350_v3 = vor.u32 %v5349_v56, %v5348_v18  ;;  %v10041_v29 = vshll.u32 %v5327_v43, 8  ;;  %vm5352_vm5 = vcmp.lt.s32.totalorder %v10020_v28, 2 }
 0x2ba   : > { %vm5353_vm3 = vcmp.lt.s32.totalorder %v10020_v28, 3  ;;  %vm5354_vm6 = vcmp.lt.s32.totalorder %v10020_v28, 4  ;;  %v5359_v48 = vsel %vm5351_vm4, %v5338_v2, %v5341_v34  ;;  %v10050_v30 = vsub.s32 %v5275_v45, %v5278_v12 }
 0x2bb   : > { %v5360_v38 = vsel %vm5354_vm6, %v5347_v47, 920167782  ;;  %v5426_v20 = vand.u32 2139095040, %v10013_v51  ;;  %vm4890_vm8 = vcmp.eq.s32.totalorder %v10015_v55, 2  ;;  %vm5203_vm10 = vcmp.eq.s32.totalorder %v10017_v14, 2 }
 0x2bc   : > { %v5356_v26 = vsel %vm5354_vm6, %v5344_v22, 2102212464  ;;  %v5361_v63 = vsel %vm5353_vm3, %v5344_v22, %v5360_v38  ;;  %v5281_v42 = vsub.s32 0, %v10050_v30  ;;  %v5301_v52 = vsub.s32 4, %v5277_v0 }
 0x2bd   : > { %v5355_v15 = vsel %vm5351_vm4, %v5335_v5, %v5338_v2  ;;  %v5362_v9 = vsel %vm5352_vm5, %v5359_v48, %v5361_v63  ;;  %v5363_v17 = vsel %vm5351_vm4, %v5341_v34, %v5344_v22  ;;  %v5364_v54 = vsel %vm5354_vm6, %v5350_v3, 1326507024 }
 0x2be   : > { %v10065_v8 = vmul.u32.u64.low %v10041_v29, %v5362_v9  ;;  %v10066_v16 = vmul.u32.u64.high %v10041_v29, %v5362_v9, %v10065_v8  ;;  %v7068_v11 = vmin.u32 %v5281_v42, %v10050_v30  ;;  %v5357_v27 = vsel %vm5353_vm3, %v5341_v34, %v5356_v26 }
 0x2bf   : > { %v7376_v40 = vpop.eup %7375  ;;  %v5365_v19 = vsel %vm5353_vm3, %v5347_v47, %v5364_v54  ;;  %v5427_v60 = vshrl.u32 %v5426_v20, 23  ;;  %vm4886_vm9 = vcmp.lt.s32.totalorder %v10015_v55, 2  ;;  %vm4887_vm11 = vcmp.eq.s32.totalorder %v10015_v55, 0 }
 0x2c0   : > { %v7378_v6 = vpop.eup %7377  ;;  %v4891_v62 = vxor.u32 2147483648, %v7376_v40  ;;  %v5271_v45 = vadd.s32 %v9989_v36, %v9978_v61  ;;  %v5283_v53 = vclz %v7068_v11  ;;  %v5302_v7 = vsel %vm5217_vm2, %v5301_v52, %v5277_v0 }
 0x2c1   : > { %v4888_v25 = vxor.u32 2147483648, %v7378_v6  ;;  %v5366_v13 = vsel %vm5352_vm5, %v5363_v17, %v5365_v19  ;;  %v5358_v1 = vsel %vm5352_vm5, %v5355_v15, %v5357_v27  ;;  %v5377_v61 = vadd.s32 1, %v10066_v16 }
 0x2c2   : > { %v4892_v57 = vsel %vm4890_vm8, %v4891_v62, %v7378_v6  ;;  %v5205_v23 = vsel %vm5203_vm10, %v4891_v62, %v7378_v6  ;;  %v7069_v59 = vadd.s32 4294967294, %v5283_v53  ;;  %v7075_v32 = vadd.s32 4294967169, %v5427_v60 }
 0x2c3   : > { %v4889_v36 = vsel %vm4887_vm11, %v7376_v40, %v4888_v25  ;;  %v5202_v43 = vsel %vm5200_vm7, %v7376_v40, %v4888_v25  ;;  %v10096_v0 = vmul.u32.u64.low %v10041_v29, %v5366_v13  ;;  %v10097_v2 = vmul.u32.u64.high %v10041_v29, %v5366_v13, %v10096_v0 }
 0x2c4   : > { %v4893_v31 = vsel %vm4886_vm9, %v4889_v36, %v4892_v57  ;;  %v5206_v10 = vsel %vm5199_vm0, %v5202_v43, %v5205_v23  ;;  %vm7070_vm12 = vcmp.lt.s32.totalorder %v7069_v59, 0  ;;  %v5433_v56 = vadd.s32 1, %v7075_v32 }
 0x2c5   : > { %v4894_v28 = vsel %vm4883_vm1, nan, %v4893_v31  ;;  %v5207_v18 = vsel %vm4883_vm1, nan, %v5206_v10  ;;  %vm10107_vm13 = vcmp.le.f32.partialorder %v5215_v46, 0.7853982  ;;  %v5286_v14 = vsel %vm7070_vm12, 0, %v7069_v59 }
 0x2c6   : > { %7051 = vst [vmem:[%s7504_s26 + $0x178] sm:$0xff] %v4894_v28  ;;  %7066 = vst [vmem:[%s7504_s26 + $0x190] sm:$0xff] %v5207_v18  ;;  %v5374_v34 = vmul.u32 %v10041_v29, %v5358_v1  ;;  %v5423_v22 = vand.u32 2147483647, %v10013_v51  ;;  %v5287_v47 = vsub.s32 32, %v5286_v14  ;;  %v5288_v12 = vshll.u32 %v10050_v30, %v5286_v14 }
 0x2c7   : > { %v5291_v44 = vsub.s32 4294967266, %v5286_v14  ;;  %vm5434_vm14 = vcmp.gt.s32.totalorder %v5433_v56, 0  ;;  %v10116_v5 = vsel %vm10107_vm13, 0, %v5302_v7  ;;  %vm5376_vm15 = vc.u32 %v10097_v2, %v10065_v8 }
 0x2c8   : > { %v5435_v46 = vsel %vm5434_vm14, %v5433_v56, 0  ;;  %v5289_v3 = vshrl.u32 %v5271_v45, %v5287_v47  ;;  %v5378_v38 = vsel %vm5376_vm15, %v5377_v61, %v10066_v16  ;;  %v5308_v30 = vadd.s32 3, %v10116_v5 }
 0x2c9   : > { %v5292_v48 = vadd.s32 127, %v5291_v44  ;;  %v5379_v29 = vadd.s32 %v5378_v38, %v5374_v34  ;;  %v5437_v20 = vand.u32 31, %v5435_v46  ;;  %v5430_v42 = vand.u32 8388607, %v5423_v22 }
 0x2ca   : > { %v5290_v26 = vor.u32 %v5289_v3, %v5288_v12  ;;  %v5436_v15 = vshrl.u32 %v5435_v46, 5  ;;  %v10137_v10 = vand.u32 3, %v5308_v30  ;;  %vm5321_vm0 = vcmp.lt.s32.totalorder %v9884_v4, 0 }
 0x2cb   : > { %v5293_v63 = vshll.u32 %v5292_v48, 23  ;;  %v5380_v52 = vadd.s32 536870912, %v5379_v29  ;;  %v5438_v9 = vsub.s32 32, %v5437_v20  ;;  %v5440_v17 = vshll.u32 %v7439_v33, %v5437_v20 }
 0x2cc   : > { %v5297_v40 = vcvt.s32.f32 %v5290_v26  ;;  %v5443_v11 = vshll.u32 %v7440_v35, %v5437_v20  ;;  %v5449_v16 = vshll.u32 %v7442_v39, %v5437_v20  ;;  %v5446_v6 = vshll.u32 %v7441_v37, %v5437_v20 }
 0x2cd   : > { %v5294_v54 = vor.u32 4788187, %v5293_v63  ;;  %v5381_v27 = vshrl.u32 %v5380_v52, 30  ;;  %v5441_v19 = vshrl.u32 %v7440_v35, %v5438_v9  ;;  %v5444_v60 = vshrl.u32 %v7441_v37, %v5438_v9  ;;  %v7414_v52 = vld [vmem:[%s7504_s26] sm:$0xff] }
 0x2ce   : > { %v5447_v45 = vshrl.u32 %v7442_v39, %v5438_v9  ;;  %v5450_v25 = vshrl.u32 %v7443_v41, %v5438_v9  ;;  %v5452_v53 = vshll.u32 %v7443_v41, %v5437_v20  ;;  %v5431_v13 = vor.u32 8388608, %v5430_v42 }
 0x2cf   : > { %v5295_v62 = vand.u32 2147483647, %v5294_v54  ;;  %v5382_v7 = vshll.u32 %v5381_v27, 30  ;;  %v5439_v57 = vshrl.u32 %v7439_v33, %v5438_v9  ;;  %v5442_v1 = vor.u32 %v5441_v19, %v5440_v17 }
 0x2d0   : > { %v5451_v61 = vor.u32 %v5450_v25, %v5449_v16  ;;  %v5453_v36 = vshrl.u32 %v7444_v49, %v5438_v9  ;;  %v5445_v59 = vor.u32 %v5444_v60, %v5443_v11  ;;  %v5448_v32 = vor.u32 %v5447_v45, %v5446_v6 }
 0x2d1   : > { %v5298_v23 = vmul.f32 %v5297_v40, %v5295_v62  ;;  %v10135_v43 = vsub.s32 %v5379_v29, %v5382_v7  ;;  %vm5458_vm4 = vcmp.lt.s32.totalorder %v5436_v15, 4  ;;  %vm5455_vm1 = vcmp.lt.s32.totalorder %v5436_v15, 1 }
 0x2d2   : > { %v5454_v0 = vor.u32 %v5453_v36, %v5452_v53  ;;  %vm5457_vm5 = vcmp.lt.s32.totalorder %v5436_v15, 3  ;;  %v5460_v18 = vsel %vm5458_vm4, %v5448_v32, 2102212464  ;;  %v5471_v56 = vshll.u32 %v5431_v13, 8 }
 0x2d3   : > { %v5299_v31 = vxor.u32 2147483648, %v5298_v23  ;;  %v5385_v28 = vsub.s32 0, %v10135_v43  ;;  %vm5456_vm3 = vcmp.lt.s32.totalorder %v5436_v15, 2  ;;  %v5459_v34 = vsel %vm5455_vm1, %v5439_v57, %v5442_v1 }
 0x2d4   : > { %v5464_v47 = vsel %vm5458_vm4, %v5451_v61, 920167782  ;;  %v5461_v46 = vsel %vm5457_vm5, %v5445_v59, %v5460_v18  ;;  %v5463_v3 = vsel %vm5455_vm1, %v5442_v1, %v5445_v59  ;;  %v5467_v38 = vsel %vm5455_vm1, %v5445_v59, %v5448_v32 }
 0x2d5   : > { %v5300_v14 = vsel %vm5217_vm2, %v5299_v31, %v5298_v23  ;;  %v7072_v44 = vmin.u32 %v5385_v28, %v10135_v43  ;;  %v5465_v48 = vsel %vm5457_vm5, %v5448_v32, %v5464_v47  ;;  %v5468_v29 = vsel %vm5458_vm4, %v5454_v0, 1326507024 }
 0x2d6   : > { %v5303_v12 = vsel %vm10107_vm13, %v9850_v58, %v5300_v14  ;;  %vm10154_vm2 = vcmp.le.f32.partialorder %v5319_v21, 0.7853982  ;;  %v5405_v26 = vsub.s32 4, %v5381_v27  ;;  %v5462_v63 = vsel %vm5456_vm3, %v5459_v34, %v5461_v46 }
 0x2d7   : > { %7379 = vcosq.f32 %v5303_v12  ;;  %v5387_v55 = vclz %v7072_v44  ;;  %v5466_v30 = vsel %vm5456_vm3, %v5463_v3, %v5465_v48  ;;  %v5469_v42 = vsel %vm5457_vm5, %v5451_v61, %v5468_v29 }
 0x2d8   : > { %7381 = vsinq.f32 %v5303_v12  ;;  %v10162_v9 = vmul.f32 512.0, %v7414_v52  ;;  %v5470_v54 = vsel %vm5456_vm3, %v5467_v38, %v5469_v42  ;;  %vm5310_vm6 = vcmp.lt.s32.totalorder %v10137_v10, 2 }
 0x2d9   : > { %v7073_v17 = vadd.s32 4294967294, %v5387_v55  ;;  %v10165_v40 = vmul.u32.u64.low %v5471_v56, %v5466_v30  ;;  %v10166_v11 = vmul.u32.u64.high %v5471_v56, %v5466_v30, %v10165_v40  ;;  %v5624_v19 = vand.u32 3, %v10116_v5 }
 0x2da   : > { %v10170_v21 = vmul.u32.u64.low %v5471_v56, %v5470_v54  ;;  %v10171_v16 = vmul.u32.u64.high %v5471_v56, %v5470_v54, %v10170_v21  ;;  %vm5307_vm7 = vweird.f32 %v9850_v58  ;;  %vm5311_vm8 = vcmp.eq.s32.totalorder %v10137_v10, 0 }
 0x2db   : > { %v5375_v60 = vadd.s32 %v10065_v8, %v10097_v2  ;;  %vm7074_vm10 = vcmp.lt.s32.totalorder %v7073_v17, 0  ;;  %v5406_v15 = vsel %vm5321_vm0, %v5405_v26, %v5381_v27  ;;  %vm5314_vm9 = vcmp.eq.s32.totalorder %v10137_v10, 2 }
 0x2dc   : > { %v5390_v6 = vsel %vm7074_vm10, 0, %v7073_v17  ;;  %v5478_v62 = vmul.u32 %v5471_v56, %v5462_v63  ;;  %v5850_v45 = vand.u32 2139095040, %v10162_v9  ;;  %v5481_v7 = vadd.s32 1, %v10166_v11 }
 0x2dd   : > { %v5391_v25 = vsub.s32 32, %v5390_v6  ;;  %v5392_v5 = vshll.u32 %v10135_v43, %v5390_v6  ;;  %v5395_v53 = vsub.s32 4294967266, %v5390_v6  ;;  %v5408_v13 = vsel %vm10154_vm2, 0, %v5406_v15 }
 0x2de   : > { %vm5480_vm11 = vc.u32 %v10171_v16, %v10165_v40  ;;  %vm5625_vm12 = vcmp.lt.s32.totalorder %v5624_v19, 2  ;;  %v5851_v8 = vshrl.u32 %v5850_v45, 23  ;;  %vm5626_vm13 = vcmp.eq.s32.totalorder %v5624_v19, 0 }
 0x2df   : > { %v5393_v2 = vshrl.u32 %v5375_v60, %v5391_v25  ;;  %v5396_v27 = vadd.s32 127, %v5395_v53  ;;  %v5482_v57 = vsel %vm5480_vm11, %v5481_v7, %v10166_v11  ;;  %vm5629_vm14 = vcmp.eq.s32.totalorder %v5624_v19, 2 }
 0x2e0   : > { %v5483_v1 = vadd.s32 %v5482_v57, %v5478_v62  ;;  %v7097_v61 = vadd.s32 4294967169, %v5851_v8  ;;  %v10190_v36 = vmul.f32 512.0, %v9881_v50  ;;  %v5412_v0 = vadd.s32 3, %v5408_v13 }
 0x2e1   : > { %v7380_v23 = vpop.eup %7379  ;;  %v5394_v32 = vor.u32 %v5393_v2, %v5392_v5  ;;  %v5397_v31 = vshll.u32 %v5396_v27, 23  ;;  %v5847_v56 = vand.u32 2147483647, %v10162_v9  ;;  %v10217_v60 = vand.u32 3, %v5408_v13 }
 0x2e2   : > { %v7382_v43 = vpop.eup %7381  ;;  %v5315_v59 = vxor.u32 2147483648, %v7380_v23  ;;  %v5484_v18 = vadd.s32 536870912, %v5483_v1  ;;  %v5857_v14 = vadd.s32 1, %v7097_v61  ;;  %v10214_v11 = vand.u32 3, %v5412_v0 }
 0x2e3   : > { %v5312_v28 = vxor.u32 2147483648, %v7382_v43  ;;  %v5398_v47 = vor.u32 4788187, %v5397_v31  ;;  %v5401_v12 = vcvt.s32.f32 %v5394_v32  ;;  %v5854_v42 = vand.u32 8388607, %v5847_v56 }
 0x2e4   : > { %v5316_v34 = vsel %vm5314_vm9, %v5315_v59, %v7382_v43  ;;  %v5631_v44 = vsel %vm5629_vm14, %v5315_v59, %v7382_v43  ;;  %v10197_v46 = vshrl.u32 %v5484_v18, 30  ;;  %vm5858_vm15 = vcmp.gt.s32.totalorder %v5857_v14, 0 }
 0x2e5   : > { %v5313_v50 = vsel %vm5311_vm8, %v7380_v23, %v5312_v28  ;;  %v5628_v3 = vsel %vm5626_vm13, %v7380_v23, %v5312_v28  ;;  %v5399_v38 = vand.u32 2147483647, %v5398_v47  ;;  %v5859_v55 = vsel %vm5858_vm15, %v5857_v14, 0 }
 0x2e6   : > { %v5317_v48 = vsel %vm5310_vm6, %v5313_v50, %v5316_v34  ;;  %v5632_v29 = vsel %vm5625_vm12, %v5628_v3, %v5631_v44  ;;  %v5486_v63 = vshll.u32 %v10197_v46, 30  ;;  %v5861_v10 = vand.u32 31, %v5859_v55 }
 0x2e7   : > { %v5318_v26 = vsel %vm5307_vm7, nan, %v5317_v48  ;;  %v5633_v30 = vsel %vm5307_vm7, nan, %v5632_v29  ;;  %v5402_v52 = vmul.f32 %v5401_v12, %v5399_v38  ;;  %v5855_v15 = vor.u32 8388608, %v5854_v42 }
 0x2e8   : > { %7079 = vst [vmem:[%s7504_s26 + $0x198] sm:$0xff] %v5318_v26  ;;  %7094 = vst [vmem:[%s7504_s26 + $0x1b0] sm:$0xff] %v5633_v30  ;;  %v10212_v17 = vsub.s32 %v5483_v1, %v5486_v63  ;;  %v5862_v21 = vsub.s32 32, %v5861_v10  ;;  %v5954_v58 = vand.u32 2139095040, %v10190_v36  ;;  %v5864_v62 = vshll.u32 %v7439_v33, %v5861_v10 }
 0x2e9   : > { %v5403_v54 = vxor.u32 2147483648, %v5402_v52  ;;  %v5951_v25 = vand.u32 2147483647, %v10190_v36  ;;  %v5479_v53 = vadd.s32 %v10165_v40, %v10171_v16  ;;  %v5509_v13 = vsub.s32 4, %v10197_v46 }
 0x2ea   : > { %v5489_v19 = vsub.s32 0, %v10212_v17  ;;  %v5865_v45 = vshrl.u32 %v7440_v35, %v5862_v21  ;;  %v5860_v8 = vshrl.u32 %v5859_v55, 5  ;;  %v5867_v2 = vshll.u32 %v7440_v35, %v5861_v10 }
 0x2eb   : > { %v5404_v6 = vsel %vm5321_vm0, %v5403_v54, %v5402_v52  ;;  %v5868_v27 = vshrl.u32 %v7441_v37, %v5862_v21  ;;  %vm5425_vm4 = vcmp.lt.s32.totalorder %v10013_v51, 0  ;;  %v10235_v23 = vshll.u32 %v5855_v15, 8 }
 0x2ec   : > { %v5407_v5 = vsel %vm10154_vm2, %v9884_v4, %v5404_v6  ;;  %v7076_v7 = vmin.u32 %v5489_v19, %v10212_v17  ;;  %v5955_v20 = vshrl.u32 %v5954_v58, 23  ;;  %vm5418_vm0 = vcmp.eq.s32.totalorder %v10214_v11, 2 }
 0x2ed   : > { %7383 = vcosq.f32 %v5407_v5  ;;  %vm5732_vm1 = vcmp.eq.s32.totalorder %v10217_v60, 2  ;;  %v5863_v40 = vshrl.u32 %v7439_v33, %v5862_v21  ;;  %v5866_v16 = vor.u32 %v5865_v45, %v5864_v62 }
 0x2ee   : > { %7385 = vsinq.f32 %v5407_v5  ;;  %v5491_v57 = vclz %v7076_v7  ;;  %v5870_v1 = vshll.u32 %v7441_v37, %v5861_v10  ;;  %v5871_v61 = vshrl.u32 %v7442_v39, %v5862_v21 }
 0x2ef   : > { %vm5415_vm5 = vcmp.eq.s32.totalorder %v10214_v11, 0  ;;  %vm5729_vm3 = vcmp.eq.s32.totalorder %v10217_v60, 0  ;;  %v5873_v59 = vshll.u32 %v7442_v39, %v5861_v10  ;;  %v5874_v32 = vshrl.u32 %v7443_v41, %v5862_v21 }
 0x2f0   : > { %v7077_v43 = vadd.s32 4294967294, %v5491_v57  ;;  %v5876_v31 = vshll.u32 %v7443_v41, %v5861_v10  ;;  %vm5414_vm2 = vcmp.lt.s32.totalorder %v10214_v11, 2  ;;  %vm5728_vm6 = vcmp.lt.s32.totalorder %v10217_v60, 2 }
 0x2f1   : > { %v5869_v0 = vor.u32 %v5868_v27, %v5867_v2  ;;  %v5872_v28 = vor.u32 %v5871_v61, %v5870_v1  ;;  %v5877_v18 = vshrl.u32 %v7444_v49, %v5862_v21  ;;  %vm5879_vm7 = vcmp.lt.s32.totalorder %v5860_v8, 1 }
 0x2f2   : > { %vm5411_vm8 = vweird.f32 %v9884_v4  ;;  %vm7078_vm10 = vcmp.lt.s32.totalorder %v7077_v43, 0  ;;  %v5875_v14 = vor.u32 %v5874_v32, %v5873_v59  ;;  %vm5880_vm9 = vcmp.lt.s32.totalorder %v5860_v8, 2 }
 0x2f3   : > { %vm5882_vm11 = vcmp.lt.s32.totalorder %v5860_v8, 4  ;;  %v5494_v34 = vsel %vm7078_vm10, 0, %v7077_v43  ;;  %v5878_v47 = vor.u32 %v5877_v18, %v5876_v31  ;;  %vm5881_vm12 = vcmp.lt.s32.totalorder %v5860_v8, 3 }
 0x2f4   : > { %v5884_v12 = vsel %vm5882_vm11, %v5872_v28, 2102212464  ;;  %vm10254_vm13 = vcmp.le.f32.partialorder %v5423_v22, 0.7853982  ;;  %v5495_v50 = vsub.s32 32, %v5494_v34  ;;  %v5496_v3 = vshll.u32 %v10212_v17, %v5494_v34 }
 0x2f5   : > { %v5499_v48 = vsub.s32 4294967266, %v5494_v34  ;;  %v5883_v38 = vsel %vm5879_vm7, %v5863_v40, %v5866_v16  ;;  %v5885_v29 = vsel %vm5881_vm12, %v5869_v0, %v5884_v12  ;;  %v5887_v55 = vsel %vm5879_vm7, %v5866_v16, %v5869_v0 }
 0x2f6   : > { %v5888_v26 = vsel %vm5882_vm11, %v5875_v14, 920167782  ;;  %v5891_v63 = vsel %vm5879_vm7, %v5869_v0, %v5872_v28  ;;  %v5497_v30 = vshrl.u32 %v5479_v53, %v5495_v50  ;;  %v5892_v52 = vsel %vm5882_vm11, %v5878_v47, 1326507024 }
 0x2f7   : > { %v5500_v42 = vadd.s32 127, %v5499_v48  ;;  %v5889_v22 = vsel %vm5881_vm12, %v5872_v28, %v5888_v26  ;;  %v7384_v10 = vpop.eup %7383  ;;  %v5510_v17 = vsel %vm5425_vm4, %v5509_v13, %v10197_v46  ;;  %v5893_v21 = vsel %vm5881_vm12, %v5875_v14, %v5892_v52 }
 0x2f8   : > { %v5890_v54 = vsel %vm5880_vm9, %v5887_v55, %v5889_v22  ;;  %v7101_v19 = vadd.s32 4294967169, %v5955_v20  ;;  %v7386_v15 = vpop.eup %7385  ;;  %v5419_v58 = vxor.u32 2147483648, %v7384_v10  ;;  %v5498_v6 = vor.u32 %v5497_v30, %v5496_v3 }
 0x2f9   : > { %v5501_v62 = vshll.u32 %v5500_v42, 23  ;;  %v5894_v45 = vsel %vm5880_vm9, %v5891_v63, %v5893_v21  ;;  %v5416_v5 = vxor.u32 2147483648, %v7386_v15  ;;  %v5886_v53 = vsel %vm5880_vm9, %v5883_v38, %v5885_v29 }
 0x2fa   : > { %v10274_v7 = vmul.u32.u64.low %v10235_v23, %v5894_v45  ;;  %v10275_v2 = vmul.u32.u64.high %v10235_v23, %v5894_v45, %v10274_v7  ;;  %v5420_v46 = vsel %vm5418_vm0, %v5419_v58, %v7386_v15  ;;  %v5505_v27 = vcvt.s32.f32 %v5498_v6 }
 0x2fb   : > { %v5502_v13 = vor.u32 4788187, %v5501_v62  ;;  %v5734_v57 = vsel %vm5732_vm1, %v5419_v58, %v7386_v15  ;;  %v5417_v20 = vsel %vm5415_vm5, %v7384_v10, %v5416_v5  ;;  %v5731_v8 = vsel %vm5729_vm3, %v7384_v10, %v5416_v5 }
 0x2fc   : > { %v10286_v40 = vmul.u32.u64.low %v10235_v23, %v5890_v54  ;;  %v10287_v16 = vmul.u32.u64.high %v10235_v23, %v5890_v54, %v10286_v40  ;;  %v5421_v1 = vsel %vm5414_vm2, %v5417_v20, %v5420_v46  ;;  %v5735_v43 = vsel %vm5728_vm6, %v5731_v8, %v5734_v57 }
 0x2fd   : > { %v5503_v61 = vand.u32 2147483647, %v5502_v13  ;;  %v5961_v59 = vadd.s32 1, %v7101_v19  ;;  %v5422_v32 = vsel %vm5411_vm8, nan, %v5421_v1  ;;  %v5512_v31 = vsel %vm10254_vm13, 0, %v5510_v17 }
 0x2fe   : > { %v5736_v0 = vsel %vm5411_vm8, nan, %v5735_v43  ;;  %v5958_v28 = vand.u32 8388607, %v5951_v25  ;;  %7080 = vst [vmem:[%s7504_s26 + $0x1a0] sm:$0xff] %v5422_v32  ;;  %v5902_v18 = vmul.u32 %v10235_v23, %v5886_v53  ;;  %vm5904_vm14 = vc.u32 %v10275_v2, %v10286_v40 }
 0x2ff   : > { %v5506_v11 = vmul.f32 %v5505_v27, %v5503_v61  ;;  %7095 = vst [vmem:[%s7504_s26 + $0x1b8] sm:$0xff] %v5736_v0  ;;  %vm5962_vm15 = vcmp.gt.s32.totalorder %v5961_v59, 0  ;;  %v5905_v60 = vadd.s32 1, %v10287_v16  ;;  %v5516_v47 = vadd.s32 3, %v5512_v31 }
 0x300   : > { %v5963_v14 = vsel %vm5962_vm15, %v5961_v59, 0  ;;  %v10308_v4 = vand.u32 3, %v5512_v31  ;;  %v5959_v3 = vor.u32 8388608, %v5958_v28  ;;  %v10324_v10 = vmul.f32 512.0, %v10010_v24 }
 0x301   : > { %v5507_v34 = vxor.u32 2147483648, %v5506_v11  ;;  %v5965_v12 = vand.u32 31, %v5963_v14  ;;  %v5906_v50 = vsel %vm5904_vm14, %v5905_v60, %v10287_v16  ;;  %v10311_v48 = vshrl.u32 %v5963_v14, 5 }
 0x302   : > { %v5907_v38 = vadd.s32 %v5906_v50, %v5902_v18  ;;  %v5517_v24 = vand.u32 3, %v5516_v47  ;;  %v10335_v7 = vshll.u32 %v5959_v3, 8  ;;  %vm5515_vm0 = vweird.f32 %v10013_v51 }
 0x303   : > { %v5508_v23 = vsel %vm5425_vm4, %v5507_v34, %v5506_v11  ;;  %v5966_v29 = vsub.s32 32, %v5965_v12  ;;  %v5968_v55 = vshll.u32 %v7439_v33, %v5965_v12  ;;  %v5971_v63 = vshll.u32 %v7440_v35, %v5965_v12 }
 0x304   : > { %v5511_v26 = vsel %vm10254_vm13, %v10013_v51, %v5508_v23  ;;  %v5974_v30 = vshll.u32 %v7441_v37, %v5965_v12  ;;  %v5977_v42 = vshll.u32 %v7442_v39, %v5965_v12  ;;  %v5908_v22 = vadd.s32 536870912, %v5907_v38 }
 0x305   : > { %7387 = vcosq.f32 %v5511_v26  ;;  %v5969_v52 = vshrl.u32 %v7440_v35, %v5966_v29  ;;  %v5972_v17 = vshrl.u32 %v7441_v37, %v5966_v29  ;;  %v5975_v54 = vshrl.u32 %v7442_v39, %v5966_v29 }
 0x306   : > { %7389 = vsinq.f32 %v5511_v26  ;;  %v5978_v44 = vshrl.u32 %v7443_v41, %v5966_v29  ;;  %v10329_v21 = vshrl.u32 %v5908_v22, 30  ;;  %v5980_v15 = vshll.u32 %v7443_v41, %v5965_v12 }
 0x307   : > { %v5970_v19 = vor.u32 %v5969_v52, %v5968_v55  ;;  %v5981_v58 = vshrl.u32 %v7444_v49, %v5966_v29  ;;  %v5973_v6 = vor.u32 %v5972_v17, %v5971_v63  ;;  %v5976_v62 = vor.u32 %v5975_v54, %v5974_v30 }
 0x308   : > { %v5979_v45 = vor.u32 %v5978_v44, %v5977_v42  ;;  %vm5983_vm4 = vcmp.lt.s32.totalorder %v10311_v48, 1  ;;  %v5910_v5 = vshll.u32 %v10329_v21, 30  ;;  %vm5984_vm1 = vcmp.lt.s32.totalorder %v10311_v48, 2 }
 0x309   : > { %v5982_v53 = vor.u32 %v5981_v58, %v5980_v15  ;;  %vm5985_vm5 = vcmp.lt.s32.totalorder %v10311_v48, 3  ;;  %vm5986_vm3 = vcmp.lt.s32.totalorder %v10311_v48, 4  ;;  %v5991_v46 = vsel %vm5983_vm4, %v5970_v19, %v5973_v6 }
 0x30a   : > { %vm5831_vm2 = vcmp.lt.s32.totalorder %v10308_v4, 2  ;;  %v10344_v13 = vsub.s32 %v5907_v38, %v5910_v5  ;;  %v5967_v27 = vshrl.u32 %v7439_v33, %v5966_v29  ;;  %v5992_v57 = vsel %vm5986_vm3, %v5979_v45, 920167782 }
 0x30b   : > { %vm5832_vm6 = vcmp.eq.s32.totalorder %v10308_v4, 0  ;;  %v5988_v20 = vsel %vm5986_vm3, %v5976_v62, 2102212464  ;;  %v5993_v8 = vsel %vm5985_vm5, %v5976_v62, %v5992_v57  ;;  %v6058_v16 = vand.u32 2139095040, %v10324_v10 }
 0x30c   : > { %vm5522_vm7 = vcmp.eq.s32.totalorder %v5517_v24, 2  ;;  %vm5835_vm8 = vcmp.eq.s32.totalorder %v10308_v4, 2  ;;  %v5913_v1 = vsub.s32 0, %v10344_v13  ;;  %v5994_v61 = vsel %vm5984_vm1, %v5991_v46, %v5993_v8 }
 0x30d   : > { %v5995_v43 = vsel %vm5983_vm4, %v5973_v6, %v5976_v62  ;;  %v5996_v59 = vsel %vm5986_vm3, %v5982_v53, 1326507024  ;;  %v10358_v32 = vmul.u32.u64.low %v10335_v7, %v5994_v61  ;;  %v10359_v31 = vmul.u32.u64.high %v10335_v7, %v5994_v61, %v10358_v32 }
 0x30e   : > { %v7098_v28 = vmin.u32 %v5913_v1, %v10344_v13  ;;  %v5987_v11 = vsel %vm5983_vm4, %v5967_v27, %v5970_v19  ;;  %v5989_v18 = vsel %vm5985_vm5, %v5973_v6, %v5988_v20  ;;  %v5997_v60 = vsel %vm5985_vm5, %v5979_v45, %v5996_v59 }
 0x30f   : > { %v7388_v0 = vpop.eup %7387  ;;  %vm5518_vm10 = vcmp.lt.s32.totalorder %v5517_v24, 2  ;;  %vm5519_vm9 = vcmp.eq.s32.totalorder %v5517_v24, 0  ;;  %v6059_v47 = vshrl.u32 %v6058_v16, 23  ;;  %v5903_v50 = vadd.s32 %v10286_v40, %v10275_v2 }
 0x310   : > { %v7390_v14 = vpop.eup %7389  ;;  %v5523_v34 = vxor.u32 2147483648, %v7388_v0  ;;  %v5915_v3 = vclz %v7098_v28  ;;  %v5998_v23 = vsel %vm5984_vm1, %v5995_v43, %v5997_v60  ;;  %v5990_v55 = vsel %vm5984_vm1, %v5987_v11, %v5989_v18 }
 0x311   : > { %v5520_v12 = vxor.u32 2147483648, %v7390_v14  ;;  %v6055_v26 = vand.u32 2147483647, %v10324_v10  ;;  %v7105_v30 = vadd.s32 4294967169, %v6059_v47  ;;  %v6009_v44 = vadd.s32 1, %v10359_v31 }
 0x312   : > { %v5524_v38 = vsel %vm5522_vm7, %v5523_v34, %v7390_v14  ;;  %v5837_v29 = vsel %vm5835_vm8, %v5523_v34, %v7390_v14  ;;  %v7099_v40 = vadd.s32 4294967294, %v5915_v3  ;;  %v6006_v15 = vmul.u32 %v10335_v7, %v5990_v55 }
 0x313   : > { %v5521_v63 = vsel %vm5519_vm9, %v7388_v0, %v5520_v12  ;;  %v5834_v2 = vsel %vm5832_vm6, %v7388_v0, %v5520_v12  ;;  %v10385_v52 = vmul.u32.u64.low %v10335_v7, %v5998_v23  ;;  %v10386_v17 = vmul.u32.u64.high %v10335_v7, %v5998_v23, %v10385_v52 }
 0x314   : > { %v5525_v42 = vsel %vm5518_vm10, %v5521_v63, %v5524_v38  ;;  %v5838_v22 = vsel %vm5831_vm2, %v5834_v2, %v5837_v29  ;;  %vm7100_vm11 = vcmp.lt.s32.totalorder %v7099_v40, 0  ;;  %v6065_v4 = vadd.s32 1, %v7105_v30 }
 0x315   : > { %v5526_v48 = vsel %vm5515_vm0, nan, %v5525_v42  ;;  %v5839_v54 = vsel %vm5515_vm0, nan, %v5838_v22  ;;  %v5918_v19 = vsel %vm7100_vm11, 0, %v7099_v40  ;;  %v5933_v45 = vsub.s32 4, %v10329_v21 }
 0x316   : > { %7081 = vst [vmem:[%s7504_s26 + $0x1a8] sm:$0xff] %v5526_v48  ;;  %7096 = vst [vmem:[%s7504_s26 + $0x1c0] sm:$0xff] %v5839_v54  ;;  %v5919_v58 = vsub.s32 32, %v5918_v19  ;;  %v5920_v6 = vshll.u32 %v10344_v13, %v5918_v19  ;;  %v5923_v62 = vsub.s32 4294967266, %v5918_v19  ;;  %vm6008_vm12 = vc.u32 %v10386_v17, %v10358_v32 }
 0x317   : > { %v6062_v51 = vand.u32 8388607, %v6055_v26  ;;  %vm6066_vm13 = vcmp.gt.s32.totalorder %v6065_v4, 0  ;;  %v6010_v53 = vsel %vm6008_vm12, %v6009_v44, %v10359_v31  ;;  %vm5849_vm14 = vcmp.lt.s32.totalorder %v10162_v9, 0 }
 0x318   : > { %v5921_v24 = vshrl.u32 %v5903_v50, %v5919_v58  ;;  %v5924_v5 = vadd.s32 127, %v5923_v62  ;;  %v6067_v46 = vsel %vm6066_vm13, %v6065_v4, 0  ;;  %v6011_v7 = vadd.s32 %v6010_v53, %v6006_v15 }
 0x319   : > { %v6069_v27 = vand.u32 31, %v6067_v46  ;;  %vm10406_vm15 = vcmp.le.f32.partialorder %v5847_v56, 0.7853982  ;;  %v5934_v8 = vsel %vm5849_vm14, %v5933_v45, %v10329_v21  ;;  %v6063_v1 = vor.u32 8388608, %v6062_v51 }
 0x31a   : > { %v5922_v57 = vor.u32 %v5921_v24, %v5920_v6  ;;  %v5925_v20 = vshll.u32 %v5924_v5, 23  ;;  %v6012_v16 = vadd.s32 536870912, %v6011_v7  ;;  %v6068_v61 = vshrl.u32 %v6067_v46, 5 }
 0x31b   : > { %v6070_v43 = vsub.s32 32, %v6069_v27  ;;  %v6072_v0 = vshll.u32 %v7439_v33, %v6069_v27  ;;  %v6081_v28 = vshll.u32 %v7442_v39, %v6069_v27  ;;  %v6075_v18 = vshll.u32 %v7440_v35, %v6069_v27 }
 0x31c   : > { %v5926_v59 = vor.u32 4788187, %v5925_v20  ;;  %v5929_v31 = vcvt.s32.f32 %v5922_v57  ;;  %v10415_v56 = vshrl.u32 %v6012_v16, 30  ;;  %v6078_v21 = vshll.u32 %v7441_v37, %v6069_v27 }
 0x31d   : > { %v6073_v11 = vshrl.u32 %v7440_v35, %v6070_v43  ;;  %v6076_v60 = vshrl.u32 %v7441_v37, %v6070_v43  ;;  %v6079_v34 = vshrl.u32 %v7442_v39, %v6070_v43  ;;  %v6082_v47 = vshrl.u32 %v7443_v41, %v6070_v43 }
 0x31e   : > { %v5927_v14 = vand.u32 2147483647, %v5926_v59  ;;  %v5936_v12 = vsel %vm10406_vm15, 0, %v5934_v8  ;;  %v6014_v50 = vshll.u32 %v10415_v56, 30  ;;  %v6084_v3 = vshll.u32 %v7443_v41, %v6069_v27 }
 0x31f   : > { %v6071_v38 = vshrl.u32 %v7439_v33, %v6070_v43  ;;  %v6083_v35 = vor.u32 %v6082_v47, %v6081_v28  ;;  %v6085_v29 = vshrl.u32 %v7444_v49, %v6070_v43  ;;  %v6074_v63 = vor.u32 %v6073_v11, %v6072_v0 }
 0x320   : > { %v5930_v23 = vmul.f32 %v5929_v31, %v5927_v14  ;;  %v6015_v55 = vsub.s32 %v6011_v7, %v6014_v50  ;;  %v6077_v37 = vor.u32 %v6076_v60, %v6075_v18  ;;  %v6103_v2 = vshll.u32 %v6063_v1, 8 }
 0x321   : > { %v6080_v40 = vor.u32 %v6079_v34, %v6078_v21  ;;  %vm6087_vm4 = vcmp.lt.s32.totalorder %v6068_v61, 1  ;;  %vm6088_vm0 = vcmp.lt.s32.totalorder %v6068_v61, 2  ;;  %v6086_v42 = vor.u32 %v6085_v29, %v6084_v3 }
 0x322   : > { %v5931_v39 = vxor.u32 2147483648, %v5930_v23  ;;  %v6017_v30 = vsub.s32 0, %v6015_v55  ;;  %vm6089_vm1 = vcmp.lt.s32.totalorder %v6068_v61, 3  ;;  %vm6090_vm5 = vcmp.lt.s32.totalorder %v6068_v61, 4 }
 0x323   : > { %v6091_v33 = vsel %vm6087_vm4, %v6071_v38, %v6074_v63  ;;  %v6092_v22 = vsel %vm6090_vm5, %v6080_v40, 2102212464  ;;  %v6096_v49 = vsel %vm6090_vm5, %v6083_v35, 920167782  ;;  %v6095_v44 = vsel %vm6087_vm4, %v6074_v63, %v6077_v37 }
 0x324   : > { %v5932_v41 = vsel %vm5849_vm14, %v5931_v39, %v5930_v23  ;;  %v7102_v48 = vmin.u32 %v6017_v30, %v6015_v55  ;;  %v6093_v54 = vsel %vm6089_vm1, %v6077_v37, %v6092_v22  ;;  %v5940_v19 = vadd.s32 3, %v5936_v12 }
 0x325   : > { %v5935_v52 = vsel %vm10406_vm15, %v10162_v9, %v5932_v41  ;;  %v6097_v15 = vsel %vm6089_vm1, %v6080_v40, %v6096_v49  ;;  %v6099_v58 = vsel %vm6087_vm4, %v6077_v37, %v6080_v40  ;;  %v6094_v6 = vsel %vm6088_vm0, %v6091_v33, %v6093_v54 }
 0x326   : > { %7391 = vcosq.f32 %v5935_v52  ;;  %v6019_v4 = vclz %v7102_v48  ;;  %v6098_v62 = vsel %vm6088_vm0, %v6095_v44, %v6097_v15  ;;  %v6100_v45 = vsel %vm6090_vm5, %v6086_v42, 1326507024 }
 0x327   : > { %7393 = vsinq.f32 %v5935_v52  ;;  %v6101_v24 = vsel %vm6089_vm1, %v6083_v35, %v6100_v45  ;;  %v10445_v5 = vmul.u32.u64.low %v6103_v2, %v6098_v62  ;;  %v10446_v53 = vmul.u32.u64.high %v6103_v2, %v6098_v62, %v10445_v5 }
 0x328   : > { %v7103_v51 = vadd.s32 4294967294, %v6019_v4  ;;  %v5941_v46 = vand.u32 3, %v5940_v19  ;;  %v6102_v7 = vsel %vm6088_vm0, %v6099_v58, %v6101_v24  ;;  %v6007_v27 = vadd.s32 %v10358_v32, %v10386_v17 }
 0x329   : > { %v10452_v13 = vmul.u32.u64.low %v6103_v2, %v6102_v7  ;;  %v10453_v57 = vmul.u32.u64.high %v6103_v2, %v6102_v7, %v10452_v13  ;;  %v6110_v8 = vmul.u32 %v6103_v2, %v6094_v6  ;;  %v6256_v16 = vand.u32 3, %v5936_v12 }
 0x32a   : > { %vm7104_vm3 = vcmp.lt.s32.totalorder %v7103_v51, 0  ;;  %v6113_v31 = vadd.s32 1, %v10446_v53  ;;  %vm5943_vm2 = vcmp.eq.s32.totalorder %v5941_v46, 0  ;;  %vm5946_vm7 = vcmp.eq.s32.totalorder %v5941_v46, 2 }
 0x32b   : > { %v6022_v20 = vsel %vm7104_vm3, 0, %v7103_v51  ;;  %vm6112_vm6 = vc.u32 %v10453_v57, %v10445_v5  ;;  %vm6258_vm8 = vcmp.eq.s32.totalorder %v6256_v16, 0  ;;  %vm6261_vm10 = vcmp.eq.s32.totalorder %v6256_v16, 2 }
 0x32c   : > { %v6023_v1 = vsub.s32 32, %v6022_v20  ;;  %v6024_v43 = vshll.u32 %v6015_v55, %v6022_v20  ;;  %v6027_v59 = vsub.s32 4294967266, %v6022_v20  ;;  %v6114_v32 = vsel %vm6112_vm6, %v6113_v31, %v10446_v53 }
 0x32d   : > { %v6115_v14 = vadd.s32 %v6114_v32, %v6110_v8  ;;  %vm5939_vm9 = vweird.f32 %v10162_v9  ;;  %vm5942_vm11 = vcmp.lt.s32.totalorder %v5941_v46, 2  ;;  %vm6257_vm12 = vcmp.lt.s32.totalorder %v6256_v16, 2 }
 0x32e   : > { %v6025_v0 = vshrl.u32 %v6007_v27, %v6023_v1  ;;  %v6028_v28 = vadd.s32 127, %v6027_v59  ;;  %v6037_v23 = vsub.s32 4, %v10415_v56  ;;  %vm5953_vm13 = vcmp.lt.s32.totalorder %v10190_v36, 0 }
 0x32f   : > { %v6116_v50 = vadd.s32 536870912, %v6115_v14  ;;  %vm5952_vm14 = vcmp.le.f32.partialorder %v5951_v25, 0.7853982  ;;  %v6111_v4 = vadd.s32 %v10445_v5, %v10453_v57  ;;  %vm6043_vm6 = vweird.f32 %v10190_v36 }
 0x330   : > { %v7392_v61 = vpop.eup %7391  ;;  %v6026_v18 = vor.u32 %v6025_v0, %v6024_v43  ;;  %v6029_v60 = vshll.u32 %v6028_v28, 23  ;;  %v6038_v41 = vsel %vm5953_vm13, %v6037_v23, %v10415_v56 }
 0x331   : > { %v7394_v17 = vpop.eup %7393  ;;  %v5947_v11 = vxor.u32 2147483648, %v7392_v61  ;;  %v10464_v63 = vshrl.u32 %v6116_v50, 30  ;;  %v6040_v9 = vsel %vm5952_vm14, 0, %v6038_v41  ;;  %v6648_v41 = vld [vmem:[%s7504_s26 + $0x30] sm:$0xff] (%p7485_p5) }
 0x332   : > { %v5944_v21 = vxor.u32 2147483648, %v7394_v17  ;;  %v6030_v47 = vor.u32 4788187, %v6029_v60  ;;  %v6033_v12 = vcvt.s32.f32 %v6026_v18  ;;  %v6044_v54 = vadd.s32 3, %v6040_v9  ;;  %6649 = vst [vmem:[%s10502_s30 + $0x90] sm:$0xff] (%p7485_p5), %v6648_v41 }
 0x333   : > { %v5948_v34 = vsel %vm5946_vm7, %v5947_v11, %v7394_v17  ;;  %v6263_v35 = vsel %vm6261_vm10, %v5947_v11, %v7394_v17  ;;  %v6118_v30 = vshll.u32 %v10464_v63, 30  ;;  %v6359_v25 = vand.u32 3, %v6040_v9  ;;  %v6658_v9 = vld [vmem:[%s7504_s26 + $0x58] sm:$0xff] (%p7485_p5) }
 0x334   : > { %v5945_v3 = vsel %vm5943_vm2, %v7392_v61, %v5944_v21  ;;  %v6260_v38 = vsel %vm6258_vm8, %v7392_v61, %v5944_v21  ;;  %v6031_v55 = vand.u32 2147483647, %v6030_v47  ;;  %v6045_v15 = vand.u32 3, %v6044_v54  ;;  %6659 = vst [vmem:[%s10502_s30 + $0x108] sm:$0xff] (%p7485_p5), %v6658_v9  ;;  %v6662_v54 = vld [vmem:[%s7504_s26 + $0x68] sm:$0xff] (%p7485_p5) }
 0x335   : > { %v5949_v29 = vsel %vm5942_vm11, %v5945_v3, %v5948_v34  ;;  %v6264_v37 = vsel %vm6257_vm12, %v6260_v38, %v6263_v35  ;;  %v6119_v33 = vsub.s32 %v6115_v14, %v6118_v30  ;;  %vm6364_vm0 = vcmp.eq.s32.totalorder %v6359_v25, 2  ;;  %v6644_v30 = vld [vmem:[%s7504_s26 + $0x20] sm:$0xff] (%p7485_p5)  ;;  %6663 = vst [vmem:[%s10502_s30 + $0x138] sm:$0xff] (%p7485_p5), %v6662_v54 }
 0x336   : > { %v5950_v2 = vsel %vm5939_vm9, nan, %v5949_v29  ;;  %v6265_v39 = vsel %vm5939_vm9, nan, %v6264_v37  ;;  %v6034_v40 = vmul.f32 %v6033_v12, %v6031_v55  ;;  %vm6050_vm4 = vcmp.eq.s32.totalorder %v6045_v15, 2  ;;  %6645 = vst [vmem:[%s10502_s30 + $0x60] sm:$0xff] (%p7485_p5), %v6644_v30 }
 0x337   : > { %7109 = vst [vmem:[%s7504_s26 + $0x1c8] sm:$0xff] %v5950_v2  ;;  %7124 = vst [vmem:[%s7504_s26 + $0x1e0] sm:$0xff] %v6265_v39  ;;  %v6121_v49 = vsub.s32 0, %v6119_v33  ;;  %vm6046_vm1 = vcmp.lt.s32.totalorder %v6045_v15, 2  ;;  %vm6047_vm5 = vcmp.eq.s32.totalorder %v6045_v15, 0  ;;  %vm6361_vm3 = vcmp.eq.s32.totalorder %v6359_v25, 0 }
 0x338   : > { %v6035_v42 = vxor.u32 2147483648, %v6034_v40  ;;  %vm6360_vm2 = vcmp.lt.s32.totalorder %v6359_v25, 2  ;;  %v6141_v28 = vsub.s32 4, %v10464_v63  ;;  %vm6057_vm7 = vcmp.lt.s32.totalorder %v10324_v10, 0  ;;  %v6638_v2 = vld [vmem:[%s7504_s26 + $0x8] sm:$0xff] (%p7485_p5)  ;;  %v6640_v39 = vld [vmem:[%s7504_s26 + $0x10] sm:$0xff] (%p7485_p5) }
 0x339   : > { %v7106_v48 = vmin.u32 %v6121_v49, %v6119_v33  ;;  %vm6056_vm8 = vcmp.le.f32.partialorder %v6055_v26, 0.7853982  ;;  %6639 = vst [vmem:[%s10502_s30 + $0x18] sm:$0xff] (%p7485_p5), %v6638_v2  ;;  %6641 = vst [vmem:[%s10502_s30 + $0x30] sm:$0xff] (%p7485_p5), %v6640_v39  ;;  %v6654_v49 = vld [vmem:[%s7504_s26 + $0x48] sm:$0xff] (%p7485_p5)  ;;  %v6668_v15 = vld [vmem:[%s7504_s26 + $0x80] sm:$0xff] (%p7485_p5) }
 0x33a   : > { %v6036_v22 = vsel %vm5953_vm13, %v6035_v42, %v6034_v40  ;;  %v6142_v17 = vsel %vm6057_vm7, %v6141_v28, %v10464_v63  ;;  %v6642_v40 = vld [vmem:[%s7504_s26 + $0x18] sm:$0xff] (%p7485_p5)  ;;  %v6646_v42 = vld [vmem:[%s7504_s26 + $0x28] sm:$0xff] (%p7485_p5)  ;;  %6655 = vst [vmem:[%s10502_s30 + $0xd8] sm:$0xff] (%p7485_p5), %v6654_v49  ;;  %6669 = vst [vmem:[%s10502_s30 + $0x180] sm:$0xff] (%p7485_p5), %v6668_v15 }
 0x33b   : > { %v6039_v52 = vsel %vm5952_vm14, %v10190_v36, %v6036_v22  ;;  %v6123_v44 = vclz %v7106_v48  ;;  %v6144_v60 = vsel %vm6056_vm8, 0, %v6142_v17  ;;  %6643 = vst [vmem:[%s10502_s30 + $0x48] sm:$0xff] (%p7485_p5), %v6642_v40  ;;  %6647 = vst [vmem:[%s10502_s30 + $0x78] sm:$0xff] (%p7485_p5), %v6646_v42  ;;  %v6652_v22 = vld [vmem:[%s7504_s26 + $0x40] sm:$0xff] (%p7485_p5)  ;;  %v6672_v25 = vld [vmem:[%s7504_s26 + $0x90] sm:$0xff] (%p7485_p5) }
 0x33c   : > { %7395 = vcosq.f32 %v6039_v52  ;;  %v6148_v14 = vadd.s32 3, %v6144_v60  ;;  %v6462_v34 = vand.u32 3, %v6144_v60  ;;  %6653 = vst [vmem:[%s10502_s30 + $0xc0] sm:$0xff] (%p7485_p5), %v6652_v22  ;;  %v6660_v48 = vld [vmem:[%s7504_s26 + $0x60] sm:$0xff] (%p7485_p5)  ;;  %6673 = vst [vmem:[%s10502_s30 + $0x1b0] sm:$0xff] (%p7485_p5), %v6672_v25  ;;  %v6718_v28 = vld [vmem:[%s7504_s26 + $0x148] sm:$0xff] (%p7485_p5) }
 0x33d   : > { %7397 = vsinq.f32 %v6039_v52  ;;  %v7107_v19 = vadd.s32 4294967294, %v6123_v44  ;;  %v6656_v52 = vld [vmem:[%s7504_s26 + $0x50] sm:$0xff] (%p7485_p5)  ;;  %6661 = vst [vmem:[%s10502_s30 + $0x120] sm:$0xff] (%p7485_p5), %v6660_v48  ;;  %6719 = vst [vmem:[%s10502_s30 + $0x3d8] sm:$0xff] (%p7485_p5), %v6718_v28  ;;  %v6726_v17 = vld [vmem:[%s7504_s26 + $0x168] sm:$0xff] (%p7485_p5) }
 0x33e   : > { %v6149_v21 = vand.u32 3, %v6148_v14  ;;  %vm6467_vm9 = vcmp.eq.s32.totalorder %v6462_v34, 2  ;;  %vm6464_vm12 = vcmp.eq.s32.totalorder %v6462_v34, 0  ;;  %vm6463_vm14 = vcmp.lt.s32.totalorder %v6462_v34, 2  ;;  %6657 = vst [vmem:[%s10502_s30 + $0xf0] sm:$0xff] (%p7485_p5), %v6656_v52  ;;  %v6664_v44 = vld [vmem:[%s7504_s26 + $0x70] sm:$0xff] (%p7485_p5) }
 0x33f   : > { %vm7108_vm15 = vcmp.lt.s32.totalorder %v7107_v19, 0  ;;  %6665 = vst [vmem:[%s10502_s30 + $0x150] sm:$0xff] (%p7485_p5), %v6664_v44  ;;  %6727 = vst [vmem:[%s10502_s30 + $0x438] sm:$0xff] (%p7485_p5), %v6726_v17  ;;  %v6732_v60 = vld [vmem:[%s7504_s26 + $0x180] sm:$0xff] (%p7485_p5)  ;;  %v6734_v14 = vld [vmem:[%s7504_s26 + $0x188] sm:$0xff] (%p7485_p5) }
 0x340   : > { %v6126_v58 = vsel %vm7108_vm15, 0, %v7107_v19  ;;  %vm6154_vm10 = vcmp.eq.s32.totalorder %v6149_v21, 2  ;;  %vm6151_vm11 = vcmp.eq.s32.totalorder %v6149_v21, 0  ;;  %vm6150_vm13 = vcmp.lt.s32.totalorder %v6149_v21, 2  ;;  %v6666_v19 = vld [vmem:[%s7504_s26 + $0x78] sm:$0xff] (%p7485_p5)  ;;  %v6736_v21 = vld [vmem:[%s7504_s26 + $0x190] sm:$0xff] (%p7485_p5) }
 0x341   : > { %v6127_v56 = vsub.s32 32, %v6126_v58  ;;  %v6128_v6 = vshll.u32 %v6119_v33, %v6126_v58  ;;  %v6131_v62 = vsub.s32 4294967266, %v6126_v58  ;;  %vm6147_vm15 = vweird.f32 %v10324_v10  ;;  %v6650_v33 = vld [vmem:[%s7504_s26 + $0x38] sm:$0xff] (%p7485_p5)  ;;  %6667 = vst [vmem:[%s10502_s30 + $0x168] sm:$0xff] (%p7485_p5), %v6666_v19  ;;  %6733 = vst [vmem:[%s10502_s30 + $0x480] sm:$0xff] (%p7485_p5), %v6732_v60 }
 0x342   : > { %6651 = vst [vmem:[%s10502_s30 + $0xa8] sm:$0xff] (%p7485_p5), %v6650_v33  ;;  %v6674_v58 = vld [vmem:[%s7504_s26 + $0x98] sm:$0xff] (%p7485_p5)  ;;  %6735 = vst [vmem:[%s10502_s30 + $0x498] sm:$0xff] (%p7485_p5), %v6734_v14 }
 0x343   : > { %v6129_v51 = vshrl.u32 %v6111_v4, %v6127_v56  ;;  %v6132_v24 = vadd.s32 127, %v6131_v62  ;;  %v6670_v4 = vld [vmem:[%s7504_s26 + $0x88] sm:$0xff] (%p7485_p5)  ;;  %v6676_v56 = vld [vmem:[%s7504_s26 + $0xa0] sm:$0xff] (%p7485_p5)  ;;  %6675 = vst [vmem:[%s10502_s30 + $0x1c8] sm:$0xff] (%p7485_p5), %v6674_v58  ;;  %v6680_v62 = vld [vmem:[%s7504_s26 + $0xb0] sm:$0xff] (%p7485_p5) }
 0x344   : > { %6671 = vst [vmem:[%s10502_s30 + $0x198] sm:$0xff] (%p7485_p5), %v6670_v4  ;;  %6677 = vst [vmem:[%s10502_s30 + $0x1e0] sm:$0xff] (%p7485_p5), %v6676_v56  ;;  %v6738_v34 = vld [vmem:[%s7504_s26 + $0x198] sm:$0xff] (%p7485_p5) }
 0x345   : > { %v6130_v27 = vor.u32 %v6129_v51, %v6128_v6  ;;  %v6133_v5 = vshll.u32 %v6132_v24, 23  ;;  %v6678_v6 = vld [vmem:[%s7504_s26 + $0xa8] sm:$0xff] (%p7485_p5)  ;;  %6681 = vst [vmem:[%s10502_s30 + $0x210] sm:$0xff] (%p7485_p5), %v6680_v62  ;;  %v6684_v51 = vld [vmem:[%s7504_s26 + $0xc0] sm:$0xff] (%p7485_p5)  ;;  %6737 = vst [vmem:[%s10502_s30 + $0x4b0] sm:$0xff] (%p7485_p5), %v6736_v21 }
 0x346   : > { %v7396_v45 = vpop.eup %7395  ;;  %6679 = vst [vmem:[%s10502_s30 + $0x1f8] sm:$0xff] (%p7485_p5), %v6678_v6  ;;  %v6686_v24 = vld [vmem:[%s7504_s26 + $0xc8] sm:$0xff] (%p7485_p5)  ;;  %6685 = vst [vmem:[%s10502_s30 + $0x240] sm:$0xff] (%p7485_p5), %v6684_v51 }
 0x347   : > { %v7398_v53 = vpop.eup %7397  ;;  %v6051_v46 = vxor.u32 2147483648, %v7396_v45  ;;  %v6134_v8 = vor.u32 4788187, %v6133_v5  ;;  %v6137_v16 = vcvt.s32.f32 %v6130_v27  ;;  %6687 = vst [vmem:[%s10502_s30 + $0x258] sm:$0xff] (%p7485_p5), %v6686_v24  ;;  %v6694_v27 = vld [vmem:[%s7504_s26 + $0xe8] sm:$0xff] (%p7485_p5)  ;;  %v6696_v5 = vld [vmem:[%s7504_s26 + $0xf0] sm:$0xff] (%p7485_p5) }
 0x348   : > { %v6048_v7 = vxor.u32 2147483648, %v7398_v53  ;;  %6695 = vst [vmem:[%s10502_s30 + $0x2b8] sm:$0xff] (%p7485_p5), %v6694_v27  ;;  %6697 = vst [vmem:[%s10502_s30 + $0x2d0] sm:$0xff] (%p7485_p5), %v6696_v5 }
 0x349   : > { %v6052_v13 = vsel %vm6050_vm4, %v6051_v46, %v7398_v53  ;;  %v6366_v57 = vsel %vm6364_vm0, %v6051_v46, %v7398_v53  ;;  %v6135_v0 = vand.u32 2147483647, %v6134_v8  ;;  %v6688_v53 = vld [vmem:[%s7504_s26 + $0xd0] sm:$0xff] (%p7485_p5)  ;;  %v6690_v46 = vld [vmem:[%s7504_s26 + $0xd8] sm:$0xff] (%p7485_p5)  ;;  %6739 = vst [vmem:[%s10502_s30 + $0x4c8] sm:$0xff] (%p7485_p5), %v6738_v34 }
 0x34a   : > { %v6049_v20 = vsel %vm6047_vm5, %v7396_v45, %v6048_v7  ;;  %v6363_v1 = vsel %vm6361_vm3, %v7396_v45, %v6048_v7  ;;  %v6682_v45 = vld [vmem:[%s7504_s26 + $0xb8] sm:$0xff] (%p7485_p5)  ;;  %6689 = vst [vmem:[%s10502_s30 + $0x270] sm:$0xff] (%p7485_p5), %v6688_v53  ;;  %v6692_v7 = vld [vmem:[%s7504_s26 + $0xe0] sm:$0xff] (%p7485_p5)  ;;  %6691 = vst [vmem:[%s10502_s30 + $0x288] sm:$0xff] (%p7485_p5), %v6690_v46 }
 0x34b   : > { %v6053_v43 = vsel %vm6046_vm1, %v6049_v20, %v6052_v13  ;;  %v6367_v59 = vsel %vm6360_vm2, %v6363_v1, %v6366_v57  ;;  %v6138_v32 = vmul.f32 %v6137_v16, %v6135_v0  ;;  %6683 = vst [vmem:[%s10502_s30 + $0x228] sm:$0xff] (%p7485_p5), %v6682_v45  ;;  %6693 = vst [vmem:[%s10502_s30 + $0x2a0] sm:$0xff] (%p7485_p5), %v6692_v7  ;;  %v6698_v13 = vld [vmem:[%s7504_s26 + $0xf8] sm:$0xff] (%p7485_p5)  ;;  %v6700_v57 = vld [vmem:[%s7504_s26 + $0x100] sm:$0xff] (%p7485_p5) }
 0x34c   : > { %v6054_v31 = vsel %vm6043_vm6, nan, %v6053_v43  ;;  %v6368_v61 = vsel %vm6043_vm6, nan, %v6367_v59  ;;  %6699 = vst [vmem:[%s10502_s30 + $0x2e8] sm:$0xff] (%p7485_p5), %v6698_v13  ;;  %6701 = vst [vmem:[%s10502_s30 + $0x300] sm:$0xff] (%p7485_p5), %v6700_v57  ;;  %v6702_v20 = vld [vmem:[%s7504_s26 + $0x108] sm:$0xff] (%p7485_p5)  ;;  %v6704_v8 = vld [vmem:[%s7504_s26 + $0x110] sm:$0xff] (%p7485_p5) }
 0x34d   : > { %7110 = vst [vmem:[%s7504_s26 + $0x1d0] sm:$0xff] %v6054_v31  ;;  %7125 = vst [vmem:[%s7504_s26 + $0x1e8] sm:$0xff] %v6368_v61  ;;  %v6139_v36 = vxor.u32 2147483648, %v6138_v32  ;;  %v6706_v16 = vld [vmem:[%s7504_s26 + $0x118] sm:$0xff] (%p7485_p5)  ;;  %v6708_v1 = vld [vmem:[%s7504_s26 + $0x120] sm:$0xff] (%p7485_p5) }
 0x34e   : > { %6703 = vst [vmem:[%s10502_s30 + $0x318] sm:$0xff] (%p7485_p5), %v6702_v20  ;;  %6705 = vst [vmem:[%s10502_s30 + $0x330] sm:$0xff] (%p7485_p5), %v6704_v8  ;;  %v6710_v43 = vld [vmem:[%s7504_s26 + $0x128] sm:$0xff] (%p7485_p5)  ;;  %v6712_v59 = vld [vmem:[%s7504_s26 + $0x130] sm:$0xff] (%p7485_p5) }
 0x34f   : > { %v6140_v11 = vsel %vm6057_vm7, %v6139_v36, %v6138_v32  ;;  %6707 = vst [vmem:[%s10502_s30 + $0x348] sm:$0xff] (%p7485_p5), %v6706_v16  ;;  %6709 = vst [vmem:[%s10502_s30 + $0x360] sm:$0xff] (%p7485_p5), %v6708_v1  ;;  %v6714_v31 = vld [vmem:[%s7504_s26 + $0x138] sm:$0xff] (%p7485_p5)  ;;  %v6716_v0 = vld [vmem:[%s7504_s26 + $0x140] sm:$0xff] (%p7485_p5) }
 0x350   : > { %v6143_v18 = vsel %vm6056_vm8, %v10324_v10, %v6140_v11  ;;  %v6636_v10 = vld [vmem:[%s7504_s26] sm:$0xff] (%p7485_p5)  ;;  %6711 = vst [vmem:[%s10502_s30 + $0x378] sm:$0xff] (%p7485_p5), %v6710_v43  ;;  %6713 = vst [vmem:[%s10502_s30 + $0x390] sm:$0xff] (%p7485_p5), %v6712_v59  ;;  %v6720_v61 = vld [vmem:[%s7504_s26 + $0x150] sm:$0xff] (%p7485_p5) }
 0x351   : > { %7399 = vcosq.f32 %v6143_v18  ;;  %6637 = vst [vmem:[%s10502_s30] sm:$0xff] (%p7485_p5), %v6636_v10  ;;  %6715 = vst [vmem:[%s10502_s30 + $0x3a8] sm:$0xff] (%p7485_p5), %v6714_v31  ;;  %v6722_v32 = vld [vmem:[%s7504_s26 + $0x158] sm:$0xff] (%p7485_p5)  ;;  %v6724_v36 = vld [vmem:[%s7504_s26 + $0x160] sm:$0xff] (%p7485_p5) }
 0x352   : > { %7401 = vsinq.f32 %v6143_v18  ;;  %6717 = vst [vmem:[%s10502_s30 + $0x3c0] sm:$0xff] (%p7485_p5), %v6716_v0  ;;  %6721 = vst [vmem:[%s10502_s30 + $0x3f0] sm:$0xff] (%p7485_p5), %v6720_v61  ;;  %v6728_v11 = vld [vmem:[%s7504_s26 + $0x170] sm:$0xff] (%p7485_p5)  ;;  %v6730_v18 = vld [vmem:[%s7504_s26 + $0x178] sm:$0xff] (%p7485_p5) }
 0x353   : > { %6723 = vst [vmem:[%s10502_s30 + $0x408] sm:$0xff] (%p7485_p5), %v6722_v32  ;;  %6725 = vst [vmem:[%s10502_s30 + $0x420] sm:$0xff] (%p7485_p5), %v6724_v36 }
 0x354   : > { %6729 = vst [vmem:[%s10502_s30 + $0x450] sm:$0xff] (%p7485_p5), %v6728_v11  ;;  %6731 = vst [vmem:[%s10502_s30 + $0x468] sm:$0xff] (%p7485_p5), %v6730_v18 }
 0x35b   : > { %v7400_v47 = vpop.eup %7399 }
 0x35c   : > { %v7402_v12 = vpop.eup %7401  ;;  %v6155_v26 = vxor.u32 2147483648, %v7400_v47  ;;  %6482 = sbr.rel (!%p7485_p5) target bundleno = 875 (0x36b), region = 66 }
 0x35d   : > { %v6152_v50 = vxor.u32 2147483648, %v7402_v12 }
 0x35e   : > { %v6156_v3 = vsel %vm6154_vm10, %v6155_v26, %v7402_v12  ;;  %v6469_v23 = vsel %vm6467_vm9, %v6155_v26, %v7402_v12  ;;  %v6742_v12 = vld [vmem:[%s7504_s26 + $0x1a8] sm:$0xff] (%p7485_p5)  ;;  %v6744_v26 = vld [vmem:[%s7504_s26 + $0x1b0] sm:$0xff] (%p7485_p5) }
 0x35f   : > { %v6153_v38 = vsel %vm6151_vm11, %v7400_v47, %v6152_v50  ;;  %v6466_v35 = vsel %vm6464_vm12, %v7400_v47, %v6152_v50  ;;  %v6740_v47 = vld [vmem:[%s7504_s26 + $0x1a0] sm:$0xff] (%p7485_p5)  ;;  %6743 = vst [vmem:[%s10502_s30 + $0x4f8] sm:$0xff] (%p7485_p5), %v6742_v12  ;;  %v6746_v50 = vld [vmem:[%s7504_s26 + $0x1b8] sm:$0xff] (%p7485_p5)  ;;  %6745 = vst [vmem:[%s10502_s30 + $0x510] sm:$0xff] (%p7485_p5), %v6744_v26 }
 0x360   : > { %v6157_v29 = vsel %vm6150_vm13, %v6153_v38, %v6156_v3  ;;  %v6470_v55 = vsel %vm6463_vm14, %v6466_v35, %v6469_v23  ;;  %6741 = vst [vmem:[%s10502_s30 + $0x4e0] sm:$0xff] (%p7485_p5), %v6740_v47  ;;  %v6748_v3 = vld [vmem:[%s7504_s26 + $0x1c0] sm:$0xff] (%p7485_p5)  ;;  %6747 = vst [vmem:[%s10502_s30 + $0x528] sm:$0xff] (%p7485_p5), %v6746_v50  ;;  %v6750_v23 = vld [vmem:[%s7504_s26 + $0x1c8] sm:$0xff] (%p7485_p5) }
 0x361   : > { %v6158_v63 = vsel %vm6147_vm15, nan, %v6157_v29  ;;  %v6471_v37 = vsel %vm6147_vm15, nan, %v6470_v55  ;;  %6749 = vst [vmem:[%s10502_s30 + $0x540] sm:$0xff] (%p7485_p5), %v6748_v3  ;;  %v6752_v38 = vld [vmem:[%s7504_s26 + $0x1d0] sm:$0xff] (%p7485_p5)  ;;  %6751 = vst [vmem:[%s10502_s30 + $0x558] sm:$0xff] (%p7485_p5), %v6750_v23  ;;  %v6756_v29 = vld [vmem:[%s7504_s26 + $0x1e0] sm:$0xff] (%p7485_p5) }
 0x362   : > { %7111 = vst [vmem:[%s7504_s26 + $0x1d8] sm:$0xff] %v6158_v63  ;;  %7126 = vst [vmem:[%s7504_s26 + $0x1f0] sm:$0xff] %v6471_v37  ;;  %v6758_v55 = vld [vmem:[%s7504_s26 + $0x1e8] sm:$0xff] (%p7485_p5) }
 0x363   : > { %6753 = vst [vmem:[%s10502_s30 + $0x570] sm:$0xff] %v6752_v38  ;;  %6757 = vst [vmem:[%s10502_s30 + $0x5a0] sm:$0xff] %v6756_v29 }
 0x364   : > { %6759 = vst [vmem:[%s10502_s30 + $0x5b8] sm:$0xff] %v6758_v55 }
 0x369   : > { %v6754_v35 = vld [vmem:[%s7504_s26 + $0x1d8] sm:$0xff]  ;;  %v6760_v63 = vld [vmem:[%s7504_s26 + $0x1f0] sm:$0xff] }
 0x36a   : > { %6755 = vst [vmem:[%s10502_s30 + $0x588] sm:$0xff] %v6754_v35  ;;  %6761 = vst [vmem:[%s10502_s30 + $0x5d0] sm:$0xff] %v6760_v63 }
 0x36b PF: > { %p8_p10 = scmp.ge.s32.totalorder %s7472_s10, 5   ;;  %s10701_s6 = smov %s7433_s7 }
 0x36c   : > { %s10702_s7 = smov %s7483_s13  ;;  %s10703_s8 = smov %s7472_s10 }
 0x36d   :  { %10 = sbr.rel (!%p8_p10) target bundleno = 2 (0x2), region = 155 }

</bundles_post_ra>
